<compile_context>
chip_gen: v6e
topology: v6e:2x2x1
jax: 0.10.0
libtpu: 0.0.40
codegen_flags: <defaults>
</compile_context>

<pallas_src>
import math

import jax
import jax.numpy as jnp
from jax.experimental import pallas as pl
from jax.experimental.pallas import tpu as pltpu

LANE = 128


def _round_up(x, m):
    return ((x + m - 1) // m) * m


# -----------------------------------------------------------------------------
# Fused tiled matmul kernel: C = A @ B with f32 VMEM accumulator and an epilogue
# at k==last:  r = acc [+ shift] [relu] [+ residual]
#   - optional primary ("raw") output = r
#   - optional second ("act") output  = relu(r * act_scale + act_shift)
# -----------------------------------------------------------------------------
def _make_conv_matmul_kernel(has_shift, relu, has_residual, has_act, emit_raw):
    def kernel(*refs):
        it = iter(refs)
        a_ref = next(it)
        b_ref = next(it)
        shift_ref = next(it) if has_shift else None
        res_ref = next(it) if has_residual else None
        if has_act:
            act_scale_ref = next(it)
            act_shift_ref = next(it)
        raw_ref = next(it) if emit_raw else None
        act_ref = next(it) if has_act else None
        acc_ref = next(it)

        @pl.when(pl.program_id(2) == 0)
        def _init():
            acc_ref[...] = jnp.zeros_like(acc_ref)

        acc_ref[...] += jnp.dot(a_ref[...], b_ref[...],
                                preferred_element_type=jnp.float32)

        @pl.when(pl.program_id(2) == pl.num_programs(2) - 1)
        def _finalize():
            r = acc_ref[...]
            if has_shift:
                r = r + shift_ref[...]
            if relu:
                r = jnp.maximum(r, 0.0)
            if has_residual:
                r = r + res_ref[...].astype(jnp.float32)
            if emit_raw:
                raw_ref[...] = r.astype(raw_ref.dtype)
            if has_act:
                y = jnp.maximum(r * act_scale_ref[...] + act_shift_ref[...], 0.0)
                act_ref[...] = y.astype(act_ref.dtype)

    return kernel


def fused_matmul(a, b, *, shift=None, relu=False, residual=None,
                 act_scale=None, act_shift=None, emit_raw=True,
                 out_dtype=jnp.bfloat16):
    """(M, K) @ (K, Np) with K, Np multiples of 128. Returns tuple of outputs."""
    M, K = a.shape
    K2, Np = b.shape
    assert K == K2 and K % LANE == 0 and Np % LANE == 0, (a.shape, b.shape)
    has_shift = shift is not None
    has_residual = residual is not None
    has_act = act_scale is not None
    assert emit_raw or has_act

    # ---- tile selection: always lane-dense, VMEM budget << 16 MiB -----------
    bn = 256 if Np % 256 == 0 else LANE
    bk = LANE
    for cand in (512, 256):
        if K % cand == 0:
            bk = cand
            break
    bm_cap = 1024 if K <= 256 else 512        # big bm for small-K (1x1) matmuls
    bm = bm_cap if M >= bm_cap else _round_up(M, 8)
    Mp = _round_up(M, bm)
    if Mp != M:
        a = jnp.pad(a, ((0, Mp - M), (0, 0)))
        if has_residual:
            residual = jnp.pad(residual, ((0, Mp - M), (0, 0)))

    grid = (Mp // bm, Np // bn, K // bk)

    in_specs = [pl.BlockSpec((bm, bk), lambda i, j, kk: (i, kk)),
                pl.BlockSpec((bk, bn), lambda i, j, kk: (kk, j))]
    operands = [a, b]
    if has_shift:
        in_specs.append(pl.BlockSpec((1, bn), lambda i, j, kk: (0, j)))
        operands.append(shift)
    if has_residual:
        in_specs.append(pl.BlockSpec((bm, bn), lambda i, j, kk: (i, j)))
        operands.append(residual)
    if has_act:
        in_specs += [pl.BlockSpec((1, bn), lambda i, j, kk: (0, j)),
                     pl.BlockSpec((1, bn), lambda i, j, kk: (0, j))]
        operands += [act_scale, act_shift]

    out_shapes, out_specs = [], []
    if emit_raw:
        out_shapes.append(jax.ShapeDtypeStruct((Mp, Np), out_dtype))
        out_specs.append(pl.BlockSpec((bm, bn), lambda i, j, kk: (i, j)))
    if has_act:
        out_shapes.append(jax.ShapeDtypeStruct((Mp, Np), out_dtype))
        out_specs.append(pl.BlockSpec((bm, bn), lambda i, j, kk: (i, j)))

    outs = pl.pallas_call(
        _make_conv_matmul_kernel(has_shift, relu, has_residual, has_act, emit_raw),
        out_shape=tuple(out_shapes),
        grid=grid,
        in_specs=in_specs,
        out_specs=tuple(out_specs),
        scratch_shapes=[pltpu.VMEM((bm, bn), jnp.float32)],
        compiler_params=pltpu.CompilerParams(
            dimension_semantics=("parallel", "parallel", "arbitrary")),
    )(*operands)
    if not isinstance(outs, (tuple, list)):
        outs = (outs,)
    if Mp != M:
        outs = tuple(o[:M] for o in outs)
    return tuple(outs)


# -----------------------------------------------------------------------------
# Conv2d (bias=False) = bf16 im2col + fused tiled Pallas matmul.
# x is channel-padded NHWC (Cl multiple of 128), except the 3-channel stem input.
# -----------------------------------------------------------------------------
def conv2d_nhwc(x, conv, *, shift=None, relu=False, residual=None,
                act_scale=None, act_shift=None, emit_raw=True):
    N, H, W, Cl = x.shape
    k, stride, padding = conv["k"], conv["stride"], conv["padding"]
    OCp = conv["out_cp"]
    Ho = (H + 2 * padding - k) // stride + 1
    Wo = (W + 2 * padding - k) // stride + 1
    xp = jnp.pad(x, ((0, 0), (padding, padding), (padding, padding), (0, 0))) \
        if padding > 0 else x
    if k == 1:
        a = xp[:, ::stride, ::stride, :].reshape(N * Ho * Wo, Cl)
    else:
        cols = [xp[:, dy:dy + stride * Ho:stride, dx:dx + stride * Wo:stride, :]
                for dy in range(k) for dx in range(k)]
        a = jnp.concatenate(cols, axis=-1).reshape(N * Ho * Wo, k * k * Cl)
    Kp = conv["w"].shape[0]
    if a.shape[1] != Kp:                      # only the stem (27 -> 128)
        a = jnp.pad(a, ((0, 0), (0, Kp - a.shape[1])))
    res2d = residual.reshape(N * Ho * Wo, OCp) if residual is not None else None
    outs = fused_matmul(a, conv["w"], shift=shift, relu=relu, residual=res2d,
                        act_scale=act_scale, act_shift=act_shift,
                        emit_raw=emit_raw)
    return [o.reshape(N, Ho, Wo, OCp) for o in outs]


# -----------------------------------------------------------------------------
# Head: global average pool + Linear + log_softmax, batch-tiled, lane-dense.
# -----------------------------------------------------------------------------
def _head_kernel(x_ref, w_ref, b_ref, o_ref):
    pooled = jnp.mean(x_ref[...].astype(jnp.float32), axis=1)          # (bb, Cl)
    logits = jnp.dot(pooled.astype(jnp.bfloat16), w_ref[...],
                     preferred_element_type=jnp.float32) + b_ref[...]
    m = jnp.max(logits, axis=-1, keepdims=True)
    z = logits - m
    o_ref[...] = z - jnp.log(jnp.sum(jnp.exp(z), axis=-1, keepdims=True))


def pallas_head(x_nhwc, w, b, num_classes):
    """x: (N,H,W,Cl) bf16; w: (Cl,NCp) bf16 zero-padded; b: (1,NCp) f32 with -1e9
    on padded classes -> (N, num_classes) f32 log-probs."""
    N, H, W, Cl = x_nhwc.shape
    NCp = w.shape[1]
    x = x_nhwc.reshape(N, H * W, Cl)
    bb = 8
    Nb = _round_up(N, bb)
    if Nb != N:
        x = jnp.pad(x, ((0, Nb - N), (0, 0), (0, 0)))
    out = pl.pallas_call(
        _head_kernel,
        out_shape=jax.ShapeDtypeStruct((Nb, NCp), jnp.float32),
        grid=(Nb // bb,),
        in_specs=[pl.BlockSpec((bb, H * W, Cl), lambda i: (i, 0, 0)),
                  pl.BlockSpec((Cl, NCp), lambda i: (0, 0)),
                  pl.BlockSpec((1, NCp), lambda i: (0, 0))],
        out_specs=pl.BlockSpec((bb, NCp), lambda i: (i, 0)),
        compiler_params=pltpu.CompilerParams(dimension_semantics=("parallel",)),
    )(x, w, b)
    return out[:N, :num_classes]


def _pool_kernel(x_ref, o_ref):
    o_ref[...] = jnp.mean(x_ref[...].astype(jnp.float32), axis=1)


def pallas_global_avgpool(x_nhwc, feat_c):
    N, H, W, Cl = x_nhwc.shape
    x = x_nhwc.reshape(N, H * W, Cl)
    bb = 8
    Nb = _round_up(N, bb)
    if Nb != N:
        x = jnp.pad(x, ((0, Nb - N), (0, 0), (0, 0)))
    out = pl.pallas_call(
        _pool_kernel,
        out_shape=jax.ShapeDtypeStruct((Nb, Cl), jnp.float32),
        grid=(Nb // bb,),
        in_specs=[pl.BlockSpec((bb, H * W, Cl), lambda i: (i, 0, 0))],
        out_specs=pl.BlockSpec((bb, Cl), lambda i: (i, 0)),
        compiler_params=pltpu.CompilerParams(dimension_semantics=("parallel",)),
    )(x)
    return out[:N, :feat_c]


# -----------------------------------------------------------------------------
# Parameters (deterministic, mirrors WideResNet.__init__ shapes & kaiming init).
# Conv weights are stored matmul-ready: (Kp, OCp) with Kp, OCp multiples of 128,
# zero rows/cols on padding.  BN vectors are padded (pad -> scale 0, shift 0).
# -----------------------------------------------------------------------------
def _conv_param(key, in_c, out_c, ksize, stride, *, in_c_layout=None):
    padding = 1 if ksize == 3 else 0
    fan_out = out_c * ksize * ksize
    std = math.sqrt(2.0 / fan_out)
    w = jax.random.normal(key, (out_c, in_c, ksize, ksize), jnp.float32) * std
    cl = in_c_layout if in_c_layout is not None else _round_up(in_c, LANE)
    ocp = _round_up(out_c, LANE)
    w_t = jnp.transpose(w, (2, 3, 1, 0))                    # (kh, kw, in_c, out_c)
    w_t = jnp.pad(w_t, ((0, 0), (0, 0), (0, cl - in_c), (0, ocp - out_c)))
    w_mat = w_t.reshape(ksize * ksize * cl, ocp)
    kp = _round_up(w_mat.shape[0], LANE)
    if kp != w_mat.shape[0]:
        w_mat = jnp.pad(w_mat, ((0, kp - w_mat.shape[0]), (0, 0)))
    return {"w": w_mat, "k": ksize, "stride": int(stride), "padding": padding,
            "in_c": in_c, "out_c": out_c, "out_cp": ocp}


def _bn_params(c):
    return dict(gamma=jnp.ones((c,), jnp.float32),
                beta=jnp.zeros((c,), jnp.float32),
                mean=jnp.zeros((c,), jnp.float32),
                var=jnp.ones((c,), jnp.float32))


def _bn_fold_padded(bn, cp, eps=1e-5):
    c = bn["gamma"].shape[0]
    scale = bn["gamma"] / jnp.sqrt(bn["var"] + eps)
    shift = bn["beta"] - bn["mean"] * scale
    scale = jnp.pad(scale, (0, cp - c)).reshape(1, cp)
    shift = jnp.pad(shift, (0, cp - c)).reshape(1, cp)
    return scale, shift


def init_wide_resnet(key, input_size, depth=10, widen_factor=1, num_classes=10):
    assert (depth - 4) % 6 == 0, "Wide-resnet depth should be 6n+4"
    n = (depth - 4) // 6
    k = widen_factor
    nStages = [16, 16 * k, 32 * k, 64 * k]
    strides = [1, 1, 2, 2]
    keys = iter(jax.random.split(key, 256))

    params = {}
    stem = _conv_param(next(keys), 3, nStages[0], 3, strides[0], in_c_layout=3)
    stem["w"] = stem["w"].astype(jnp.bfloat16)
    params["conv1"] = stem

    size = input_size
    in_c = nStages[0]
    layers = []
    for out_c, layer_stride in zip(nStages[1:], strides[1:]):
        blocks = []
        s = layer_stride
        for _ in range(n):
            in_cp, out_cp = _round_up(in_c, LANE), _round_up(out_c, LANE)
            bn1 = _bn_params(in_c)
            conv1 = _conv_param(next(keys), in_c, out_c, 3, s)
            bn2 = _bn_params(out_c)
            conv2 = _conv_param(next(keys), out_c, out_c, 3, 1)
            s1, t1 = _bn_fold_padded(bn1, in_cp)
            s2, t2 = _bn_fold_padded(bn2, out_cp)
            # Fold bn2's per-channel scale into conv1's weight columns (eval mode);
            # only shift (+ReLU) stays in the conv1 epilogue.
            conv1["w"] = (conv1["w"] * s2).astype(jnp.bfloat16)
            conv2["w"] = conv2["w"].astype(jnp.bfloat16)
            blk = {"bn1_scale": s1, "bn1_shift": t1, "bn2_shift": t2,
                   "conv1": conv1, "conv2": conv2}
            if s != 1 or in_c != out_c:
                sc = _conv_param(next(keys), in_c, out_c, 1, s)
                sc["w"] = sc["w"].astype(jnp.bfloat16)
                blk["shortcut"] = sc
            else:
                blk["shortcut"] = None
            blocks.append(blk)
            in_c = out_c
            size = (size - 1) // s + 1
            s = 1
        layers.append(blocks)
    params["layers"] = layers

    bnF = _bn_params(nStages[3])
    sF, tF = _bn_fold_padded(bnF, _round_up(nStages[3], LANE))
    params["bnF_scale"], params["bnF_shift"] = sF, tF
    params["feat_c"] = nStages[3]

    if num_classes is not None:
        ncp = _round_up(num_classes, LANE)
        cl = _round_up(nStages[3], LANE)
        std = math.sqrt(2.0 / num_classes)    # kaiming fan_out on nn.Linear weight
        w = jax.random.normal(next(keys), (num_classes, nStages[3]), jnp.float32) * std
        w_mat = jnp.zeros((cl, ncp), jnp.float32).at[:nStages[3], :num_classes].set(w.T)
        b = jnp.full((1, ncp), -1e9, jnp.float32).at[0, :num_classes].set(0.0)
        params["linear_w"] = w_mat.astype(jnp.bfloat16)
        params["linear_b"] = b
    return params, size


# -----------------------------------------------------------------------------
# Forward pass
# -----------------------------------------------------------------------------
def wide_basic_forward(raw_x, act_x, blk, next_scale, next_shift, emit_raw):
    # act_x = relu(bn1(raw_x)) was already produced by the previous conv epilogue.
    # conv1 + bn2(shift; scale folded into W) + ReLU, fused.
    h = conv2d_nhwc(act_x, blk["conv1"], shift=blk["bn2_shift"], relu=True)[0]
    # Dropout (rate=0.3) is identity in eval mode.
    sc = raw_x if blk["shortcut"] is None else conv2d_nhwc(raw_x, blk["shortcut"])[0]
    # conv2 + residual add, plus the NEXT block's bn1+ReLU (or bn_final+ReLU)
    # fused as a second output of the same kernel.
    outs = conv2d_nhwc(h, blk["conv2"], residual=sc,
                       act_scale=next_scale, act_shift=next_shift,
                       emit_raw=emit_raw)
    if emit_raw:
        return outs[0], outs[1]
    return None, outs[0]


def wide_resnet_forward(params, x_nchw, num_classes=10):
    x = jnp.transpose(x_nchw, (0, 2, 3, 1)).astype(jnp.bfloat16)   # NHWC, 3 chans
    blocks = [b for layer in params["layers"] for b in layer]

    # Stem conv; block-0's bn1+ReLU fused into its epilogue (dual output:
    # raw feeds block-0's shortcut, act feeds block-0's conv1).
    raw, act = conv2d_nhwc(x, params["conv1"],
                           act_scale=blocks[0]["bn1_scale"],
                           act_shift=blocks[0]["bn1_shift"],
                           emit_raw=True)

    for bi, blk in enumerate(blocks):
        last = bi == len(blocks) - 1
        if last:
            nscale, nshift = params["bnF_scale"], params["bnF_shift"]
        else:
            nscale = blocks[bi + 1]["bn1_scale"]
            nshift = blocks[bi + 1]["bn1_shift"]
        raw, act = wide_basic_forward(raw, act, blk, nscale, nshift,
                                      emit_raw=not last)

    # act == relu(bn_final(.)) in channel-padded NHWC layout.
    if num_classes is None:
        return pallas_global_avgpool(act, params["feat_c"])   # avg_pool + flatten
    return pallas_head(act, params["linear_w"], params["linear_b"], num_classes)


# -----------------------------------------------------------------------------
if __name__ == "__main__":
    key = jax.random.PRNGKey(0)
    pkey, xkey = jax.random.split(key)

    batch, in_ch, input_size = 2, 3, 8
    depth, widen_factor, num_classes = 10, 1, 10     # depth = 6n+4 with n=1

    params, _ = init_wide_resnet(pkey, input_size, depth=depth,
                                 widen_factor=widen_factor,
                                 num_classes=num_classes)
    x = jax.random.normal(xkey, (batch, in_ch, input_size, input_size), jnp.float32)

    fwd = jax.jit(lambda xx: wide_resnet_forward(params, xx, num_classes=num_classes))
    logprobs = jax.block_until_ready(fwd(x))

    assert logprobs.shape == (batch, num_classes), logprobs.shape
    assert bool(jnp.all(jnp.isfinite(logprobs)))
    # log_softmax rows should (approximately) exponentiate-sum to 1.
    row_sums = jnp.sum(jnp.exp(logprobs), axis=1)
    assert bool(jnp.all(jnp.abs(row_sums - 1.0) < 1e-3))

    print("KERNEL_OK")
</pallas_src>

<mosaic_0001>
module attributes {stable_mosaic.version = 11 : i64} {
  func.func @kernel(%arg0: i32, %arg1: i32, %arg2: i32, %arg3: memref<128x128xbf16, #tpu.memory_space<vmem>>, %arg4: memref<128x128xbf16, #tpu.memory_space<vmem>>, %arg5: memref<1x128xf32, #tpu.memory_space<vmem>>, %arg6: memref<1x128xf32, #tpu.memory_space<vmem>>, %arg7: memref<128x128xbf16, #tpu.memory_space<vmem>>, %arg8: memref<128x128xbf16, #tpu.memory_space<vmem>>, %arg9: memref<128x128xf32, #tpu.memory_space<vmem>>) attributes {dimension_semantics = [#tpu.dimension_semantics<parallel>, #tpu.dimension_semantics<parallel>, #tpu.dimension_semantics<arbitrary>], iteration_bounds = array<i64: 1, 1, 1>, scalar_prefetch = 0 : i64, scratch_operands = 1 : i64, tpu.core_type = #tpu.core_type<tc>, window_params = [{transform_indices = @transform_0, window_bounds = array<i64: 128, 128>}, {transform_indices = @transform_1, window_bounds = array<i64: 128, 128>}, {transform_indices = @transform_2, window_bounds = array<i64: 1, 128>}, {transform_indices = @transform_3, window_bounds = array<i64: 1, 128>}, {transform_indices = @transform_4, window_bounds = array<i64: 128, 128>}, {transform_indices = @transform_5, window_bounds = array<i64: 128, 128>}]} {
    %c0_i32 = arith.constant 0 : i32
    %0 = arith.cmpi eq, %arg2, %c0_i32 : i32
    %1 = arith.extui %0 : i1 to i32
    %c0_i32_0 = arith.constant 0 : i32
    %2 = arith.cmpi ne, %1, %c0_i32_0 : i32
    scf.if %2 {
      %cst_10 = arith.constant 0.000000e+00 : f32
      %12 = vector.broadcast %cst_10 : f32 to vector<128x128xf32>
      %c0_11 = arith.constant 0 : index
      %c0_12 = arith.constant 0 : index
      %13 = vector.load %arg9[%c0_11, %c0_12] : memref<128x128xf32, #tpu.memory_space<vmem>>, vector<128x128xf32>
      tpu.vector_store %arg9[%c0_11, %c0_12], %12 {strides = array<i32>} : memref<128x128xf32, #tpu.memory_space<vmem>>, vector<128x128xf32>,
    } else {
    }
    %c0 = arith.constant 0 : index
    %c0_1 = arith.constant 0 : index
    %3 = vector.load %arg9[%c0, %c0_1] : memref<128x128xf32, #tpu.memory_space<vmem>>, vector<128x128xf32>
    %c0_2 = arith.constant 0 : index
    %c0_3 = arith.constant 0 : index
    %4 = vector.load %arg3[%c0_2, %c0_3] : memref<128x128xbf16, #tpu.memory_space<vmem>>, vector<128x128xbf16>
    %c0_4 = arith.constant 0 : index
    %c0_5 = arith.constant 0 : index
    %5 = vector.load %arg4[%c0_4, %c0_5] : memref<128x128xbf16, #tpu.memory_space<vmem>>, vector<128x128xbf16>
    %cst = arith.constant dense<0.000000e+00> : vector<128x128xf32>
    %6 = tpu.matmul %4, %5, %cst {dimension_numbers = #tpu.dot_dimension_numbers<[1], [0], [0], [1], [0, 0, 1, 1], [], []>} : vector<128x128xbf16>, vector<128x128xbf16>, vector<128x128xf32> -> vector<128x128xf32>
    %7 = arith.addf %3, %6 : vector<128x128xf32>
    %c0_6 = arith.constant 0 : index
    %c0_7 = arith.constant 0 : index
    %8 = vector.load %arg9[%c0_6, %c0_7] : memref<128x128xf32, #tpu.memory_space<vmem>>, vector<128x128xf32>
    tpu.vector_store %arg9[%c0_6, %c0_7], %7 {strides = array<i32>} : memref<128x128xf32, #tpu.memory_space<vmem>>, vector<128x128xf32>,
    %c0_i32_8 = arith.constant 0 : i32
    %9 = arith.cmpi eq, %arg2, %c0_i32_8 : i32
    %10 = arith.extui %9 : i1 to i32
    %c0_i32_9 = arith.constant 0 : i32
    %11 = arith.cmpi ne, %10, %c0_i32_9 : i32
    scf.if %11 {
      %c0_10 = arith.constant 0 : index
      %c0_11 = arith.constant 0 : index
      %12 = vector.load %arg9[%c0_10, %c0_11] : memref<128x128xf32, #tpu.memory_space<vmem>>, vector<128x128xf32>
      %13 = arith.truncf %12 : vector<128x128xf32> to vector<128x128xbf16>
      %c0_12 = arith.constant 0 : index
      %c0_13 = arith.constant 0 : index
      %14 = vector.load %arg7[%c0_12, %c0_13] : memref<128x128xbf16, #tpu.memory_space<vmem>>, vector<128x128xbf16>
      tpu.vector_store %arg7[%c0_12, %c0_13], %13 {strides = array<i32>} : memref<128x128xbf16, #tpu.memory_space<vmem>>, vector<128x128xbf16>,
      %c0_14 = arith.constant 0 : index
      %c0_15 = arith.constant 0 : index
      %15 = vector.load %arg5[%c0_14, %c0_15] : memref<1x128xf32, #tpu.memory_space<vmem>>, vector<1x128xf32>
      %16 = vector.broadcast %15 : vector<1x128xf32> to vector<128x128xf32>
      %17 = arith.mulf %12, %16 : vector<128x128xf32>
      %c0_16 = arith.constant 0 : index
      %c0_17 = arith.constant 0 : index
      %18 = vector.load %arg6[%c0_16, %c0_17] : memref<1x128xf32, #tpu.memory_space<vmem>>, vector<1x128xf32>
      %19 = vector.broadcast %18 : vector<1x128xf32> to vector<128x128xf32>
      %20 = arith.addf %17, %19 : vector<128x128xf32>
      %cst_18 = arith.constant 0.000000e+00 : f32
      %21 = vector.broadcast %cst_18 : f32 to vector<128x128xf32>
      %22 = arith.maximumf %20, %21 : vector<128x128xf32>
      %23 = arith.truncf %22 : vector<128x128xf32> to vector<128x128xbf16>
      %c0_19 = arith.constant 0 : index
      %c0_20 = arith.constant 0 : index
      %24 = vector.load %arg8[%c0_19, %c0_20] : memref<128x128xbf16, #tpu.memory_space<vmem>>, vector<128x128xbf16>
      tpu.vector_store %arg8[%c0_19, %c0_20], %23 {strides = array<i32>} : memref<128x128xbf16, #tpu.memory_space<vmem>>, vector<128x128xbf16>,
    } else {
    }
    return
  }
  func.func @transform_0(%arg0: i32, %arg1: i32, %arg2: i32) -> (i32, i32) {
    %c0_i32 = arith.constant 0 : i32
    return %arg0, %arg2 : i32, i32
  }
  func.func @transform_1(%arg0: i32, %arg1: i32, %arg2: i32) -> (i32, i32) {
    %c0_i32 = arith.constant 0 : i32
    return %arg2, %arg1 : i32, i32
  }
  func.func @transform_2(%arg0: i32, %arg1: i32, %arg2: i32) -> (i32, i32) {
    %c0_i32 = arith.constant 0 : i32
    %c0_i32_0 = arith.constant 0 : i32
    return %c0_i32, %arg1 : i32, i32
  }
  func.func @transform_3(%arg0: i32, %arg1: i32, %arg2: i32) -> (i32, i32) {
    %c0_i32 = arith.constant 0 : i32
    %c0_i32_0 = arith.constant 0 : i32
    return %c0_i32, %arg1 : i32, i32
  }
  func.func @transform_4(%arg0: i32, %arg1: i32, %arg2: i32) -> (i32, i32) {
    %c0_i32 = arith.constant 0 : i32
    return %arg0, %arg1 : i32, i32
  }
  func.func @transform_5(%arg0: i32, %arg1: i32, %arg2: i32) -> (i32, i32) {
    %c0_i32 = arith.constant 0 : i32
    return %arg0, %arg1 : i32, i32
  }
}

module attributes {stable_mosaic.version = 11 : i64} {
  func.func @kernel(%arg0: i32, %arg1: i32, %arg2: i32, %arg3: memref<128x128xbf16, #tpu.memory_space<vmem>>, %arg4: memref<128x128xbf16, #tpu.memory_space<vmem>>, %arg5: memref<1x128xf32, #tpu.memory_space<vmem>>, %arg6: memref<128x128xbf16, #tpu.memory_space<vmem>>, %arg7: memref<128x128xf32, #tpu.memory_space<vmem>>) attributes {dimension_semantics = [#tpu.dimension_semantics<parallel>, #tpu.dimension_semantics<parallel>, #tpu.dimension_semantics<arbitrary>], iteration_bounds = array<i64: 1, 1, 9>, scalar_prefetch = 0 : i64, scratch_operands = 1 : i64, tpu.core_type = #tpu.core_type<tc>, window_params = [{transform_indices = @transform_0, window_bounds = array<i64: 128, 128>}, {transform_indices = @transform_1, window_bounds = array<i64: 128, 128>}, {transform_indices = @transform_2, window_bounds = array<i64: 1, 128>}, {transform_indices = @transform_3, window_bounds = array<i64: 128, 128>}]} {
    %c0_i32 = arith.constant 0 : i32
    %0 = arith.cmpi eq, %arg2, %c0_i32 : i32
    %1 = arith.extui %0 : i1 to i32
    %c0_i32_0 = arith.constant 0 : i32
    %2 = arith.cmpi ne, %1, %c0_i32_0 : i32
    scf.if %2 {
      %cst_9 = arith.constant 0.000000e+00 : f32
      %12 = vector.broadcast %cst_9 : f32 to vector<128x128xf32>
      %c0_10 = arith.constant 0 : index
      %c0_11 = arith.constant 0 : index
      %13 = vector.load %arg7[%c0_10, %c0_11] : memref<128x128xf32, #tpu.memory_space<vmem>>, vector<128x128xf32>
      tpu.vector_store %arg7[%c0_10, %c0_11], %12 {strides = array<i32>} : memref<128x128xf32, #tpu.memory_space<vmem>>, vector<128x128xf32>,
    } else {
    }
    %c0 = arith.constant 0 : index
    %c0_1 = arith.constant 0 : index
    %3 = vector.load %arg7[%c0, %c0_1] : memref<128x128xf32, #tpu.memory_space<vmem>>, vector<128x128xf32>
    %c0_2 = arith.constant 0 : index
    %c0_3 = arith.constant 0 : index
    %4 = vector.load %arg3[%c0_2, %c0_3] : memref<128x128xbf16, #tpu.memory_space<vmem>>, vector<128x128xbf16>
    %c0_4 = arith.constant 0 : index
    %c0_5 = arith.constant 0 : index
    %5 = vector.load %arg4[%c0_4, %c0_5] : memref<128x128xbf16, #tpu.memory_space<vmem>>, vector<128x128xbf16>
    %cst = arith.constant dense<0.000000e+00> : vector<128x128xf32>
    %6 = tpu.matmul %4, %5, %cst {dimension_numbers = #tpu.dot_dimension_numbers<[1], [0], [0], [1], [0, 0, 1, 1], [], []>} : vector<128x128xbf16>, vector<128x128xbf16>, vector<128x128xf32> -> vector<128x128xf32>
    %7 = arith.addf %3, %6 : vector<128x128xf32>
    %c0_6 = arith.constant 0 : index
    %c0_7 = arith.constant 0 : index
    %8 = vector.load %arg7[%c0_6, %c0_7] : memref<128x128xf32, #tpu.memory_space<vmem>>, vector<128x128xf32>
    tpu.vector_store %arg7[%c0_6, %c0_7], %7 {strides = array<i32>} : memref<128x128xf32, #tpu.memory_space<vmem>>, vector<128x128xf32>,
    %c8_i32 = arith.constant 8 : i32
    %9 = arith.cmpi eq, %arg2, %c8_i32 : i32
    %10 = arith.extui %9 : i1 to i32
    %c0_i32_8 = arith.constant 0 : i32
    %11 = arith.cmpi ne, %10, %c0_i32_8 : i32
    scf.if %11 {
      %c0_9 = arith.constant 0 : index
      %c0_10 = arith.constant 0 : index
      %12 = vector.load %arg7[%c0_9, %c0_10] : memref<128x128xf32, #tpu.memory_space<vmem>>, vector<128x128xf32>
      %c0_11 = arith.constant 0 : index
      %c0_12 = arith.constant 0 : index
      %13 = vector.load %arg5[%c0_11, %c0_12] : memref<1x128xf32, #tpu.memory_space<vmem>>, vector<1x128xf32>
      %14 = vector.broadcast %13 : vector<1x128xf32> to vector<128x128xf32>
      %15 = arith.addf %12, %14 : vector<128x128xf32>
      %cst_13 = arith.constant 0.000000e+00 : f32
      %16 = vector.broadcast %cst_13 : f32 to vector<128x128xf32>
      %17 = arith.maximumf %15, %16 : vector<128x128xf32>
      %18 = arith.truncf %17 : vector<128x128xf32> to vector<128x128xbf16>
      %c0_14 = arith.constant 0 : index
      %c0_15 = arith.constant 0 : index
      %19 = vector.load %arg6[%c0_14, %c0_15] : memref<128x128xbf16, #tpu.memory_space<vmem>>, vector<128x128xbf16>
      tpu.vector_store %arg6[%c0_14, %c0_15], %18 {strides = array<i32>} : memref<128x128xbf16, #tpu.memory_space<vmem>>, vector<128x128xbf16>,
    } else {
    }
    return
  }
  func.func @transform_0(%arg0: i32, %arg1: i32, %arg2: i32) -> (i32, i32) {
    %c0_i32 = arith.constant 0 : i32
    return %arg0, %arg2 : i32, i32
  }
  func.func @transform_1(%arg0: i32, %arg1: i32, %arg2: i32) -> (i32, i32) {
    %c0_i32 = arith.constant 0 : i32
    return %arg2, %arg1 : i32, i32
  }
  func.func @transform_2(%arg0: i32, %arg1: i32, %arg2: i32) -> (i32, i32) {
    %c0_i32 = arith.constant 0 : i32
    %c0_i32_0 = arith.constant 0 : i32
    return %c0_i32, %arg1 : i32, i32
  }
  func.func @transform_3(%arg0: i32, %arg1: i32, %arg2: i32) -> (i32, i32) {
    %c0_i32 = arith.constant 0 : i32
    return %arg0, %arg1 : i32, i32
  }
}

module attributes {stable_mosaic.version = 11 : i64} {
  func.func @kernel(%arg0: i32, %arg1: i32, %arg2: i32, %arg3: memref<128x128xbf16, #tpu.memory_space<vmem>>, %arg4: memref<128x128xbf16, #tpu.memory_space<vmem>>, %arg5: memref<128x128xbf16, #tpu.memory_space<vmem>>, %arg6: memref<1x128xf32, #tpu.memory_space<vmem>>, %arg7: memref<1x128xf32, #tpu.memory_space<vmem>>, %arg8: memref<128x128xbf16, #tpu.memory_space<vmem>>, %arg9: memref<128x128xbf16, #tpu.memory_space<vmem>>, %arg10: memref<128x128xf32, #tpu.memory_space<vmem>>) attributes {dimension_semantics = [#tpu.dimension_semantics<parallel>, #tpu.dimension_semantics<parallel>, #tpu.dimension_semantics<arbitrary>], iteration_bounds = array<i64: 1, 1, 9>, scalar_prefetch = 0 : i64, scratch_operands = 1 : i64, tpu.core_type = #tpu.core_type<tc>, window_params = [{transform_indices = @transform_0, window_bounds = array<i64: 128, 128>}, {transform_indices = @transform_1, window_bounds = array<i64: 128, 128>}, {transform_indices = @transform_2, window_bounds = array<i64: 128, 128>}, {transform_indices = @transform_3, window_bounds = array<i64: 1, 128>}, {transform_indices = @transform_4, window_bounds = array<i64: 1, 128>}, {transform_indices = @transform_5, window_bounds = array<i64: 128, 128>}, {transform_indices = @transform_6, window_bounds = array<i64: 128, 128>}]} {
    %c0_i32 = arith.constant 0 : i32
    %0 = arith.cmpi eq, %arg2, %c0_i32 : i32
    %1 = arith.extui %0 : i1 to i32
    %c0_i32_0 = arith.constant 0 : i32
    %2 = arith.cmpi ne, %1, %c0_i32_0 : i32
    scf.if %2 {
      %cst_9 = arith.constant 0.000000e+00 : f32
      %12 = vector.broadcast %cst_9 : f32 to vector<128x128xf32>
      %c0_10 = arith.constant 0 : index
      %c0_11 = arith.constant 0 : index
      %13 = vector.load %arg10[%c0_10, %c0_11] : memref<128x128xf32, #tpu.memory_space<vmem>>, vector<128x128xf32>
      tpu.vector_store %arg10[%c0_10, %c0_11], %12 {strides = array<i32>} : memref<128x128xf32, #tpu.memory_space<vmem>>, vector<128x128xf32>,
    } else {
    }
    %c0 = arith.constant 0 : index
    %c0_1 = arith.constant 0 : index
    %3 = vector.load %arg10[%c0, %c0_1] : memref<128x128xf32, #tpu.memory_space<vmem>>, vector<128x128xf32>
    %c0_2 = arith.constant 0 : index
    %c0_3 = arith.constant 0 : index
    %4 = vector.load %arg3[%c0_2, %c0_3] : memref<128x128xbf16, #tpu.memory_space<vmem>>, vector<128x128xbf16>
    %c0_4 = arith.constant 0 : index
    %c0_5 = arith.constant 0 : index
    %5 = vector.load %arg4[%c0_4, %c0_5] : memref<128x128xbf16, #tpu.memory_space<vmem>>, vector<128x128xbf16>
    %cst = arith.constant dense<0.000000e+00> : vector<128x128xf32>
    %6 = tpu.matmul %4, %5, %cst {dimension_numbers = #tpu.dot_dimension_numbers<[1], [0], [0], [1], [0, 0, 1, 1], [], []>} : vector<128x128xbf16>, vector<128x128xbf16>, vector<128x128xf32> -> vector<128x128xf32>
    %7 = arith.addf %3, %6 : vector<128x128xf32>
    %c0_6 = arith.constant 0 : index
    %c0_7 = arith.constant 0 : index
    %8 = vector.load %arg10[%c0_6, %c0_7] : memref<128x128xf32, #tpu.memory_space<vmem>>, vector<128x128xf32>
    tpu.vector_store %arg10[%c0_6, %c0_7], %7 {strides = array<i32>} : memref<128x128xf32, #tpu.memory_space<vmem>>, vector<128x128xf32>,
    %c8_i32 = arith.constant 8 : i32
    %9 = arith.cmpi eq, %arg2, %c8_i32 : i32
    %10 = arith.extui %9 : i1 to i32
    %c0_i32_8 = arith.constant 0 : i32
    %11 = arith.cmpi ne, %10, %c0_i32_8 : i32
    scf.if %11 {
      %c0_9 = arith.constant 0 : index
      %c0_10 = arith.constant 0 : index
      %12 = vector.load %arg10[%c0_9, %c0_10] : memref<128x128xf32, #tpu.memory_space<vmem>>, vector<128x128xf32>
      %c0_11 = arith.constant 0 : index
      %c0_12 = arith.constant 0 : index
      %13 = vector.load %arg5[%c0_11, %c0_12] : memref<128x128xbf16, #tpu.memory_space<vmem>>, vector<128x128xbf16>
      %14 = arith.extf %13 : vector<128x128xbf16> to vector<128x128xf32>
      %15 = arith.addf %12, %14 : vector<128x128xf32>
      %16 = arith.truncf %15 : vector<128x128xf32> to vector<128x128xbf16>
      %c0_13 = arith.constant 0 : index
      %c0_14 = arith.constant 0 : index
      %17 = vector.load %arg8[%c0_13, %c0_14] : memref<128x128xbf16, #tpu.memory_space<vmem>>, vector<128x128xbf16>
      tpu.vector_store %arg8[%c0_13, %c0_14], %16 {strides = array<i32>} : memref<128x128xbf16, #tpu.memory_space<vmem>>, vector<128x128xbf16>,
      %c0_15 = arith.constant 0 : index
      %c0_16 = arith.constant 0 : index
      %18 = vector.load %arg6[%c0_15, %c0_16] : memref<1x128xf32, #tpu.memory_space<vmem>>, vector<1x128xf32>
      %19 = vector.broadcast %18 : vector<1x128xf32> to vector<128x128xf32>
      %20 = arith.mulf %15, %19 : vector<128x128xf32>
      %c0_17 = arith.constant 0 : index
      %c0_18 = arith.constant 0 : index
      %21 = vector.load %arg7[%c0_17, %c0_18] : memref<1x128xf32, #tpu.memory_space<vmem>>, vector<1x128xf32>
      %22 = vector.broadcast %21 : vector<1x128xf32> to vector<128x128xf32>
      %23 = arith.addf %20, %22 : vector<128x128xf32>
      %cst_19 = arith.constant 0.000000e+00 : f32
      %24 = vector.broadcast %cst_19 : f32 to vector<128x128xf32>
      %25 = arith.maximumf %23, %24 : vector<128x128xf32>
      %26 = arith.truncf %25 : vector<128x128xf32> to vector<128x128xbf16>
      %c0_20 = arith.constant 0 : index
      %c0_21 = arith.constant 0 : index
      %27 = vector.load %arg9[%c0_20, %c0_21] : memref<128x128xbf16, #tpu.memory_space<vmem>>, vector<128x128xbf16>
      tpu.vector_store %arg9[%c0_20, %c0_21], %26 {strides = array<i32>} : memref<128x128xbf16, #tpu.memory_space<vmem>>, vector<128x128xbf16>,
    } else {
    }
    return
  }
  func.func @transform_0(%arg0: i32, %arg1: i32, %arg2: i32) -> (i32, i32) {
    %c0_i32 = arith.constant 0 : i32
    return %arg0, %arg2 : i32, i32
  }
  func.func @transform_1(%arg0: i32, %arg1: i32, %arg2: i32) -> (i32, i32) {
    %c0_i32 = arith.constant 0 : i32
    return %arg2, %arg1 : i32, i32
  }
  func.func @transform_2(%arg0: i32, %arg1: i32, %arg2: i32) -> (i32, i32) {
    %c0_i32 = arith.constant 0 : i32
    return %arg0, %arg1 : i32, i32
  }
  func.func @transform_3(%arg0: i32, %arg1: i32, %arg2: i32) -> (i32, i32) {
    %c0_i32 = arith.constant 0 : i32
    %c0_i32_0 = arith.constant 0 : i32
    return %c0_i32, %arg1 : i32, i32
  }
  func.func @transform_4(%arg0: i32, %arg1: i32, %arg2: i32) -> (i32, i32) {
    %c0_i32 = arith.constant 0 : i32
    %c0_i32_0 = arith.constant 0 : i32
    return %c0_i32, %arg1 : i32, i32
  }
  func.func @transform_5(%arg0: i32, %arg1: i32, %arg2: i32) -> (i32, i32) {
    %c0_i32 = arith.constant 0 : i32
    return %arg0, %arg1 : i32, i32
  }
  func.func @transform_6(%arg0: i32, %arg1: i32, %arg2: i32) -> (i32, i32) {
    %c0_i32 = arith.constant 0 : i32
    return %arg0, %arg1 : i32, i32
  }
}

module attributes {stable_mosaic.version = 11 : i64} {
  func.func @kernel(%arg0: i32, %arg1: i32, %arg2: i32, %arg3: memref<32x128xbf16, #tpu.memory_space<vmem>>, %arg4: memref<128x128xbf16, #tpu.memory_space<vmem>>, %arg5: memref<32x128xbf16, #tpu.memory_space<vmem>>, %arg6: memref<32x128xf32, #tpu.memory_space<vmem>>) attributes {dimension_semantics = [#tpu.dimension_semantics<parallel>, #tpu.dimension_semantics<parallel>, #tpu.dimension_semantics<arbitrary>], iteration_bounds = array<i64: 1, 1, 1>, scalar_prefetch = 0 : i64, scratch_operands = 1 : i64, tpu.core_type = #tpu.core_type<tc>, window_params = [{transform_indices = @transform_0, window_bounds = array<i64: 32, 128>}, {transform_indices = @transform_1, window_bounds = array<i64: 128, 128>}, {transform_indices = @transform_2, window_bounds = array<i64: 32, 128>}]} {
    %c0_i32 = arith.constant 0 : i32
    %0 = arith.cmpi eq, %arg2, %c0_i32 : i32
    %1 = arith.extui %0 : i1 to i32
    %c0_i32_0 = arith.constant 0 : i32
    %2 = arith.cmpi ne, %1, %c0_i32_0 : i32
    scf.if %2 {
      %cst_10 = arith.constant 0.000000e+00 : f32
      %12 = vector.broadcast %cst_10 : f32 to vector<32x128xf32>
      %c0_11 = arith.constant 0 : index
      %c0_12 = arith.constant 0 : index
      %13 = vector.load %arg6[%c0_11, %c0_12] : memref<32x128xf32, #tpu.memory_space<vmem>>, vector<32x128xf32>
      tpu.vector_store %arg6[%c0_11, %c0_12], %12 {strides = array<i32>} : memref<32x128xf32, #tpu.memory_space<vmem>>, vector<32x128xf32>,
    } else {
    }
    %c0 = arith.constant 0 : index
    %c0_1 = arith.constant 0 : index
    %3 = vector.load %arg6[%c0, %c0_1] : memref<32x128xf32, #tpu.memory_space<vmem>>, vector<32x128xf32>
    %c0_2 = arith.constant 0 : index
    %c0_3 = arith.constant 0 : index
    %4 = vector.load %arg3[%c0_2, %c0_3] : memref<32x128xbf16, #tpu.memory_space<vmem>>, vector<32x128xbf16>
    %c0_4 = arith.constant 0 : index
    %c0_5 = arith.constant 0 : index
    %5 = vector.load %arg4[%c0_4, %c0_5] : memref<128x128xbf16, #tpu.memory_space<vmem>>, vector<128x128xbf16>
    %cst = arith.constant dense<0.000000e+00> : vector<32x128xf32>
    %6 = tpu.matmul %4, %5, %cst {dimension_numbers = #tpu.dot_dimension_numbers<[1], [0], [0], [1], [0, 0, 1, 1], [], []>} : vector<32x128xbf16>, vector<128x128xbf16>, vector<32x128xf32> -> vector<32x128xf32>
    %7 = arith.addf %3, %6 : vector<32x128xf32>
    %c0_6 = arith.constant 0 : index
    %c0_7 = arith.constant 0 : index
    %8 = vector.load %arg6[%c0_6, %c0_7] : memref<32x128xf32, #tpu.memory_space<vmem>>, vector<32x128xf32>
    tpu.vector_store %arg6[%c0_6, %c0_7], %7 {strides = array<i32>} : memref<32x128xf32, #tpu.memory_space<vmem>>, vector<32x128xf32>,
    %c0_i32_8 = arith.constant 0 : i32
    %9 = arith.cmpi eq, %arg2, %c0_i32_8 : i32
    %10 = arith.extui %9 : i1 to i32
    %c0_i32_9 = arith.constant 0 : i32
    %11 = arith.cmpi ne, %10, %c0_i32_9 : i32
    scf.if %11 {
      %c0_10 = arith.constant 0 : index
      %c0_11 = arith.constant 0 : index
      %12 = vector.load %arg6[%c0_10, %c0_11] : memref<32x128xf32, #tpu.memory_space<vmem>>, vector<32x128xf32>
      %13 = arith.truncf %12 : vector<32x128xf32> to vector<32x128xbf16>
      %c0_12 = arith.constant 0 : index
      %c0_13 = arith.constant 0 : index
      %14 = vector.load %arg5[%c0_12, %c0_13] : memref<32x128xbf16, #tpu.memory_space<vmem>>, vector<32x128xbf16>
      tpu.vector_store %arg5[%c0_12, %c0_13], %13 {strides = array<i32>} : memref<32x128xbf16, #tpu.memory_space<vmem>>, vector<32x128xbf16>,
    } else {
    }
    return
  }
  func.func @transform_0(%arg0: i32, %arg1: i32, %arg2: i32) -> (i32, i32) {
    %c0_i32 = arith.constant 0 : i32
    return %arg0, %arg2 : i32, i32
  }
  func.func @transform_1(%arg0: i32, %arg1: i32, %arg2: i32) -> (i32, i32) {
    %c0_i32 = arith.constant 0 : i32
    return %arg2, %arg1 : i32, i32
  }
  func.func @transform_2(%arg0: i32, %arg1: i32, %arg2: i32) -> (i32, i32) {
    %c0_i32 = arith.constant 0 : i32
    return %arg0, %arg1 : i32, i32
  }
}

module attributes {stable_mosaic.version = 11 : i64} {
  func.func @kernel(%arg0: i32, %arg1: i32, %arg2: i32, %arg3: memref<32x128xbf16, #tpu.memory_space<vmem>>, %arg4: memref<128x128xbf16, #tpu.memory_space<vmem>>, %arg5: memref<1x128xf32, #tpu.memory_space<vmem>>, %arg6: memref<32x128xbf16, #tpu.memory_space<vmem>>, %arg7: memref<32x128xf32, #tpu.memory_space<vmem>>) attributes {dimension_semantics = [#tpu.dimension_semantics<parallel>, #tpu.dimension_semantics<parallel>, #tpu.dimension_semantics<arbitrary>], iteration_bounds = array<i64: 1, 1, 9>, scalar_prefetch = 0 : i64, scratch_operands = 1 : i64, tpu.core_type = #tpu.core_type<tc>, window_params = [{transform_indices = @transform_0, window_bounds = array<i64: 32, 128>}, {transform_indices = @transform_1, window_bounds = array<i64: 128, 128>}, {transform_indices = @transform_2, window_bounds = array<i64: 1, 128>}, {transform_indices = @transform_3, window_bounds = array<i64: 32, 128>}]} {
    %c0_i32 = arith.constant 0 : i32
    %0 = arith.cmpi eq, %arg2, %c0_i32 : i32
    %1 = arith.extui %0 : i1 to i32
    %c0_i32_0 = arith.constant 0 : i32
    %2 = arith.cmpi ne, %1, %c0_i32_0 : i32
    scf.if %2 {
      %cst_9 = arith.constant 0.000000e+00 : f32
      %12 = vector.broadcast %cst_9 : f32 to vector<32x128xf32>
      %c0_10 = arith.constant 0 : index
      %c0_11 = arith.constant 0 : index
      %13 = vector.load %arg7[%c0_10, %c0_11] : memref<32x128xf32, #tpu.memory_space<vmem>>, vector<32x128xf32>
      tpu.vector_store %arg7[%c0_10, %c0_11], %12 {strides = array<i32>} : memref<32x128xf32, #tpu.memory_space<vmem>>, vector<32x128xf32>,
    } else {
    }
    %c0 = arith.constant 0 : index
    %c0_1 = arith.constant 0 : index
    %3 = vector.load %arg7[%c0, %c0_1] : memref<32x128xf32, #tpu.memory_space<vmem>>, vector<32x128xf32>
    %c0_2 = arith.constant 0 : index
    %c0_3 = arith.constant 0 : index
    %4 = vector.load %arg3[%c0_2, %c0_3] : memref<32x128xbf16, #tpu.memory_space<vmem>>, vector<32x128xbf16>
    %c0_4 = arith.constant 0 : index
    %c0_5 = arith.constant 0 : index
    %5 = vector.load %arg4[%c0_4, %c0_5] : memref<128x128xbf16, #tpu.memory_space<vmem>>, vector<128x128xbf16>
    %cst = arith.constant dense<0.000000e+00> : vector<32x128xf32>
    %6 = tpu.matmul %4, %5, %cst {dimension_numbers = #tpu.dot_dimension_numbers<[1], [0], [0], [1], [0, 0, 1, 1], [], []>} : vector<32x128xbf16>, vector<128x128xbf16>, vector<32x128xf32> -> vector<32x128xf32>
    %7 = arith.addf %3, %6 : vector<32x128xf32>
    %c0_6 = arith.constant 0 : index
    %c0_7 = arith.constant 0 : index
    %8 = vector.load %arg7[%c0_6, %c0_7] : memref<32x128xf32, #tpu.memory_space<vmem>>, vector<32x128xf32>
    tpu.vector_store %arg7[%c0_6, %c0_7], %7 {strides = array<i32>} : memref<32x128xf32, #tpu.memory_space<vmem>>, vector<32x128xf32>,
    %c8_i32 = arith.constant 8 : i32
    %9 = arith.cmpi eq, %arg2, %c8_i32 : i32
    %10 = arith.extui %9 : i1 to i32
    %c0_i32_8 = arith.constant 0 : i32
    %11 = arith.cmpi ne, %10, %c0_i32_8 : i32
    scf.if %11 {
      %c0_9 = arith.constant 0 : index
      %c0_10 = arith.constant 0 : index
      %12 = vector.load %arg7[%c0_9, %c0_10] : memref<32x128xf32, #tpu.memory_space<vmem>>, vector<32x128xf32>
      %c0_11 = arith.constant 0 : index
      %c0_12 = arith.constant 0 : index
      %13 = vector.load %arg5[%c0_11, %c0_12] : memref<1x128xf32, #tpu.memory_space<vmem>>, vector<1x128xf32>
      %14 = vector.broadcast %13 : vector<1x128xf32> to vector<32x128xf32>
      %15 = arith.addf %12, %14 : vector<32x128xf32>
      %cst_13 = arith.constant 0.000000e+00 : f32
      %16 = vector.broadcast %cst_13 : f32 to vector<32x128xf32>
      %17 = arith.maximumf %15, %16 : vector<32x128xf32>
      %18 = arith.truncf %17 : vector<32x128xf32> to vector<32x128xbf16>
      %c0_14 = arith.constant 0 : index
      %c0_15 = arith.constant 0 : index
      %19 = vector.load %arg6[%c0_14, %c0_15] : memref<32x128xbf16, #tpu.memory_space<vmem>>, vector<32x128xbf16>
      tpu.vector_store %arg6[%c0_14, %c0_15], %18 {strides = array<i32>} : memref<32x128xbf16, #tpu.memory_space<vmem>>, vector<32x128xbf16>,
    } else {
    }
    return
  }
  func.func @transform_0(%arg0: i32, %arg1: i32, %arg2: i32) -> (i32, i32) {
    %c0_i32 = arith.constant 0 : i32
    return %arg0, %arg2 : i32, i32
  }
  func.func @transform_1(%arg0: i32, %arg1: i32, %arg2: i32) -> (i32, i32) {
    %c0_i32 = arith.constant 0 : i32
    return %arg2, %arg1 : i32, i32
  }
  func.func @transform_2(%arg0: i32, %arg1: i32, %arg2: i32) -> (i32, i32) {
    %c0_i32 = arith.constant 0 : i32
    %c0_i32_0 = arith.constant 0 : i32
    return %c0_i32, %arg1 : i32, i32
  }
  func.func @transform_3(%arg0: i32, %arg1: i32, %arg2: i32) -> (i32, i32) {
    %c0_i32 = arith.constant 0 : i32
    return %arg0, %arg1 : i32, i32
  }
}

module attributes {stable_mosaic.version = 11 : i64} {
  func.func @kernel(%arg0: i32, %arg1: i32, %arg2: i32, %arg3: memref<32x128xbf16, #tpu.memory_space<vmem>>, %arg4: memref<128x128xbf16, #tpu.memory_space<vmem>>, %arg5: memref<32x128xbf16, #tpu.memory_space<vmem>>, %arg6: memref<1x128xf32, #tpu.memory_space<vmem>>, %arg7: memref<1x128xf32, #tpu.memory_space<vmem>>, %arg8: memref<32x128xbf16, #tpu.memory_space<vmem>>, %arg9: memref<32x128xbf16, #tpu.memory_space<vmem>>, %arg10: memref<32x128xf32, #tpu.memory_space<vmem>>) attributes {dimension_semantics = [#tpu.dimension_semantics<parallel>, #tpu.dimension_semantics<parallel>, #tpu.dimension_semantics<arbitrary>], iteration_bounds = array<i64: 1, 1, 9>, scalar_prefetch = 0 : i64, scratch_operands = 1 : i64, tpu.core_type = #tpu.core_type<tc>, window_params = [{transform_indices = @transform_0, window_bounds = array<i64: 32, 128>}, {transform_indices = @transform_1, window_bounds = array<i64: 128, 128>}, {transform_indices = @transform_2, window_bounds = array<i64: 32, 128>}, {transform_indices = @transform_3, window_bounds = array<i64: 1, 128>}, {transform_indices = @transform_4, window_bounds = array<i64: 1, 128>}, {transform_indices = @transform_5, window_bounds = array<i64: 32, 128>}, {transform_indices = @transform_6, window_bounds = array<i64: 32, 128>}]} {
    %c0_i32 = arith.constant 0 : i32
    %0 = arith.cmpi eq, %arg2, %c0_i32 : i32
    %1 = arith.extui %0 : i1 to i32
    %c0_i32_0 = arith.constant 0 : i32
    %2 = arith.cmpi ne, %1, %c0_i32_0 : i32
    scf.if %2 {
      %cst_9 = arith.constant 0.000000e+00 : f32
      %12 = vector.broadcast %cst_9 : f32 to vector<32x128xf32>
      %c0_10 = arith.constant 0 : index
      %c0_11 = arith.constant 0 : index
      %13 = vector.load %arg10[%c0_10, %c0_11] : memref<32x128xf32, #tpu.memory_space<vmem>>, vector<32x128xf32>
      tpu.vector_store %arg10[%c0_10, %c0_11], %12 {strides = array<i32>} : memref<32x128xf32, #tpu.memory_space<vmem>>, vector<32x128xf32>,
    } else {
    }
    %c0 = arith.constant 0 : index
    %c0_1 = arith.constant 0 : index
    %3 = vector.load %arg10[%c0, %c0_1] : memref<32x128xf32, #tpu.memory_space<vmem>>, vector<32x128xf32>
    %c0_2 = arith.constant 0 : index
    %c0_3 = arith.constant 0 : index
    %4 = vector.load %arg3[%c0_2, %c0_3] : memref<32x128xbf16, #tpu.memory_space<vmem>>, vector<32x128xbf16>
    %c0_4 = arith.constant 0 : index
    %c0_5 = arith.constant 0 : index
    %5 = vector.load %arg4[%c0_4, %c0_5] : memref<128x128xbf16, #tpu.memory_space<vmem>>, vector<128x128xbf16>
    %cst = arith.constant dense<0.000000e+00> : vector<32x128xf32>
    %6 = tpu.matmul %4, %5, %cst {dimension_numbers = #tpu.dot_dimension_numbers<[1], [0], [0], [1], [0, 0, 1, 1], [], []>} : vector<32x128xbf16>, vector<128x128xbf16>, vector<32x128xf32> -> vector<32x128xf32>
    %7 = arith.addf %3, %6 : vector<32x128xf32>
    %c0_6 = arith.constant 0 : index
    %c0_7 = arith.constant 0 : index
    %8 = vector.load %arg10[%c0_6, %c0_7] : memref<32x128xf32, #tpu.memory_space<vmem>>, vector<32x128xf32>
    tpu.vector_store %arg10[%c0_6, %c0_7], %7 {strides = array<i32>} : memref<32x128xf32, #tpu.memory_space<vmem>>, vector<32x128xf32>,
    %c8_i32 = arith.constant 8 : i32
    %9 = arith.cmpi eq, %arg2, %c8_i32 : i32
    %10 = arith.extui %9 : i1 to i32
    %c0_i32_8 = arith.constant 0 : i32
    %11 = arith.cmpi ne, %10, %c0_i32_8 : i32
    scf.if %11 {
      %c0_9 = arith.constant 0 : index
      %c0_10 = arith.constant 0 : index
      %12 = vector.load %arg10[%c0_9, %c0_10] : memref<32x128xf32, #tpu.memory_space<vmem>>, vector<32x128xf32>
      %c0_11 = arith.constant 0 : index
      %c0_12 = arith.constant 0 : index
      %13 = vector.load %arg5[%c0_11, %c0_12] : memref<32x128xbf16, #tpu.memory_space<vmem>>, vector<32x128xbf16>
      %14 = arith.extf %13 : vector<32x128xbf16> to vector<32x128xf32>
      %15 = arith.addf %12, %14 : vector<32x128xf32>
      %16 = arith.truncf %15 : vector<32x128xf32> to vector<32x128xbf16>
      %c0_13 = arith.constant 0 : index
      %c0_14 = arith.constant 0 : index
      %17 = vector.load %arg8[%c0_13, %c0_14] : memref<32x128xbf16, #tpu.memory_space<vmem>>, vector<32x128xbf16>
      tpu.vector_store %arg8[%c0_13, %c0_14], %16 {strides = array<i32>} : memref<32x128xbf16, #tpu.memory_space<vmem>>, vector<32x128xbf16>,
      %c0_15 = arith.constant 0 : index
      %c0_16 = arith.constant 0 : index
      %18 = vector.load %arg6[%c0_15, %c0_16] : memref<1x128xf32, #tpu.memory_space<vmem>>, vector<1x128xf32>
      %19 = vector.broadcast %18 : vector<1x128xf32> to vector<32x128xf32>
      %20 = arith.mulf %15, %19 : vector<32x128xf32>
      %c0_17 = arith.constant 0 : index
      %c0_18 = arith.constant 0 : index
      %21 = vector.load %arg7[%c0_17, %c0_18] : memref<1x128xf32, #tpu.memory_space<vmem>>, vector<1x128xf32>
      %22 = vector.broadcast %21 : vector<1x128xf32> to vector<32x128xf32>
      %23 = arith.addf %20, %22 : vector<32x128xf32>
      %cst_19 = arith.constant 0.000000e+00 : f32
      %24 = vector.broadcast %cst_19 : f32 to vector<32x128xf32>
      %25 = arith.maximumf %23, %24 : vector<32x128xf32>
      %26 = arith.truncf %25 : vector<32x128xf32> to vector<32x128xbf16>
      %c0_20 = arith.constant 0 : index
      %c0_21 = arith.constant 0 : index
      %27 = vector.load %arg9[%c0_20, %c0_21] : memref<32x128xbf16, #tpu.memory_space<vmem>>, vector<32x128xbf16>
      tpu.vector_store %arg9[%c0_20, %c0_21], %26 {strides = array<i32>} : memref<32x128xbf16, #tpu.memory_space<vmem>>, vector<32x128xbf16>,
    } else {
    }
    return
  }
  func.func @transform_0(%arg0: i32, %arg1: i32, %arg2: i32) -> (i32, i32) {
    %c0_i32 = arith.constant 0 : i32
    return %arg0, %arg2 : i32, i32
  }
  func.func @transform_1(%arg0: i32, %arg1: i32, %arg2: i32) -> (i32, i32) {
    %c0_i32 = arith.constant 0 : i32
    return %arg2, %arg1 : i32, i32
  }
  func.func @transform_2(%arg0: i32, %arg1: i32, %arg2: i32) -> (i32, i32) {
    %c0_i32 = arith.constant 0 : i32
    return %arg0, %arg1 : i32, i32
  }
  func.func @transform_3(%arg0: i32, %arg1: i32, %arg2: i32) -> (i32, i32) {
    %c0_i32 = arith.constant 0 : i32
    %c0_i32_0 = arith.constant 0 : i32
    return %c0_i32, %arg1 : i32, i32
  }
  func.func @transform_4(%arg0: i32, %arg1: i32, %arg2: i32) -> (i32, i32) {
    %c0_i32 = arith.constant 0 : i32
    %c0_i32_0 = arith.constant 0 : i32
    return %c0_i32, %arg1 : i32, i32
  }
  func.func @transform_5(%arg0: i32, %arg1: i32, %arg2: i32) -> (i32, i32) {
    %c0_i32 = arith.constant 0 : i32
    return %arg0, %arg1 : i32, i32
  }
  func.func @transform_6(%arg0: i32, %arg1: i32, %arg2: i32) -> (i32, i32) {
    %c0_i32 = arith.constant 0 : i32
    return %arg0, %arg1 : i32, i32
  }
}

module attributes {stable_mosaic.version = 11 : i64} {
  func.func @kernel(%arg0: i32, %arg1: i32, %arg2: i32, %arg3: memref<8x128xbf16, #tpu.memory_space<vmem>>, %arg4: memref<128x128xbf16, #tpu.memory_space<vmem>>, %arg5: memref<8x128xbf16, #tpu.memory_space<vmem>>, %arg6: memref<8x128xf32, #tpu.memory_space<vmem>>) attributes {dimension_semantics = [#tpu.dimension_semantics<parallel>, #tpu.dimension_semantics<parallel>, #tpu.dimension_semantics<arbitrary>], iteration_bounds = array<i64: 1, 1, 1>, scalar_prefetch = 0 : i64, scratch_operands = 1 : i64, tpu.core_type = #tpu.core_type<tc>, window_params = [{transform_indices = @transform_0, window_bounds = array<i64: 8, 128>}, {transform_indices = @transform_1, window_bounds = array<i64: 128, 128>}, {transform_indices = @transform_2, window_bounds = array<i64: 8, 128>}]} {
    %c0_i32 = arith.constant 0 : i32
    %0 = arith.cmpi eq, %arg2, %c0_i32 : i32
    %1 = arith.extui %0 : i1 to i32
    %c0_i32_0 = arith.constant 0 : i32
    %2 = arith.cmpi ne, %1, %c0_i32_0 : i32
    scf.if %2 {
      %cst_10 = arith.constant 0.000000e+00 : f32
      %12 = vector.broadcast %cst_10 : f32 to vector<8x128xf32>
      %c0_11 = arith.constant 0 : index
      %c0_12 = arith.constant 0 : index
      %13 = vector.load %arg6[%c0_11, %c0_12] : memref<8x128xf32, #tpu.memory_space<vmem>>, vector<8x128xf32>
      tpu.vector_store %arg6[%c0_11, %c0_12], %12 {strides = array<i32>} : memref<8x128xf32, #tpu.memory_space<vmem>>, vector<8x128xf32>,
    } else {
    }
    %c0 = arith.constant 0 : index
    %c0_1 = arith.constant 0 : index
    %3 = vector.load %arg6[%c0, %c0_1] : memref<8x128xf32, #tpu.memory_space<vmem>>, vector<8x128xf32>
    %c0_2 = arith.constant 0 : index
    %c0_3 = arith.constant 0 : index
    %4 = vector.load %arg3[%c0_2, %c0_3] : memref<8x128xbf16, #tpu.memory_space<vmem>>, vector<8x128xbf16>
    %c0_4 = arith.constant 0 : index
    %c0_5 = arith.constant 0 : index
    %5 = vector.load %arg4[%c0_4, %c0_5] : memref<128x128xbf16, #tpu.memory_space<vmem>>, vector<128x128xbf16>
    %cst = arith.constant dense<0.000000e+00> : vector<8x128xf32>
    %6 = tpu.matmul %4, %5, %cst {dimension_numbers = #tpu.dot_dimension_numbers<[1], [0], [0], [1], [0, 0, 1, 1], [], []>} : vector<8x128xbf16>, vector<128x128xbf16>, vector<8x128xf32> -> vector<8x128xf32>
    %7 = arith.addf %3, %6 : vector<8x128xf32>
    %c0_6 = arith.constant 0 : index
    %c0_7 = arith.constant 0 : index
    %8 = vector.load %arg6[%c0_6, %c0_7] : memref<8x128xf32, #tpu.memory_space<vmem>>, vector<8x128xf32>
    tpu.vector_store %arg6[%c0_6, %c0_7], %7 {strides = array<i32>} : memref<8x128xf32, #tpu.memory_space<vmem>>, vector<8x128xf32>,
    %c0_i32_8 = arith.constant 0 : i32
    %9 = arith.cmpi eq, %arg2, %c0_i32_8 : i32
    %10 = arith.extui %9 : i1 to i32
    %c0_i32_9 = arith.constant 0 : i32
    %11 = arith.cmpi ne, %10, %c0_i32_9 : i32
    scf.if %11 {
      %c0_10 = arith.constant 0 : index
      %c0_11 = arith.constant 0 : index
      %12 = vector.load %arg6[%c0_10, %c0_11] : memref<8x128xf32, #tpu.memory_space<vmem>>, vector<8x128xf32>
      %13 = arith.truncf %12 : vector<8x128xf32> to vector<8x128xbf16>
      %c0_12 = arith.constant 0 : index
      %c0_13 = arith.constant 0 : index
      %14 = vector.load %arg5[%c0_12, %c0_13] : memref<8x128xbf16, #tpu.memory_space<vmem>>, vector<8x128xbf16>
      tpu.vector_store %arg5[%c0_12, %c0_13], %13 {strides = array<i32>} : memref<8x128xbf16, #tpu.memory_space<vmem>>, vector<8x128xbf16>,
    } else {
    }
    return
  }
  func.func @transform_0(%arg0: i32, %arg1: i32, %arg2: i32) -> (i32, i32) {
    %c0_i32 = arith.constant 0 : i32
    return %arg0, %arg2 : i32, i32
  }
  func.func @transform_1(%arg0: i32, %arg1: i32, %arg2: i32) -> (i32, i32) {
    %c0_i32 = arith.constant 0 : i32
    return %arg2, %arg1 : i32, i32
  }
  func.func @transform_2(%arg0: i32, %arg1: i32, %arg2: i32) -> (i32, i32) {
    %c0_i32 = arith.constant 0 : i32
    return %arg0, %arg1 : i32, i32
  }
}

module attributes {stable_mosaic.version = 11 : i64} {
  func.func @kernel(%arg0: i32, %arg1: i32, %arg2: i32, %arg3: memref<8x128xbf16, #tpu.memory_space<vmem>>, %arg4: memref<128x128xbf16, #tpu.memory_space<vmem>>, %arg5: memref<1x128xf32, #tpu.memory_space<vmem>>, %arg6: memref<8x128xbf16, #tpu.memory_space<vmem>>, %arg7: memref<8x128xf32, #tpu.memory_space<vmem>>) attributes {dimension_semantics = [#tpu.dimension_semantics<parallel>, #tpu.dimension_semantics<parallel>, #tpu.dimension_semantics<arbitrary>], iteration_bounds = array<i64: 1, 1, 9>, scalar_prefetch = 0 : i64, scratch_operands = 1 : i64, tpu.core_type = #tpu.core_type<tc>, window_params = [{transform_indices = @transform_0, window_bounds = array<i64: 8, 128>}, {transform_indices = @transform_1, window_bounds = array<i64: 128, 128>}, {transform_indices = @transform_2, window_bounds = array<i64: 1, 128>}, {transform_indices = @transform_3, window_bounds = array<i64: 8, 128>}]} {
    %c0_i32 = arith.constant 0 : i32
    %0 = arith.cmpi eq, %arg2, %c0_i32 : i32
    %1 = arith.extui %0 : i1 to i32
    %c0_i32_0 = arith.constant 0 : i32
    %2 = arith.cmpi ne, %1, %c0_i32_0 : i32
    scf.if %2 {
      %cst_9 = arith.constant 0.000000e+00 : f32
      %12 = vector.broadcast %cst_9 : f32 to vector<8x128xf32>
      %c0_10 = arith.constant 0 : index
      %c0_11 = arith.constant 0 : index
      %13 = vector.load %arg7[%c0_10, %c0_11] : memref<8x128xf32, #tpu.memory_space<vmem>>, vector<8x128xf32>
      tpu.vector_store %arg7[%c0_10, %c0_11], %12 {strides = array<i32>} : memref<8x128xf32, #tpu.memory_space<vmem>>, vector<8x128xf32>,
    } else {
    }
    %c0 = arith.constant 0 : index
    %c0_1 = arith.constant 0 : index
    %3 = vector.load %arg7[%c0, %c0_1] : memref<8x128xf32, #tpu.memory_space<vmem>>, vector<8x128xf32>
    %c0_2 = arith.constant 0 : index
    %c0_3 = arith.constant 0 : index
    %4 = vector.load %arg3[%c0_2, %c0_3] : memref<8x128xbf16, #tpu.memory_space<vmem>>, vector<8x128xbf16>
    %c0_4 = arith.constant 0 : index
    %c0_5 = arith.constant 0 : index
    %5 = vector.load %arg4[%c0_4, %c0_5] : memref<128x128xbf16, #tpu.memory_space<vmem>>, vector<128x128xbf16>
    %cst = arith.constant dense<0.000000e+00> : vector<8x128xf32>
    %6 = tpu.matmul %4, %5, %cst {dimension_numbers = #tpu.dot_dimension_numbers<[1], [0], [0], [1], [0, 0, 1, 1], [], []>} : vector<8x128xbf16>, vector<128x128xbf16>, vector<8x128xf32> -> vector<8x128xf32>
    %7 = arith.addf %3, %6 : vector<8x128xf32>
    %c0_6 = arith.constant 0 : index
    %c0_7 = arith.constant 0 : index
    %8 = vector.load %arg7[%c0_6, %c0_7] : memref<8x128xf32, #tpu.memory_space<vmem>>, vector<8x128xf32>
    tpu.vector_store %arg7[%c0_6, %c0_7], %7 {strides = array<i32>} : memref<8x128xf32, #tpu.memory_space<vmem>>, vector<8x128xf32>,
    %c8_i32 = arith.constant 8 : i32
    %9 = arith.cmpi eq, %arg2, %c8_i32 : i32
    %10 = arith.extui %9 : i1 to i32
    %c0_i32_8 = arith.constant 0 : i32
    %11 = arith.cmpi ne, %10, %c0_i32_8 : i32
    scf.if %11 {
      %c0_9 = arith.constant 0 : index
      %c0_10 = arith.constant 0 : index
      %12 = vector.load %arg7[%c0_9, %c0_10] : memref<8x128xf32, #tpu.memory_space<vmem>>, vector<8x128xf32>
      %c0_11 = arith.constant 0 : index
      %c0_12 = arith.constant 0 : index
      %13 = vector.load %arg5[%c0_11, %c0_12] : memref<1x128xf32, #tpu.memory_space<vmem>>, vector<1x128xf32>
      %14 = vector.broadcast %13 : vector<1x128xf32> to vector<8x128xf32>
      %15 = arith.addf %12, %14 : vector<8x128xf32>
      %cst_13 = arith.constant 0.000000e+00 : f32
      %16 = vector.broadcast %cst_13 : f32 to vector<8x128xf32>
      %17 = arith.maximumf %15, %16 : vector<8x128xf32>
      %18 = arith.truncf %17 : vector<8x128xf32> to vector<8x128xbf16>
      %c0_14 = arith.constant 0 : index
      %c0_15 = arith.constant 0 : index
      %19 = vector.load %arg6[%c0_14, %c0_15] : memref<8x128xbf16, #tpu.memory_space<vmem>>, vector<8x128xbf16>
      tpu.vector_store %arg6[%c0_14, %c0_15], %18 {strides = array<i32>} : memref<8x128xbf16, #tpu.memory_space<vmem>>, vector<8x128xbf16>,
    } else {
    }
    return
  }
  func.func @transform_0(%arg0: i32, %arg1: i32, %arg2: i32) -> (i32, i32) {
    %c0_i32 = arith.constant 0 : i32
    return %arg0, %arg2 : i32, i32
  }
  func.func @transform_1(%arg0: i32, %arg1: i32, %arg2: i32) -> (i32, i32) {
    %c0_i32 = arith.constant 0 : i32
    return %arg2, %arg1 : i32, i32
  }
  func.func @transform_2(%arg0: i32, %arg1: i32, %arg2: i32) -> (i32, i32) {
    %c0_i32 = arith.constant 0 : i32
    %c0_i32_0 = arith.constant 0 : i32
    return %c0_i32, %arg1 : i32, i32
  }
  func.func @transform_3(%arg0: i32, %arg1: i32, %arg2: i32) -> (i32, i32) {
    %c0_i32 = arith.constant 0 : i32
    return %arg0, %arg1 : i32, i32
  }
}

module attributes {stable_mosaic.version = 11 : i64} {
  func.func @_head_kernel(%arg0: i32, %arg1: memref<8x4x128xbf16, #tpu.memory_space<vmem>>, %arg2: memref<128x128xbf16, #tpu.memory_space<vmem>>, %arg3: memref<1x128xf32, #tpu.memory_space<vmem>>, %arg4: memref<8x128xf32, #tpu.memory_space<vmem>>) attributes {dimension_semantics = [#tpu.dimension_semantics<parallel>], iteration_bounds = array<i64: 1>, scalar_prefetch = 0 : i64, scratch_operands = 0 : i64, tpu.core_type = #tpu.core_type<tc>, window_params = [{transform_indices = @transform_0, window_bounds = array<i64: 8, 4, 128>}, {pipeline_mode = #tpu.pipeline_mode<synchronous>, transform_indices = @transform_1, window_bounds = array<i64: 128, 128>}, {pipeline_mode = #tpu.pipeline_mode<synchronous>, transform_indices = @transform_2, window_bounds = array<i64: 1, 128>}, {transform_indices = @transform_3, window_bounds = array<i64: 8, 128>}]} {
    %c0 = arith.constant 0 : index
    %c0_0 = arith.constant 0 : index
    %c0_1 = arith.constant 0 : index
    %0 = vector.load %arg1[%c0, %c0_0, %c0_1] : memref<8x4x128xbf16, #tpu.memory_space<vmem>>, vector<8x4x128xbf16>
    %1 = arith.extf %0 : vector<8x4x128xbf16> to vector<8x4x128xf32>
    %cst = arith.constant dense<0.000000e+00> : vector<8x128xf32>
    %2 = vector.multi_reduction <add>, %1, %cst [1] : vector<8x4x128xf32> to vector<8x128xf32>
    %cst_2 = arith.constant 4.000000e+00 : f32
    %3 = vector.broadcast %cst_2 : f32 to vector<8x128xf32>
    %4 = arith.divf %2, %3 : vector<8x128xf32>
    %5 = arith.truncf %4 : vector<8x128xf32> to vector<8x128xbf16>
    %c0_3 = arith.constant 0 : index
    %c0_4 = arith.constant 0 : index
    %6 = vector.load %arg2[%c0_3, %c0_4] : memref<128x128xbf16, #tpu.memory_space<vmem>>, vector<128x128xbf16>
    %cst_5 = arith.constant dense<0.000000e+00> : vector<8x128xf32>
    %7 = tpu.matmul %5, %6, %cst_5 {dimension_numbers = #tpu.dot_dimension_numbers<[1], [0], [0], [1], [0, 0, 1, 1], [], []>} : vector<8x128xbf16>, vector<128x128xbf16>, vector<8x128xf32> -> vector<8x128xf32>
    %c0_6 = arith.constant 0 : index
    %c0_7 = arith.constant 0 : index
    %8 = vector.load %arg3[%c0_6, %c0_7] : memref<1x128xf32, #tpu.memory_space<vmem>>, vector<1x128xf32>
    %9 = vector.broadcast %8 : vector<1x128xf32> to vector<8x128xf32>
    %10 = arith.addf %7, %9 : vector<8x128xf32>
    %cst_8 = arith.constant dense<0xFF800000> : vector<8xf32>
    %11 = vector.multi_reduction <maximumf>, %10, %cst_8 [1] : vector<8x128xf32> to vector<8xf32>
    %12 = vector.shape_cast %11 : vector<8xf32> to vector<8x1xf32>
    %13 = vector.broadcast %12 : vector<8x1xf32> to vector<8x128xf32>
    %14 = arith.subf %10, %13 : vector<8x128xf32>
    %15 = math.exp %14 : vector<8x128xf32>
    %cst_9 = arith.constant dense<0.000000e+00> : vector<8xf32>
    %16 = vector.multi_reduction <add>, %15, %cst_9 [1] : vector<8x128xf32> to vector<8xf32>
    %17 = vector.shape_cast %16 : vector<8xf32> to vector<8x1xf32>
    %18 = math.log %17 : vector<8x1xf32>
    %19 = vector.broadcast %18 : vector<8x1xf32> to vector<8x128xf32>
    %20 = arith.subf %14, %19 : vector<8x128xf32>
    %c0_10 = arith.constant 0 : index
    %c0_11 = arith.constant 0 : index
    %21 = vector.load %arg4[%c0_10, %c0_11] : memref<8x128xf32, #tpu.memory_space<vmem>>, vector<8x128xf32>
    tpu.vector_store %arg4[%c0_10, %c0_11], %20 {strides = array<i32>} : memref<8x128xf32, #tpu.memory_space<vmem>>, vector<8x128xf32>,
    return
  }
  func.func @transform_0(%arg0: i32) -> (i32, i32, i32) {
    %c0_i32 = arith.constant 0 : i32
    %c0_i32_0 = arith.constant 0 : i32
    %c0_i32_1 = arith.constant 0 : i32
    return %arg0, %c0_i32, %c0_i32_0 : i32, i32, i32
  }
  func.func @transform_1(%arg0: i32) -> (i32, i32) {
    %c0_i32 = arith.constant 0 : i32
    %c0_i32_0 = arith.constant 0 : i32
    %c0_i32_1 = arith.constant 0 : i32
    return %c0_i32, %c0_i32_0 : i32, i32
  }
  func.func @transform_2(%arg0: i32) -> (i32, i32) {
    %c0_i32 = arith.constant 0 : i32
    %c0_i32_0 = arith.constant 0 : i32
    %c0_i32_1 = arith.constant 0 : i32
    return %c0_i32, %c0_i32_0 : i32, i32
  }
  func.func @transform_3(%arg0: i32) -> (i32, i32) {
    %c0_i32 = arith.constant 0 : i32
    %c0_i32_0 = arith.constant 0 : i32
    return %arg0, %c0_i32 : i32, i32
  }
}

module attributes {stable_mosaic.version = 11 : i64} {
  func.func @kernel(%arg0: i32, %arg1: i32, %arg2: i32, %arg3: memref<8x128xbf16, #tpu.memory_space<vmem>>, %arg4: memref<128x128xbf16, #tpu.memory_space<vmem>>, %arg5: memref<8x128xbf16, #tpu.memory_space<vmem>>, %arg6: memref<1x128xf32, #tpu.memory_space<vmem>>, %arg7: memref<1x128xf32, #tpu.memory_space<vmem>>, %arg8: memref<8x128xbf16, #tpu.memory_space<vmem>>, %arg9: memref<8x128xf32, #tpu.memory_space<vmem>>) attributes {dimension_semantics = [#tpu.dimension_semantics<parallel>, #tpu.dimension_semantics<parallel>, #tpu.dimension_semantics<arbitrary>], iteration_bounds = array<i64: 1, 1, 9>, scalar_prefetch = 0 : i64, scratch_operands = 1 : i64, tpu.core_type = #tpu.core_type<tc>, window_params = [{transform_indices = @transform_0, window_bounds = array<i64: 8, 128>}, {transform_indices = @transform_1, window_bounds = array<i64: 128, 128>}, {transform_indices = @transform_2, window_bounds = array<i64: 8, 128>}, {transform_indices = @transform_3, window_bounds = array<i64: 1, 128>}, {transform_indices = @transform_4, window_bounds = array<i64: 1, 128>}, {transform_indices = @transform_5, window_bounds = array<i64: 8, 128>}]} {
    %c0_i32 = arith.constant 0 : i32
    %0 = arith.cmpi eq, %arg2, %c0_i32 : i32
    %1 = arith.extui %0 : i1 to i32
    %c0_i32_0 = arith.constant 0 : i32
    %2 = arith.cmpi ne, %1, %c0_i32_0 : i32
    scf.if %2 {
      %cst_9 = arith.constant 0.000000e+00 : f32
      %12 = vector.broadcast %cst_9 : f32 to vector<8x128xf32>
      %c0_10 = arith.constant 0 : index
      %c0_11 = arith.constant 0 : index
      %13 = vector.load %arg9[%c0_10, %c0_11] : memref<8x128xf32, #tpu.memory_space<vmem>>, vector<8x128xf32>
      tpu.vector_store %arg9[%c0_10, %c0_11], %12 {strides = array<i32>} : memref<8x128xf32, #tpu.memory_space<vmem>>, vector<8x128xf32>,
    } else {
    }
    %c0 = arith.constant 0 : index
    %c0_1 = arith.constant 0 : index
    %3 = vector.load %arg9[%c0, %c0_1] : memref<8x128xf32, #tpu.memory_space<vmem>>, vector<8x128xf32>
    %c0_2 = arith.constant 0 : index
    %c0_3 = arith.constant 0 : index
    %4 = vector.load %arg3[%c0_2, %c0_3] : memref<8x128xbf16, #tpu.memory_space<vmem>>, vector<8x128xbf16>
    %c0_4 = arith.constant 0 : index
    %c0_5 = arith.constant 0 : index
    %5 = vector.load %arg4[%c0_4, %c0_5] : memref<128x128xbf16, #tpu.memory_space<vmem>>, vector<128x128xbf16>
    %cst = arith.constant dense<0.000000e+00> : vector<8x128xf32>
    %6 = tpu.matmul %4, %5, %cst {dimension_numbers = #tpu.dot_dimension_numbers<[1], [0], [0], [1], [0, 0, 1, 1], [], []>} : vector<8x128xbf16>, vector<128x128xbf16>, vector<8x128xf32> -> vector<8x128xf32>
    %7 = arith.addf %3, %6 : vector<8x128xf32>
    %c0_6 = arith.constant 0 : index
    %c0_7 = arith.constant 0 : index
    %8 = vector.load %arg9[%c0_6, %c0_7] : memref<8x128xf32, #tpu.memory_space<vmem>>, vector<8x128xf32>
    tpu.vector_store %arg9[%c0_6, %c0_7], %7 {strides = array<i32>} : memref<8x128xf32, #tpu.memory_space<vmem>>, vector<8x128xf32>,
    %c8_i32 = arith.constant 8 : i32
    %9 = arith.cmpi eq, %arg2, %c8_i32 : i32
    %10 = arith.extui %9 : i1 to i32
    %c0_i32_8 = arith.constant 0 : i32
    %11 = arith.cmpi ne, %10, %c0_i32_8 : i32
    scf.if %11 {
      %c0_9 = arith.constant 0 : index
      %c0_10 = arith.constant 0 : index
      %12 = vector.load %arg9[%c0_9, %c0_10] : memref<8x128xf32, #tpu.memory_space<vmem>>, vector<8x128xf32>
      %c0_11 = arith.constant 0 : index
      %c0_12 = arith.constant 0 : index
      %13 = vector.load %arg5[%c0_11, %c0_12] : memref<8x128xbf16, #tpu.memory_space<vmem>>, vector<8x128xbf16>
      %14 = arith.extf %13 : vector<8x128xbf16> to vector<8x128xf32>
      %15 = arith.addf %12, %14 : vector<8x128xf32>
      %c0_13 = arith.constant 0 : index
      %c0_14 = arith.constant 0 : index
      %16 = vector.load %arg6[%c0_13, %c0_14] : memref<1x128xf32, #tpu.memory_space<vmem>>, vector<1x128xf32>
      %17 = vector.broadcast %16 : vector<1x128xf32> to vector<8x128xf32>
      %18 = arith.mulf %15, %17 : vector<8x128xf32>
      %c0_15 = arith.constant 0 : index
      %c0_16 = arith.constant 0 : index
      %19 = vector.load %arg7[%c0_15, %c0_16] : memref<1x128xf32, #tpu.memory_space<vmem>>, vector<1x128xf32>
      %20 = vector.broadcast %19 : vector<1x128xf32> to vector<8x128xf32>
      %21 = arith.addf %18, %20 : vector<8x128xf32>
      %cst_17 = arith.constant 0.000000e+00 : f32
      %22 = vector.broadcast %cst_17 : f32 to vector<8x128xf32>
      %23 = arith.maximumf %21, %22 : vector<8x128xf32>
      %24 = arith.truncf %23 : vector<8x128xf32> to vector<8x128xbf16>
      %c0_18 = arith.constant 0 : index
      %c0_19 = arith.constant 0 : index
      %25 = vector.load %arg8[%c0_18, %c0_19] : memref<8x128xbf16, #tpu.memory_space<vmem>>, vector<8x128xbf16>
      tpu.vector_store %arg8[%c0_18, %c0_19], %24 {strides = array<i32>} : memref<8x128xbf16, #tpu.memory_space<vmem>>, vector<8x128xbf16>,
    } else {
    }
    return
  }
  func.func @transform_0(%arg0: i32, %arg1: i32, %arg2: i32) -> (i32, i32) {
    %c0_i32 = arith.constant 0 : i32
    return %arg0, %arg2 : i32, i32
  }
  func.func @transform_1(%arg0: i32, %arg1: i32, %arg2: i32) -> (i32, i32) {
    %c0_i32 = arith.constant 0 : i32
    return %arg2, %arg1 : i32, i32
  }
  func.func @transform_2(%arg0: i32, %arg1: i32, %arg2: i32) -> (i32, i32) {
    %c0_i32 = arith.constant 0 : i32
    return %arg0, %arg1 : i32, i32
  }
  func.func @transform_3(%arg0: i32, %arg1: i32, %arg2: i32) -> (i32, i32) {
    %c0_i32 = arith.constant 0 : i32
    %c0_i32_0 = arith.constant 0 : i32
    return %c0_i32, %arg1 : i32, i32
  }
  func.func @transform_4(%arg0: i32, %arg1: i32, %arg2: i32) -> (i32, i32) {
    %c0_i32 = arith.constant 0 : i32
    %c0_i32_0 = arith.constant 0 : i32
    return %c0_i32, %arg1 : i32, i32
  }
  func.func @transform_5(%arg0: i32, %arg1: i32, %arg2: i32) -> (i32, i32) {
    %c0_i32 = arith.constant 0 : i32
    return %arg0, %arg1 : i32, i32
  }
}

</mosaic_0001>

<bundles_post_ra>
// kernel: _lambda_.10
= control target key start
LH: loop header
LB: loop body
LE: loop exit
PB: predicated region body
PF: predicated region fallthrough
CT: control target
= control target key end

     0   :  { %s986_s1 = inlined_call_operand.vmem [shape: bf16[128,128], index: 1, kind: input, shape index: {}]   ;;  %s987_s0 = inlined_call_operand.vmem [shape: bf16[128,128], index: 0, kind: input, shape index: {}]   ;;  %s988_s2 = inlined_call_operand.vmem [shape: f32[1,128], index: 2, kind: input, shape index: {}]   ;;  %s989_s3 = inlined_call_operand.vmem [shape: f32[1,128], index: 3, kind: input, shape index: {}]   ;;  %s990_s4 = inlined_call_operand.vmem [shape: bf16[128,128], index: 4, kind: output, shape index: {0}]   ;;  %s991_s5 = inlined_call_operand.vmem [shape: bf16[128,128], index: 5, kind: output, shape index: {1}]  }
   0x1   :  { %v802_v0 = vld [vmem:[%s986_s1 + $0x38] sm:$0xff]   ;;  %v803_v1 = vld [vmem:[%s986_s1 + $0x30] sm:$0xff]   ;;  %v804_v2 = vld [vmem:[%s986_s1 + $0x28] sm:$0xff]  }
   0x2   :  { %754 = vmatprep.subr.bf16.mxu0 %v802_v0  ;;  %786 = vmatprep.subr.bf16.mxu1 %v802_v0  ;;  %v805_v3 = vld [vmem:[%s986_s1 + $0x20] sm:$0xff]   ;;  %v806_v6 = vld [vmem:[%s986_s1 + $0x18] sm:$0xff]   ;;  %v807_v7 = vld [vmem:[%s986_s1 + $0x10] sm:$0xff]  }
   0x3   :  { %755 = vmatpush3.bf16.msra.mxu0 %v802_v0  ;;  %794 = vmatpush3.bf16.msra.mxu1 %v802_v0  ;;  %v810_v4 = vld [vmem:[%s987_s0] sm:$0xff]   ;;  %v808_v8 = vld [vmem:[%s986_s1 + $0x8] sm:$0xff]   ;;  %v814_v12 = vld [vmem:[%s987_s0 + $0x10] sm:$0xff]  }
   0x4   :  { %756 = vmatprep.subr.bf16.mxu0 %v803_v1  ;;  %787 = vmatprep.subr.bf16.mxu1 %v803_v1  ;;  %v811_v5 = vld [vmem:[%s987_s0 + $0x20] sm:$0xff]   ;;  %v812_v10 = vld [vmem:[%s987_s0 + $0x8] sm:$0xff]   ;;  %v815_v13 = vld [vmem:[%s987_s0 + $0x30] sm:$0xff]  }
   0x5   :  { %770 = vmatprep.mubr.bf16.mxu0 %v810_v4  ;;  %778 = vmatprep.mubr.bf16.mxu1 %v811_v5  ;;  %v809_v9 = vld [vmem:[%s986_s1] sm:$0xff]   ;;  %v813_v11 = vld [vmem:[%s987_s0 + $0x28] sm:$0xff]   ;;  %v816_v14 = vld [vmem:[%s987_s0 + $0x18] sm:$0xff]  }
   0x6   :  { %v817_v15 = vld [vmem:[%s987_s0 + $0x38] sm:$0xff]   ;;  %v899_v16 = vld [vmem:[%s988_s2] ss:$0 sm:$0xff] }
   0x7   :  { %757 = vmatpush3.bf16.msra.mxu0 %v803_v1  ;;  %795 = vmatpush3.bf16.msra.mxu1 %v803_v1  ;;  %v906_v21 = vld [vmem:[%s989_s3] ss:$0 sm:$0xff] }
   0x8   :  { %758 = vmatprep.subr.bf16.mxu0 %v804_v2  ;;  %788 = vmatprep.subr.bf16.mxu1 %v804_v2 }
   0xb   :  { %759 = vmatpush3.bf16.msra.mxu0 %v804_v2  ;;  %796 = vmatpush3.bf16.msra.mxu1 %v804_v2 }
   0xc   :  { %760 = vmatprep.subr.bf16.mxu0 %v805_v3  ;;  %789 = vmatprep.subr.bf16.mxu1 %v805_v3 }
   0xf   :  { %761 = vmatpush3.bf16.msra.mxu0 %v805_v3  ;;  %797 = vmatpush3.bf16.msra.mxu1 %v805_v3 }
  0x10   :  { %762 = vmatprep.subr.bf16.mxu0 %v806_v6  ;;  %790 = vmatprep.subr.bf16.mxu1 %v806_v6 }
  0x13   :  { %763 = vmatpush3.bf16.msra.mxu0 %v806_v6  ;;  %798 = vmatpush3.bf16.msra.mxu1 %v806_v6 }
  0x14   :  { %764 = vmatprep.subr.bf16.mxu0 %v807_v7  ;;  %791 = vmatprep.subr.bf16.mxu1 %v807_v7 }
  0x17   :  { %765 = vmatpush3.bf16.msra.mxu0 %v807_v7  ;;  %799 = vmatpush3.bf16.msra.mxu1 %v807_v7 }
  0x18   :  { %766 = vmatprep.subr.bf16.mxu0 %v808_v8  ;;  %792 = vmatprep.subr.bf16.mxu1 %v808_v8 }
  0x1b   :  { %767 = vmatpush3.bf16.msra.mxu0 %v808_v8  ;;  %800 = vmatpush3.bf16.msra.mxu1 %v808_v8 }
  0x1c   :  { %768 = vmatprep.subr.bf16.mxu0 %v809_v9  ;;  %793 = vmatprep.subr.bf16.mxu1 %v809_v9 }
  0x1f   :  { %769 = vmatpush3.bf16.msra.mxu0 %v809_v9  ;;  %801 = vmatpush3.bf16.msra.mxu1 %v809_v9 }
  0x22   :  { %771 = vmatmul.mubr.bf16.vlgmr.msra.gmra.mxu0 %v812_v10  ;;  %779 = vmatmul.mubr.bf16.vlgmr.msra.gmra.mxu1 %v813_v11 }
  0x23   :  { %774 = vmatprep.mubr.bf16.mxu0 %v814_v12  ;;  %782 = vmatprep.mubr.bf16.mxu1 %v815_v13 }
  0x2a   :  { %775 = vmatmul.mubr.bf16.gmra.mxu0 %v816_v14  ;;  %783 = vmatmul.mubr.bf16.gmra.mxu1 %v817_v15 }
  0xe2   :  { %v772_v17 = vpop.f32.mrf.mxu0  ;;  %v780_v18 = vpop.f32.mrf.mxu1 }
  0xe3   :  { %v421_v19 = vmul.f32 %v772_v17, %v899_v16  ;;  %v429_v20 = vmul.f32 %v780_v18, %v899_v16 }
  0xe4   :  { %v218_v22 = vpop.f32.mrf.mxu0  ;;  %v250_v23 = vpop.f32.mrf.mxu1 }
  0xe5   :  { %v419_v24 = vmul.f32 %v899_v16, %v218_v22  ;;  %v427_v25 = vmul.f32 %v899_v16, %v250_v23  ;;  %v444_v28 = vadd.f32 %v906_v21, %v421_v19  ;;  %v452_v29 = vadd.f32 %v906_v21, %v429_v20 }
  0xe6   :  { %v773_v26 = vpop.f32.mrf.mxu0  ;;  %v781_v27 = vpop.f32.mrf.mxu1 }
  0xe7   :  { %v652_v30 = vpack.c.bf16 %v773_v26, %v772_v17  ;;  %v422_v31 = vmul.f32 %v773_v26, %v899_v16  ;;  %v672_v32 = vpack.c.bf16 %v781_v27, %v780_v18  ;;  %v430_v33 = vmul.f32 %v781_v27, %v899_v16 }
  0xe8   :  { %v221_v34 = vpop.f32.mrf.mxu0  ;;  %v253_v35 = vpop.f32.mrf.mxu1  ;;  %v442_v36 = vadd.f32 %v906_v21, %v419_v24  ;;  %v450_v37 = vadd.f32 %v906_v21, %v427_v25  ;;  %v460_v46 = vmax.f32 %v444_v28, 0.0  ;;  %v468_v47 = vmax.f32 %v452_v29, 0.0 }
  0xe9   :  { %v647_v38 = vpack.c.bf16 %v221_v34, %v218_v22  ;;  %v420_v39 = vmul.f32 %v899_v16, %v221_v34  ;;  %724 = vst [vmem:[%s990_s4 + $0x8] sm:$0xff] %v652_v30   ;;  %v445_v40 = vadd.f32 %v906_v21, %v422_v31  ;;  %728 = vst [vmem:[%s990_s4 + $0x28] sm:$0xff] %v672_v32  }
  0xea   :  { %v453_v41 = vadd.f32 %v906_v21, %v430_v33  ;;  %v667_v42 = vpack.c.bf16 %v253_v35, %v250_v23  ;;  %v428_v43 = vmul.f32 %v899_v16, %v253_v35  ;;  %v776_v44 = vpop.f32.mrf.mxu0  ;;  %v784_v45 = vpop.f32.mrf.mxu1  ;;  %v458_v55 = vmax.f32 %v442_v36, 0.0 }
  0xeb   :  { %648 = vst [vmem:[%s990_s4] sm:$0xff] %v647_v38   ;;  %v443_v48 = vadd.f32 %v906_v21, %v420_v39  ;;  %v461_v49 = vmax.f32 %v445_v40, 0.0  ;;  %v425_v52 = vmul.f32 %v776_v44, %v899_v16  ;;  %v466_v56 = vmax.f32 %v450_v37, 0.0 }
  0xec   :  { %v469_v50 = vmax.f32 %v453_v41, 0.0  ;;  %727 = vst [vmem:[%s990_s4 + $0x20] sm:$0xff] %v667_v42   ;;  %v451_v51 = vadd.f32 %v906_v21, %v428_v43  ;;  %v234_v53 = vpop.f32.mrf.mxu0  ;;  %v266_v54 = vpop.f32.mrf.mxu1  ;;  %v433_v58 = vmul.f32 %v784_v45, %v899_v16 }
  0xed   :  { %v459_v57 = vmax.f32 %v443_v48, 0.0  ;;  %v692_v59 = vpack.c.bf16 %v461_v49, %v460_v46  ;;  %v423_v62 = vmul.f32 %v899_v16, %v234_v53  ;;  %v431_v2 = vmul.f32 %v899_v16, %v266_v54 }
  0xee   :  { %v712_v60 = vpack.c.bf16 %v469_v50, %v468_v47  ;;  %v467_v61 = vmax.f32 %v451_v51, 0.0  ;;  %v777_v63 = vpop.f32.mrf.mxu0  ;;  %v785_v0 = vpop.f32.mrf.mxu1  ;;  %v448_v4 = vadd.f32 %v906_v21, %v425_v52  ;;  %v456_v9 = vadd.f32 %v906_v21, %v433_v58 }
  0xef   :  { %v687_v1 = vpack.c.bf16 %v459_v57, %v458_v55  ;;  %731 = vst [vmem:[%s991_s5 + $0x8] sm:$0xff] %v692_v59   ;;  %v662_v5 = vpack.c.bf16 %v777_v63, %v776_v44  ;;  %v426_v6 = vmul.f32 %v777_v63, %v899_v16  ;;  %v682_v10 = vpack.c.bf16 %v785_v0, %v784_v45 }
  0xf0   :  { %735 = vst [vmem:[%s991_s5 + $0x28] sm:$0xff] %v712_v60   ;;  %v707_v3 = vpack.c.bf16 %v467_v61, %v466_v56  ;;  %v237_v7 = vpop.f32.mrf.mxu0  ;;  %v269_v8 = vpop.f32.mrf.mxu1  ;;  %v434_v11 = vmul.f32 %v785_v0, %v899_v16  ;;  %v446_v13 = vadd.f32 %v906_v21, %v423_v62  ;;  %v454_v18 = vadd.f32 %v906_v21, %v431_v2 }
  0xf1   :  { %688 = vst [vmem:[%s991_s5] sm:$0xff] %v687_v1   ;;  %v657_v12 = vpack.c.bf16 %v237_v7, %v234_v53  ;;  %726 = vst [vmem:[%s990_s4 + $0x18] sm:$0xff] %v662_v5   ;;  %v449_v14 = vadd.f32 %v906_v21, %v426_v6  ;;  %v424_v15 = vmul.f32 %v899_v16, %v237_v7  ;;  %v464_v22 = vmax.f32 %v448_v4, 0.0 }
  0xf2   :  { %734 = vst [vmem:[%s991_s5 + $0x20] sm:$0xff] %v707_v3   ;;  %v677_v17 = vpack.c.bf16 %v269_v8, %v266_v54  ;;  %730 = vst [vmem:[%s990_s4 + $0x38] sm:$0xff] %v682_v10   ;;  %v457_v19 = vadd.f32 %v906_v21, %v434_v11  ;;  %v432_v20 = vmul.f32 %v899_v16, %v269_v8  ;;  %v472_v25 = vmax.f32 %v456_v9, 0.0 }
  0xf3   :  { %725 = vst [vmem:[%s990_s4 + $0x10] sm:$0xff] %v657_v12   ;;  %v465_v23 = vmax.f32 %v449_v14, 0.0  ;;  %v447_v24 = vadd.f32 %v906_v21, %v424_v15  ;;  %v462_v28 = vmax.f32 %v446_v13, 0.0  ;;  %v470_v31 = vmax.f32 %v454_v18, 0.0 }
  0xf4   :  { %729 = vst [vmem:[%s990_s4 + $0x30] sm:$0xff] %v677_v17   ;;  %v473_v26 = vmax.f32 %v457_v19, 0.0  ;;  %v455_v27 = vadd.f32 %v906_v21, %v432_v20 }
  0xf5   :  { %v702_v29 = vpack.c.bf16 %v465_v23, %v464_v22  ;;  %v463_v30 = vmax.f32 %v447_v24, 0.0 }
  0xf6   :  { %v722_v32 = vpack.c.bf16 %v473_v26, %v472_v25  ;;  %v471_v33 = vmax.f32 %v455_v27, 0.0 }
  0xf7   :  { %733 = vst [vmem:[%s991_s5 + $0x18] sm:$0xff] %v702_v29   ;;  %v697_v16 = vpack.c.bf16 %v463_v30, %v462_v28 }
  0xf8   :  { %737 = vst [vmem:[%s991_s5 + $0x38] sm:$0xff] %v722_v32   ;;  %v717_v34 = vpack.c.bf16 %v471_v33, %v470_v31 }
  0xf9   :  { %732 = vst [vmem:[%s991_s5 + $0x10] sm:$0xff] %v697_v16  }
  0xfa   :  { %736 = vst [vmem:[%s991_s5 + $0x30] sm:$0xff] %v717_v34  }

// kernel: _lambda_.14
= control target key start
LH: loop header
LB: loop body
LE: loop exit
PB: predicated region body
PF: predicated region fallthrough
CT: control target
= control target key end

     0   :  { %s312_s1 = inlined_call_operand.vmem [shape: bf16[128,128], index: 1, kind: input, shape index: {}]   ;;  %s313_s0 = inlined_call_operand.vmem [shape: bf16[32,128], index: 0, kind: input, shape index: {}]   ;;  %s314_s2 = inlined_call_operand.vmem [shape: bf16[32,128], index: 2, kind: output, shape index: {}]  }
   0x1   :  { %v251_v0 = vld [vmem:[%s312_s1 + $0x38] sm:$0xff]   ;;  %v252_v1 = vld [vmem:[%s312_s1 + $0x30] sm:$0xff]   ;;  %v253_v2 = vld [vmem:[%s312_s1 + $0x28] sm:$0xff]  }
   0x2   :  { %231 = vmatprep.subr.bf16.mxu0 %v251_v0  ;;  %v254_v3 = vld [vmem:[%s312_s1 + $0x20] sm:$0xff]   ;;  %v255_v5 = vld [vmem:[%s312_s1 + $0x18] sm:$0xff]   ;;  %v256_v6 = vld [vmem:[%s312_s1 + $0x10] sm:$0xff]  }
   0x3   :  { %232 = vmatpush3.bf16.msra.mxu0 %v251_v0  ;;  %v259_v4 = vld [vmem:[%s313_s0] sm:$0xff]   ;;  %v257_v7 = vld [vmem:[%s312_s1 + $0x8] sm:$0xff]  }
   0x4   :  { %233 = vmatprep.subr.bf16.mxu0 %v252_v1  ;;  %247 = vmatprep.mubr.bf16.mxu0 %v259_v4  ;;  %v258_v8 = vld [vmem:[%s312_s1] sm:$0xff]   ;;  %v260_v9 = vld [vmem:[%s313_s0 + $0x8] sm:$0xff]  }
   0x7   :  { %234 = vmatpush3.bf16.msra.mxu0 %v252_v1 }
   0x8   :  { %235 = vmatprep.subr.bf16.mxu0 %v253_v2 }
   0xb   :  { %236 = vmatpush3.bf16.msra.mxu0 %v253_v2 }
   0xc   :  { %237 = vmatprep.subr.bf16.mxu0 %v254_v3 }
   0xf   :  { %238 = vmatpush3.bf16.msra.mxu0 %v254_v3 }
  0x10   :  { %239 = vmatprep.subr.bf16.mxu0 %v255_v5 }
  0x13   :  { %240 = vmatpush3.bf16.msra.mxu0 %v255_v5 }
  0x14   :  { %241 = vmatprep.subr.bf16.mxu0 %v256_v6 }
  0x17   :  { %242 = vmatpush3.bf16.msra.mxu0 %v256_v6 }
  0x18   :  { %243 = vmatprep.subr.bf16.mxu0 %v257_v7 }
  0x1b   :  { %244 = vmatpush3.bf16.msra.mxu0 %v257_v7 }
  0x1c   :  { %245 = vmatprep.subr.bf16.mxu0 %v258_v8 }
  0x1f   :  { %246 = vmatpush3.bf16.msra.mxu0 %v258_v8 }
  0x22   :  { %248 = vmatmul.mubr.bf16.vlgmr.msra.gmra.mxu0 %v260_v9 }
  0xe2   :  { %v249_v10 = vpop.f32.mrf.mxu0 }
  0xe4   :  { %v138_v11 = vpop.f32.mrf.mxu0 }
  0xe6   :  { %v250_v12 = vpop.f32.mrf.mxu0 }
  0xe7   :  { %v218_v13 = vpack.c.bf16 %v250_v12, %v249_v10 }
  0xe8   :  { %v141_v14 = vpop.f32.mrf.mxu0 }
  0xe9   :  { %220 = vst [vmem:[%s314_s2 + $0x8] sm:$0xff] %v218_v13   ;;  %v213_v15 = vpack.c.bf16 %v141_v14, %v138_v11 }
  0xeb   :  { %214 = vst [vmem:[%s314_s2] sm:$0xff] %v213_v15  }

// kernel: _lambda_.11
= control target key start
LH: loop header
LB: loop body
LE: loop exit
PB: predicated region body
PF: predicated region fallthrough
CT: control target
= control target key end

     0   :  { %s1192_s12 = smov 0   ;;  %s1194_s13 = smov 0   ;;  %s1324_s0 = inlined_call_operand.vmem [shape: bf16[128,1152], index: 0, kind: input, shape index: {}]   ;;  %s1325_s1 = inlined_call_operand.vmem [shape: bf16[1152,128], index: 1, kind: input, shape index: {}]   ;;  %s1326_s2 = inlined_call_operand.vmem [shape: f32[1,128], index: 2, kind: input, shape index: {}]   ;;  %s1327_s3 = inlined_call_operand.vmem [shape: bf16[128,128], index: 3, kind: output, shape index: {}]  }
   0x1   :  { %s1196_s14 = smov 0   ;;  %s1198_s15 = smov 0  }
   0x2   :  { %s1200_s16 = smov 0  }
   0x3 LB: > { %s25_s17 = sadd.s32 1, %s1165_s15  ;;  %p48_p1 = scmp.ne.s32.totalorder %s1157_s13, %s1153_s12  ;;  %s1169_s16 = sphi %s1200_s16, %s13_s16   ;;  %s1165_s15 = sphi %s1198_s15, %s1331_s15   ;;  %s1161_s14 = sphi %s1196_s14, %s1330_s14   ;;  %s1157_s13 = sphi %s1194_s13, %s1329_s13   ;;  %s1153_s12 = sphi %s1192_s12, %s1328_s12  }
   0x4   : > { %p26_p0 = scmp.ge.s32.totalorder %s25_s17, 9  ;;  %p49_p2 = scmp.eq.s32.totalorder %s1169_s16, 0 }
   0x5   : > { %s41_s19 = sadd.s32 1, %s1157_s13  ;;  %p901_p5 = scmp.ge.s32.totalorder %s1169_s16, 9 }
   0x6   : > { %s1333_s17 = smov (%p26_p0, %s25_s17), 0  ;;  %p50_p3 = por %p49_p2, %p48_p1 }
   0x7   : > { %s37_s18 = ssub.s32 %s1165_s15, %s1333_s17  ;;  %162 = sbr.rel (%p901_p5) target bundleno = 26 (0x1a), region = 20 }
   0x8   : > { %p39_p4 = scmp.eq.s32.totalorder %s37_s18, 0 }
   0xa   : > { %s1227_s20 = scalar_select %p39_p4, %s1157_s13, %s41_s19  }
   0xc   : > { %165 = sbr.rel (!%p50_p3) target bundleno = 26 (0x1a), region = 24  ;;  %s167_s21 = sand.u32 (%p50_p3), 1, %s1157_s13  }
   0xd   : > { %s903_s22 = sshll.u32 (%p50_p3), %s1165_s15, 2  ;;  %s902_s23 = sshll.u32 (%p50_p3), %s167_s21, 6 }
   0xe   : > { %s1235_s26 = scalar_lea.vmem (%p50_p3), %s1324_s0, %s903_s22  ;;  %s169_s27 = scalar_lea.vmem (%p50_p3), [#allocation3], %s902_s23 }
   0xf   : > { %v191_v0 = vld [vmem:[%s1235_s26] sm:$0xf] (%p50_p3)  ;;  %v193_v1 = vld [vmem:[%s1235_s26 + $0x24] sm:$0xf] (%p50_p3)  ;;  %v195_v2 = vld [vmem:[%s1235_s26 + $0x48] sm:$0xf] (%p50_p3) }
  0x10   : > { %192 = vst [vmem:[%s169_s27] sm:$0xf] (%p50_p3), %v191_v0  ;;  %194 = vst [vmem:[%s169_s27 + $0x4] sm:$0xf] (%p50_p3), %v193_v1  ;;  %v197_v3 = vld [vmem:[%s1235_s26 + $0x6c] sm:$0xf] (%p50_p3) }
  0x11   : > { %v199_v4 = vld [vmem:[%s1235_s26 + $0x90] sm:$0xf]  ;;  %196 = vst [vmem:[%s169_s27 + $0x8] sm:$0xf] %v195_v2  ;;  %198 = vst [vmem:[%s169_s27 + $0xc] sm:$0xf] %v197_v3 }
  0x12   : > { %200 = vst [vmem:[%s169_s27 + $0x10] sm:$0xf] %v199_v4  ;;  %v201_v5 = vld [vmem:[%s1235_s26 + $0xb4] sm:$0xf]  ;;  %v203_v6 = vld [vmem:[%s1235_s26 + $0xd8] sm:$0xf] }
  0x13   : > { %v205_v7 = vld [vmem:[%s1235_s26 + $0xfc] sm:$0xf]  ;;  %202 = vst [vmem:[%s169_s27 + $0x14] sm:$0xf] %v201_v5  ;;  %204 = vst [vmem:[%s169_s27 + $0x18] sm:$0xf] %v203_v6 }
  0x14   : > { %206 = vst [vmem:[%s169_s27 + $0x1c] sm:$0xf] %v205_v7  ;;  %v207_v8 = vld [vmem:[%s1235_s26 + $0x120] sm:$0xf]  ;;  %v209_v9 = vld [vmem:[%s1235_s26 + $0x144] sm:$0xf] }
  0x15   : > { %v211_v10 = vld [vmem:[%s1235_s26 + $0x168] sm:$0xf]  ;;  %208 = vst [vmem:[%s169_s27 + $0x20] sm:$0xf] %v207_v8  ;;  %210 = vst [vmem:[%s169_s27 + $0x24] sm:$0xf] %v209_v9 }
  0x16   : > { %212 = vst [vmem:[%s169_s27 + $0x28] sm:$0xf] %v211_v10  ;;  %v213_v11 = vld [vmem:[%s1235_s26 + $0x18c] sm:$0xf]  ;;  %v215_v12 = vld [vmem:[%s1235_s26 + $0x1b0] sm:$0xf] }
  0x17   : > { %v217_v13 = vld [vmem:[%s1235_s26 + $0x1d4] sm:$0xf]  ;;  %214 = vst [vmem:[%s169_s27 + $0x2c] sm:$0xf] %v213_v11  ;;  %216 = vst [vmem:[%s169_s27 + $0x30] sm:$0xf] %v215_v12 }
  0x18   : > { %218 = vst [vmem:[%s169_s27 + $0x34] sm:$0xf] %v217_v13  ;;  %v219_v14 = vld [vmem:[%s1235_s26 + $0x1f8] sm:$0xf]  ;;  %v221_v15 = vld [vmem:[%s1235_s26 + $0x21c] sm:$0xf] }
  0x19   : > { %220 = vst [vmem:[%s169_s27 + $0x38] sm:$0xf] %v219_v14  ;;  %222 = vst [vmem:[%s169_s27 + $0x3c] sm:$0xf] %v221_v15 }
  0x1a PF: > { %p904_p6 = scmp.ge.s32.totalorder %s1169_s16, 1  ;;  %p289_p7 = scmp.lt.s32.totalorder %s1169_s16, 10 }
  0x1c   : > { %p290_p8 = pnand %p904_p6, %p289_p7 }
  0x1d   : > { %s296_s28 = sand.u32 (!%p290_p8), 1, %s1153_s12   ;;  %s906_s29 = sshll.u32 (!%p290_p8), %s1161_s14, 4 }
  0x1e   : > { %293 = sbr.rel (%p290_p8) target bundleno = 308 (0x134), region = 69  ;;  %s905_s30 = sshll.u32 (!%p290_p8), %s296_s28, 6 }
  0x1f   : > { %p335_p9 = scmp.lt.s32.totalorder (!%p290_p8), %s906_s29, 143  ;;  %s1262_s8 = scalar_lea.vmem (!%p290_p8), [#allocation3], %s905_s30 }
  0x20   : > { %p908_p10 = scmp.ne.s32.totalorder (!%p290_p8), %s1161_s14, 0 }
  0x23   : > { %s1335_s29 = smov (!%p335_p9, %s906_s29), 143  ;;  %359 = sbr.rel (%p908_p10) target bundleno = 49 (0x31), region = 77 }
  0x24   : > { %s907_s4 = sshll.u32 %s1335_s29, 2 }
  0x25   : > { %s1260_s7 = scalar_lea.vmem %s1325_s1, %s907_s4 }
  0x28   : > { %v1171_v16 = vmov 0.0  }
  0x29   : > { %360 = vst [vmem:[#allocation2 + $0x30] sm:$0xff] %v1171_v16  ;;  %361 = vst [vmem:[#allocation2] sm:$0xff] %v1171_v16 }
  0x2a   : > { %362 = vst [vmem:[#allocation2 + $0x58] sm:$0xff] %v1171_v16  ;;  %363 = vst [vmem:[#allocation2 + $0x18] sm:$0xff] %v1171_v16 }
  0x2b   : > { %364 = vst [vmem:[#allocation2 + $0x50] sm:$0xff] %v1171_v16  ;;  %365 = vst [vmem:[#allocation2 + $0x68] sm:$0xff] %v1171_v16 }
  0x2c   : > { %366 = vst [vmem:[#allocation2 + $0x8] sm:$0xff] %v1171_v16  ;;  %367 = vst [vmem:[#allocation2 + $0x48] sm:$0xff] %v1171_v16 }
  0x2d   : > { %368 = vst [vmem:[#allocation2 + $0x40] sm:$0xff] %v1171_v16  ;;  %369 = vst [vmem:[#allocation2 + $0x20] sm:$0xff] %v1171_v16 }
  0x2e   : > { %370 = vst [vmem:[#allocation2 + $0x10] sm:$0xff] %v1171_v16  ;;  %371 = vst [vmem:[#allocation2 + $0x38] sm:$0xff] %v1171_v16 }
  0x2f   : > { %372 = vst [vmem:[#allocation2 + $0x60] sm:$0xff] %v1171_v16  ;;  %373 = vst [vmem:[#allocation2 + $0x70] sm:$0xff] %v1171_v16 }
  0x30   : > { %374 = vst [vmem:[#allocation2 + $0x78] sm:$0xff] %v1171_v16  ;;  %375 = vst [vmem:[#allocation2 + $0x28] sm:$0xff] %v1171_v16 }
  0x31 PF: > { %v1115_v17 = vld [vmem:[%s1260_s7 + $0x38] sm:$0xff]   ;;  %v1116_v18 = vld [vmem:[%s1260_s7 + $0x30] sm:$0xff]   ;;  %v1117_v19 = vld [vmem:[%s1260_s7 + $0x28] sm:$0xff]   ;;  %p925_p11 = scmp.ne.s32.totalorder %s1161_s14, 8 }
  0x32   : > { %1026 = vmatprep.subr.bf16.mxu0 %v1115_v17  ;;  %1058 = vmatprep.subr.bf16.mxu1 %v1115_v17  ;;  %v1118_v20 = vld [vmem:[%s1260_s7 + $0x20] sm:$0xff]   ;;  %v1119_v23 = vld [vmem:[%s1260_s7 + $0x18] sm:$0xff]   ;;  %v1120_v24 = vld [vmem:[%s1260_s7 + $0x10] sm:$0xff]  }
  0x33   : > { %1027 = vmatpush3.bf16.msra.mxu0 %v1115_v17  ;;  %1066 = vmatpush3.bf16.msra.mxu1 %v1115_v17  ;;  %v1123_v21 = vld [vmem:[%s1262_s8] sm:$0xff]   ;;  %v1121_v25 = vld [vmem:[%s1260_s7 + $0x8] sm:$0xff]   ;;  %v1127_v29 = vld [vmem:[%s1262_s8 + $0x10] sm:$0xff]  }
  0x34   : > { %1028 = vmatprep.subr.bf16.mxu0 %v1116_v18  ;;  %1059 = vmatprep.subr.bf16.mxu1 %v1116_v18  ;;  %v1124_v22 = vld [vmem:[%s1262_s8 + $0x20] sm:$0xff]   ;;  %v1125_v27 = vld [vmem:[%s1262_s8 + $0x8] sm:$0xff]   ;;  %v1128_v30 = vld [vmem:[%s1262_s8 + $0x30] sm:$0xff]  }
  0x35   : > { %1042 = vmatprep.mubr.bf16.mxu0 %v1123_v21  ;;  %1050 = vmatprep.mubr.bf16.mxu1 %v1124_v22  ;;  %v1122_v26 = vld [vmem:[%s1260_s7] sm:$0xff]   ;;  %v1126_v28 = vld [vmem:[%s1262_s8 + $0x28] sm:$0xff]   ;;  %v1129_v31 = vld [vmem:[%s1262_s8 + $0x18] sm:$0xff]  }
  0x36   : > { %v1130_v32 = vld [vmem:[%s1262_s8 + $0x38] sm:$0xff]   ;;  %v386_v34 = vld [vmem:[#allocation2 + $0x10] sm:$0xff]  ;;  %v384_v38 = vld [vmem:[#allocation2 + $0x40] sm:$0xff] }
  0x37   : > { %1029 = vmatpush3.bf16.msra.mxu0 %v1116_v18  ;;  %1067 = vmatpush3.bf16.msra.mxu1 %v1116_v18  ;;  %v378_v33 = vld [vmem:[#allocation2 + $0x58] sm:$0xff]  ;;  %v376_v37 = vld [vmem:[#allocation2 + $0x30] sm:$0xff]  ;;  %v377_v49 = vld [vmem:[#allocation2] sm:$0xff] }
  0x38   : > { %1030 = vmatprep.subr.bf16.mxu0 %v1117_v19  ;;  %1060 = vmatprep.subr.bf16.mxu1 %v1117_v19  ;;  %v379_v43 = vld [vmem:[#allocation2 + $0x18] sm:$0xff]  ;;  %v385_v50 = vld [vmem:[#allocation2 + $0x20] sm:$0xff]  ;;  %v382_v55 = vld [vmem:[#allocation2 + $0x8] sm:$0xff] }
  0x39   : > { %v387_v44 = vld [vmem:[#allocation2 + $0x38] sm:$0xff]  ;;  %v380_v61 = vld [vmem:[#allocation2 + $0x50] sm:$0xff]  ;;  %v388_v62 = vld [vmem:[#allocation2 + $0x60] sm:$0xff] }
  0x3a   : > { %v390_v56 = vld [vmem:[#allocation2 + $0x78] sm:$0xff]  ;;  %v383_v3 = vld [vmem:[#allocation2 + $0x48] sm:$0xff]  ;;  %v389_v10 = vld [vmem:[#allocation2 + $0x70] sm:$0xff] }
  0x3b   : > { %1031 = vmatpush3.bf16.msra.mxu0 %v1117_v19  ;;  %1068 = vmatpush3.bf16.msra.mxu1 %v1117_v19  ;;  %v391_v4 = vld [vmem:[#allocation2 + $0x28] sm:$0xff] }
  0x3c   : > { %1032 = vmatprep.subr.bf16.mxu0 %v1118_v20  ;;  %1061 = vmatprep.subr.bf16.mxu1 %v1118_v20  ;;  %v381_v9 = vld [vmem:[#allocation2 + $0x68] sm:$0xff] }
  0x3f   : > { %1033 = vmatpush3.bf16.msra.mxu0 %v1118_v20  ;;  %1069 = vmatpush3.bf16.msra.mxu1 %v1118_v20 }
  0x40   : > { %1034 = vmatprep.subr.bf16.mxu0 %v1119_v23  ;;  %1062 = vmatprep.subr.bf16.mxu1 %v1119_v23 }
  0x43   : > { %1035 = vmatpush3.bf16.msra.mxu0 %v1119_v23  ;;  %1070 = vmatpush3.bf16.msra.mxu1 %v1119_v23 }
  0x44   : > { %1036 = vmatprep.subr.bf16.mxu0 %v1120_v24  ;;  %1063 = vmatprep.subr.bf16.mxu1 %v1120_v24 }
  0x47   : > { %1037 = vmatpush3.bf16.msra.mxu0 %v1120_v24  ;;  %1071 = vmatpush3.bf16.msra.mxu1 %v1120_v24 }
  0x48   : > { %1038 = vmatprep.subr.bf16.mxu0 %v1121_v25  ;;  %1064 = vmatprep.subr.bf16.mxu1 %v1121_v25 }
  0x4b   : > { %1039 = vmatpush3.bf16.msra.mxu0 %v1121_v25  ;;  %1072 = vmatpush3.bf16.msra.mxu1 %v1121_v25 }
  0x4c   : > { %1040 = vmatprep.subr.bf16.mxu0 %v1122_v26  ;;  %1065 = vmatprep.subr.bf16.mxu1 %v1122_v26 }
  0x4f   : > { %1041 = vmatpush3.bf16.msra.mxu0 %v1122_v26  ;;  %1073 = vmatpush3.bf16.msra.mxu1 %v1122_v26 }
  0x52   : > { %1043 = vmatmul.mubr.bf16.vlgmr.msra.gmra.mxu0 %v1125_v27  ;;  %1051 = vmatmul.mubr.bf16.vlgmr.msra.gmra.mxu1 %v1126_v28 }
  0x53   : > { %1046 = vmatprep.mubr.bf16.mxu0 %v1127_v29  ;;  %1054 = vmatprep.mubr.bf16.mxu1 %v1128_v30 }
  0x5a   : > { %1047 = vmatmul.mubr.bf16.gmra.mxu0 %v1129_v31  ;;  %1055 = vmatmul.mubr.bf16.gmra.mxu1 %v1130_v32 }
 0x112   : > { %v1044_v35 = vpop.f32.mrf.mxu0  ;;  %v1052_v36 = vpop.f32.mrf.mxu1 }
 0x113   : > { %v619_v39 = vadd.f32 %v1044_v35, %v378_v33  ;;  %v627_v40 = vadd.f32 %v1052_v36, %v386_v34 }
 0x114   : > { %v554_v41 = vpop.f32.mrf.mxu0  ;;  %v586_v42 = vpop.f32.mrf.mxu1 }
 0x115   : > { %635 = vst [vmem:[#allocation2 + $0x58] sm:$0xff] %v619_v39  ;;  %643 = vst [vmem:[#allocation2 + $0x10] sm:$0xff] %v627_v40  ;;  %v617_v45 = vadd.f32 %v554_v41, %v376_v37  ;;  %v625_v46 = vadd.f32 %v586_v42, %v384_v38 }
 0x116   : > { %v1045_v47 = vpop.f32.mrf.mxu0  ;;  %v1053_v48 = vpop.f32.mrf.mxu1 }
 0x117   : > { %633 = vst [vmem:[#allocation2 + $0x30] sm:$0xff] %v617_v45  ;;  %641 = vst [vmem:[#allocation2 + $0x40] sm:$0xff] %v625_v46  ;;  %v620_v51 = vadd.f32 %v1045_v47, %v379_v43  ;;  %v628_v52 = vadd.f32 %v1053_v48, %v387_v44 }
 0x118   : > { %v557_v53 = vpop.f32.mrf.mxu0  ;;  %v589_v54 = vpop.f32.mrf.mxu1 }
 0x119   : > { %636 = vst [vmem:[#allocation2 + $0x18] sm:$0xff] %v620_v51  ;;  %644 = vst [vmem:[#allocation2 + $0x38] sm:$0xff] %v628_v52  ;;  %v618_v57 = vadd.f32 %v557_v53, %v377_v49  ;;  %v626_v58 = vadd.f32 %v589_v54, %v385_v50 }
 0x11a   : > { %v1048_v59 = vpop.f32.mrf.mxu0  ;;  %v1056_v60 = vpop.f32.mrf.mxu1 }
 0x11b   : > { %634 = vst [vmem:[#allocation2] sm:$0xff] %v618_v57  ;;  %642 = vst [vmem:[#allocation2 + $0x20] sm:$0xff] %v626_v58  ;;  %v623_v63 = vadd.f32 %v1048_v59, %v382_v55  ;;  %v631_v0 = vadd.f32 %v1056_v60, %v390_v56 }
 0x11c   : > { %v570_v1 = vpop.f32.mrf.mxu0  ;;  %v602_v2 = vpop.f32.mrf.mxu1 }
 0x11d   : > { %639 = vst [vmem:[#allocation2 + $0x8] sm:$0xff] %v623_v63  ;;  %647 = vst [vmem:[#allocation2 + $0x78] sm:$0xff] %v631_v0  ;;  %v621_v5 = vadd.f32 %v570_v1, %v380_v61  ;;  %v629_v6 = vadd.f32 %v602_v2, %v388_v62 }
 0x11e   : > { %v1049_v7 = vpop.f32.mrf.mxu0  ;;  %v1057_v8 = vpop.f32.mrf.mxu1 }
 0x11f   : > { %637 = vst [vmem:[#allocation2 + $0x50] sm:$0xff] %v621_v5  ;;  %645 = vst [vmem:[#allocation2 + $0x60] sm:$0xff] %v629_v6  ;;  %v624_v11 = vadd.f32 %v1049_v7, %v383_v3  ;;  %v632_v12 = vadd.f32 %v1057_v8, %v391_v4  ;;  %652 = sbr.rel (%p925_p11) target bundleno = 308 (0x134), region = 81 }
 0x120   : > { %v573_v13 = vpop.f32.mrf.mxu0  ;;  %v605_v14 = vpop.f32.mrf.mxu1 }
 0x121   : > { %640 = vst [vmem:[#allocation2 + $0x48] sm:$0xff] %v624_v11  ;;  %648 = vst [vmem:[#allocation2 + $0x28] sm:$0xff] %v632_v12  ;;  %v622_v15 = vadd.f32 %v573_v13, %v381_v9  ;;  %v630_v16 = vadd.f32 %v605_v14, %v389_v10 }
 0x123   : > { %638 = vst [vmem:[#allocation2 + $0x68] sm:$0xff] %v622_v15  ;;  %646 = vst [vmem:[#allocation2 + $0x70] sm:$0xff] %v630_v16 }
 0x124   : > { %v653_v17 = vld [vmem:[#allocation2 + $0x30] sm:$0xff]  ;;  %v654_v18 = vld [vmem:[#allocation2] sm:$0xff]  ;;  %v655_v22 = vld [vmem:[#allocation2 + $0x58] sm:$0xff] }
 0x125   : > { %v926_v19 = vld [vmem:[%s1326_s2] ss:$0 sm:$0xff]  ;;  %v656_v23 = vld [vmem:[#allocation2 + $0x18] sm:$0xff]  ;;  %v659_v29 = vld [vmem:[#allocation2 + $0x8] sm:$0xff] }
 0x126   : > { %v676_v20 = vadd.f32 %v926_v19, %v653_v17  ;;  %v677_v21 = vadd.f32 %v926_v19, %v654_v18  ;;  %v657_v24 = vld [vmem:[#allocation2 + $0x50] sm:$0xff]  ;;  %v678_v25 = vadd.f32 %v926_v19, %v655_v22  ;;  %v679_v26 = vadd.f32 %v926_v19, %v656_v23  ;;  %v661_v35 = vld [vmem:[#allocation2 + $0x40] sm:$0xff]  ;;  %v664_v42 = vld [vmem:[#allocation2 + $0x38] sm:$0xff] }
 0x127   : > { %v680_v28 = vadd.f32 %v926_v19, %v657_v24  ;;  %v682_v34 = vadd.f32 %v926_v19, %v659_v29  ;;  %v662_v36 = vld [vmem:[#allocation2 + $0x20] sm:$0xff]  ;;  %v663_v37 = vld [vmem:[#allocation2 + $0x10] sm:$0xff]  ;;  %v684_v47 = vadd.f32 %v926_v19, %v661_v35  ;;  %v667_v53 = vld [vmem:[#allocation2 + $0x78] sm:$0xff]  ;;  %v687_v57 = vadd.f32 %v926_v19, %v664_v42 }
 0x128   : > { %v660_v30 = vld [vmem:[#allocation2 + $0x48] sm:$0xff]  ;;  %v692_v31 = vmax.f32 %v676_v20, 0.0  ;;  %v693_v32 = vmax.f32 %v677_v21, 0.0  ;;  %v694_v38 = vmax.f32 %v678_v25, 0.0  ;;  %v695_v39 = vmax.f32 %v679_v26, 0.0  ;;  %v665_v43 = vld [vmem:[#allocation2 + $0x60] sm:$0xff] }
 0x129   : > { %v696_v40 = vmax.f32 %v680_v28, 0.0  ;;  %v683_v41 = vadd.f32 %v926_v19, %v660_v30  ;;  %v698_v46 = vmax.f32 %v682_v34, 0.0  ;;  %v685_v51 = vadd.f32 %v926_v19, %v662_v36  ;;  %v668_v54 = vld [vmem:[#allocation2 + $0x28] sm:$0xff] }
 0x12a   : > { %v658_v27 = vld [vmem:[#allocation2 + $0x68] sm:$0xff]  ;;  %v966_v44 = vpack.c.bf16 %v693_v32, %v692_v31  ;;  %v666_v48 = vld [vmem:[#allocation2 + $0x70] sm:$0xff]  ;;  %v971_v49 = vpack.c.bf16 %v695_v39, %v694_v38  ;;  %v686_v52 = vadd.f32 %v926_v19, %v663_v37  ;;  %v700_v56 = vmax.f32 %v684_v47, 0.0 }
 0x12b   : > { %v681_v33 = vadd.f32 %v926_v19, %v658_v27  ;;  %v699_v50 = vmax.f32 %v683_v41, 0.0  ;;  %v688_v58 = vadd.f32 %v926_v19, %v665_v43  ;;  %v701_v60 = vmax.f32 %v685_v51, 0.0 }
 0x12c   : > { %967 = vst [vmem:[%s1327_s3] sm:$0xff] %v966_v44   ;;  %1003 = vst [vmem:[%s1327_s3 + $0x8] sm:$0xff] %v971_v49   ;;  %v702_v61 = vmax.f32 %v686_v52, 0.0  ;;  %v689_v62 = vadd.f32 %v926_v19, %v666_v48  ;;  %v703_v63 = vmax.f32 %v687_v57, 0.0  ;;  %v690_v1 = vadd.f32 %v926_v19, %v667_v53 }
 0x12d   : > { %v697_v45 = vmax.f32 %v681_v33, 0.0  ;;  %v981_v59 = vpack.c.bf16 %v699_v50, %v698_v46  ;;  %v704_v0 = vmax.f32 %v688_v58, 0.0  ;;  %v691_v2 = vadd.f32 %v926_v19, %v668_v54 }
 0x12e   : > { %v986_v3 = vpack.c.bf16 %v701_v60, %v700_v56  ;;  %v705_v4 = vmax.f32 %v689_v62, 0.0  ;;  %v991_v5 = vpack.c.bf16 %v703_v63, %v702_v61  ;;  %v706_v6 = vmax.f32 %v690_v1, 0.0 }
 0x12f   : > { %v976_v55 = vpack.c.bf16 %v697_v45, %v696_v40  ;;  %1005 = vst [vmem:[%s1327_s3 + $0x18] sm:$0xff] %v981_v59   ;;  %v707_v7 = vmax.f32 %v691_v2, 0.0 }
 0x130   : > { %1006 = vst [vmem:[%s1327_s3 + $0x20] sm:$0xff] %v986_v3   ;;  %v996_v8 = vpack.c.bf16 %v705_v4, %v704_v0  ;;  %1007 = vst [vmem:[%s1327_s3 + $0x28] sm:$0xff] %v991_v5  }
 0x131   : > { %1004 = vst [vmem:[%s1327_s3 + $0x10] sm:$0xff] %v976_v55   ;;  %v1001_v9 = vpack.c.bf16 %v707_v7, %v706_v6 }
 0x132   : > { %1008 = vst [vmem:[%s1327_s3 + $0x30] sm:$0xff] %v996_v8  }
 0x133   : > { %1009 = vst [vmem:[%s1327_s3 + $0x38] sm:$0xff] %v1001_v9  }
 0x134 PF: > { %s13_s16 = sadd.s32 1, %s1169_s16   ;;  %s1328_s12 = smov %s1157_s13 }
 0x135   : > { %p10_p12 = scmp.ge.s32.totalorder %s13_s16, 11   ;;  %s1329_s13 = smov %s1227_s20 }
 0x136   : > { %s1330_s14 = smov %s1165_s15  ;;  %s1331_s15 = smov %s1333_s17 }
 0x137   :  { %12 = sbr.rel (!%p10_p12) target bundleno = 3 (0x3), region = 122 }

// kernel: _lambda_.12
= control target key start
LH: loop header
LB: loop body
LE: loop exit
PB: predicated region body
PF: predicated region fallthrough
CT: control target
= control target key end

     0   :  { %s1702_s21 = smov 0   ;;  %s1704_s22 = smov 0   ;;  %s1924_s0 = inlined_call_operand.vmem [shape: bf16[128,1152], index: 0, kind: input, shape index: {}]   ;;  %s1925_s1 = inlined_call_operand.vmem [shape: bf16[1152,128], index: 1, kind: input, shape index: {}]   ;;  %s1926_s2 = inlined_call_operand.vmem [shape: bf16[128,128], index: 2, kind: input, shape index: {}]   ;;  %s1927_s3 = inlined_call_operand.vmem [shape: f32[1,128], index: 3, kind: input, shape index: {}]   ;;  %s1928_s4 = inlined_call_operand.vmem [shape: f32[1,128], index: 4, kind: input, shape index: {}]   ;;  %s1929_s5 = inlined_call_operand.vmem [shape: bf16[128,128], index: 5, kind: output, shape index: {0}]   ;;  %s1930_s6 = inlined_call_operand.vmem [shape: bf16[128,128], index: 6, kind: output, shape index: {1}]  }
   0x1   :  { %s1706_s23 = smov 0   ;;  %s1708_s24 = smov 0  }
   0x2   :  { %s1710_s25 = smov 0  }
   0x3 LB: > { %s29_s26 = sadd.s32 1, %s1660_s24  ;;  %p52_p1 = scmp.ne.s32.totalorder %s1652_s22, %s1648_s21  ;;  %s1664_s25 = sphi %s1710_s25, %s17_s25   ;;  %s1660_s24 = sphi %s1708_s24, %s1934_s24   ;;  %s1656_s23 = sphi %s1706_s23, %s1933_s23   ;;  %s1652_s22 = sphi %s1704_s22, %s1932_s22   ;;  %s1648_s21 = sphi %s1702_s21, %s1931_s21  }
   0x4   : > { %p30_p0 = scmp.ge.s32.totalorder %s29_s26, 9  ;;  %p53_p2 = scmp.eq.s32.totalorder %s1664_s25, 0 }
   0x5   : > { %s45_s28 = sadd.s32 1, %s1652_s22  ;;  %p1275_p5 = scmp.ge.s32.totalorder %s1664_s25, 9 }
   0x6   : > { %s1936_s26 = smov (%p30_p0, %s29_s26), 0  ;;  %p54_p3 = por %p53_p2, %p52_p1 }
   0x7   : > { %s41_s27 = ssub.s32 %s1660_s24, %s1936_s26  ;;  %266 = sbr.rel (%p1275_p5) target bundleno = 26 (0x1a), region = 28 }
   0x8   : > { %p43_p4 = scmp.eq.s32.totalorder %s41_s27, 0 }
   0xa   : > { %s1737_s29 = scalar_select %p43_p4, %s1652_s22, %s45_s28  }
   0xc   : > { %269 = sbr.rel (!%p54_p3) target bundleno = 26 (0x1a), region = 32  ;;  %s271_s30 = sand.u32 (%p54_p3), 1, %s1652_s22  }
   0xd   : > { %s1277_s7 = sshll.u32 (%p54_p3), %s1660_s24, 2  ;;  %s1276_s8 = sshll.u32 (%p54_p3), %s271_s30, 6 }
   0xe   : > { %s1745_s11 = scalar_lea.vmem (%p54_p3), %s1924_s0, %s1277_s7  ;;  %s273_s12 = scalar_lea.vmem (%p54_p3), [#allocation3], %s1276_s8 }
   0xf   : > { %v295_v0 = vld [vmem:[%s1745_s11] sm:$0xf] (%p54_p3)  ;;  %v297_v1 = vld [vmem:[%s1745_s11 + $0x24] sm:$0xf] (%p54_p3)  ;;  %v299_v2 = vld [vmem:[%s1745_s11 + $0x48] sm:$0xf] (%p54_p3) }
  0x10   : > { %296 = vst [vmem:[%s273_s12] sm:$0xf] (%p54_p3), %v295_v0  ;;  %298 = vst [vmem:[%s273_s12 + $0x4] sm:$0xf] (%p54_p3), %v297_v1  ;;  %v301_v3 = vld [vmem:[%s1745_s11 + $0x6c] sm:$0xf] (%p54_p3) }
  0x11   : > { %v303_v4 = vld [vmem:[%s1745_s11 + $0x90] sm:$0xf]  ;;  %300 = vst [vmem:[%s273_s12 + $0x8] sm:$0xf] %v299_v2  ;;  %302 = vst [vmem:[%s273_s12 + $0xc] sm:$0xf] %v301_v3 }
  0x12   : > { %304 = vst [vmem:[%s273_s12 + $0x10] sm:$0xf] %v303_v4  ;;  %v305_v5 = vld [vmem:[%s1745_s11 + $0xb4] sm:$0xf]  ;;  %v307_v6 = vld [vmem:[%s1745_s11 + $0xd8] sm:$0xf] }
  0x13   : > { %v309_v7 = vld [vmem:[%s1745_s11 + $0xfc] sm:$0xf]  ;;  %306 = vst [vmem:[%s273_s12 + $0x14] sm:$0xf] %v305_v5  ;;  %308 = vst [vmem:[%s273_s12 + $0x18] sm:$0xf] %v307_v6 }
  0x14   : > { %310 = vst [vmem:[%s273_s12 + $0x1c] sm:$0xf] %v309_v7  ;;  %v311_v8 = vld [vmem:[%s1745_s11 + $0x120] sm:$0xf]  ;;  %v313_v9 = vld [vmem:[%s1745_s11 + $0x144] sm:$0xf] }
  0x15   : > { %v315_v10 = vld [vmem:[%s1745_s11 + $0x168] sm:$0xf]  ;;  %312 = vst [vmem:[%s273_s12 + $0x20] sm:$0xf] %v311_v8  ;;  %314 = vst [vmem:[%s273_s12 + $0x24] sm:$0xf] %v313_v9 }
  0x16   : > { %316 = vst [vmem:[%s273_s12 + $0x28] sm:$0xf] %v315_v10  ;;  %v317_v11 = vld [vmem:[%s1745_s11 + $0x18c] sm:$0xf]  ;;  %v319_v12 = vld [vmem:[%s1745_s11 + $0x1b0] sm:$0xf] }
  0x17   : > { %v321_v13 = vld [vmem:[%s1745_s11 + $0x1d4] sm:$0xf]  ;;  %318 = vst [vmem:[%s273_s12 + $0x2c] sm:$0xf] %v317_v11  ;;  %320 = vst [vmem:[%s273_s12 + $0x30] sm:$0xf] %v319_v12 }
  0x18   : > { %322 = vst [vmem:[%s273_s12 + $0x34] sm:$0xf] %v321_v13  ;;  %v323_v14 = vld [vmem:[%s1745_s11 + $0x1f8] sm:$0xf]  ;;  %v325_v15 = vld [vmem:[%s1745_s11 + $0x21c] sm:$0xf] }
  0x19   : > { %324 = vst [vmem:[%s273_s12 + $0x38] sm:$0xf] %v323_v14  ;;  %326 = vst [vmem:[%s273_s12 + $0x3c] sm:$0xf] %v325_v15 }
  0x1a PF: > { %p1278_p6 = scmp.ge.s32.totalorder %s1664_s25, 1  ;;  %p393_p7 = scmp.lt.s32.totalorder %s1664_s25, 10 }
  0x1c   : > { %p394_p8 = pnand %p1278_p6, %p393_p7 }
  0x1d   : > { %s400_s13 = sand.u32 (!%p394_p8), 1, %s1648_s21   ;;  %s1280_s14 = sshll.u32 (!%p394_p8), %s1656_s23, 4 }
  0x1e   : > { %397 = sbr.rel (%p394_p8) target bundleno = 323 (0x143), region = 77  ;;  %s1279_s15 = sshll.u32 (!%p394_p8), %s400_s13, 6 }
  0x1f   : > { %p464_p9 = scmp.lt.s32.totalorder (!%p394_p8), %s1280_s14, 143  ;;  %s1772_s20 = scalar_lea.vmem (!%p394_p8), [#allocation3], %s1279_s15 }
  0x20   : > { %p1282_p10 = scmp.ne.s32.totalorder (!%p394_p8), %s1656_s23, 0 }
  0x23   : > { %s1938_s14 = smov (!%p464_p9, %s1280_s14), 143  ;;  %509 = sbr.rel (%p1282_p10) target bundleno = 49 (0x31), region = 85 }
  0x24   : > { %s1281_s16 = sshll.u32 %s1938_s14, 2 }
  0x25   : > { %s1770_s19 = scalar_lea.vmem %s1925_s1, %s1281_s16 }
  0x28   : > { %v1666_v16 = vmov 0.0  }
  0x29   : > { %510 = vst [vmem:[#allocation2 + $0x30] sm:$0xff] %v1666_v16  ;;  %511 = vst [vmem:[#allocation2] sm:$0xff] %v1666_v16 }
  0x2a   : > { %512 = vst [vmem:[#allocation2 + $0x58] sm:$0xff] %v1666_v16  ;;  %513 = vst [vmem:[#allocation2 + $0x18] sm:$0xff] %v1666_v16 }
  0x2b   : > { %514 = vst [vmem:[#allocation2 + $0x50] sm:$0xff] %v1666_v16  ;;  %515 = vst [vmem:[#allocation2 + $0x68] sm:$0xff] %v1666_v16 }
  0x2c   : > { %516 = vst [vmem:[#allocation2 + $0x8] sm:$0xff] %v1666_v16  ;;  %517 = vst [vmem:[#allocation2 + $0x48] sm:$0xff] %v1666_v16 }
  0x2d   : > { %518 = vst [vmem:[#allocation2 + $0x40] sm:$0xff] %v1666_v16  ;;  %519 = vst [vmem:[#allocation2 + $0x20] sm:$0xff] %v1666_v16 }
  0x2e   : > { %520 = vst [vmem:[#allocation2 + $0x10] sm:$0xff] %v1666_v16  ;;  %521 = vst [vmem:[#allocation2 + $0x38] sm:$0xff] %v1666_v16 }
  0x2f   : > { %522 = vst [vmem:[#allocation2 + $0x60] sm:$0xff] %v1666_v16  ;;  %523 = vst [vmem:[#allocation2 + $0x70] sm:$0xff] %v1666_v16 }
  0x30   : > { %524 = vst [vmem:[#allocation2 + $0x78] sm:$0xff] %v1666_v16  ;;  %525 = vst [vmem:[#allocation2 + $0x28] sm:$0xff] %v1666_v16 }
  0x31 PF: > { %v1610_v17 = vld [vmem:[%s1770_s19 + $0x38] sm:$0xff]   ;;  %v1611_v18 = vld [vmem:[%s1770_s19 + $0x30] sm:$0xff]   ;;  %v1612_v19 = vld [vmem:[%s1770_s19 + $0x28] sm:$0xff]   ;;  %p1299_p11 = scmp.ne.s32.totalorder %s1656_s23, 8 }
  0x32   : > { %1521 = vmatprep.subr.bf16.mxu0 %v1610_v17  ;;  %1553 = vmatprep.subr.bf16.mxu1 %v1610_v17  ;;  %v1613_v20 = vld [vmem:[%s1770_s19 + $0x20] sm:$0xff]   ;;  %v1614_v23 = vld [vmem:[%s1770_s19 + $0x18] sm:$0xff]   ;;  %v1615_v24 = vld [vmem:[%s1770_s19 + $0x10] sm:$0xff]  }
  0x33   : > { %1522 = vmatpush3.bf16.msra.mxu0 %v1610_v17  ;;  %1561 = vmatpush3.bf16.msra.mxu1 %v1610_v17  ;;  %v1618_v21 = vld [vmem:[%s1772_s20] sm:$0xff]   ;;  %v1616_v25 = vld [vmem:[%s1770_s19 + $0x8] sm:$0xff]   ;;  %v1622_v29 = vld [vmem:[%s1772_s20 + $0x10] sm:$0xff]  }
  0x34   : > { %1523 = vmatprep.subr.bf16.mxu0 %v1611_v18  ;;  %1554 = vmatprep.subr.bf16.mxu1 %v1611_v18  ;;  %v1619_v22 = vld [vmem:[%s1772_s20 + $0x20] sm:$0xff]   ;;  %v1620_v27 = vld [vmem:[%s1772_s20 + $0x8] sm:$0xff]   ;;  %v1623_v30 = vld [vmem:[%s1772_s20 + $0x30] sm:$0xff]  }
  0x35   : > { %1537 = vmatprep.mubr.bf16.mxu0 %v1618_v21  ;;  %1545 = vmatprep.mubr.bf16.mxu1 %v1619_v22  ;;  %v1617_v26 = vld [vmem:[%s1770_s19] sm:$0xff]   ;;  %v1621_v28 = vld [vmem:[%s1772_s20 + $0x28] sm:$0xff]   ;;  %v1624_v31 = vld [vmem:[%s1772_s20 + $0x18] sm:$0xff]  }
  0x36   : > { %v1625_v32 = vld [vmem:[%s1772_s20 + $0x38] sm:$0xff]   ;;  %v536_v34 = vld [vmem:[#allocation2 + $0x10] sm:$0xff]  ;;  %v534_v38 = vld [vmem:[#allocation2 + $0x40] sm:$0xff] }
  0x37   : > { %1524 = vmatpush3.bf16.msra.mxu0 %v1611_v18  ;;  %1562 = vmatpush3.bf16.msra.mxu1 %v1611_v18  ;;  %v528_v33 = vld [vmem:[#allocation2 + $0x58] sm:$0xff]  ;;  %v526_v37 = vld [vmem:[#allocation2 + $0x30] sm:$0xff]  ;;  %v527_v49 = vld [vmem:[#allocation2] sm:$0xff] }
  0x38   : > { %1525 = vmatprep.subr.bf16.mxu0 %v1612_v19  ;;  %1555 = vmatprep.subr.bf16.mxu1 %v1612_v19  ;;  %v529_v43 = vld [vmem:[#allocation2 + $0x18] sm:$0xff]  ;;  %v535_v50 = vld [vmem:[#allocation2 + $0x20] sm:$0xff]  ;;  %v532_v55 = vld [vmem:[#allocation2 + $0x8] sm:$0xff] }
  0x39   : > { %v537_v44 = vld [vmem:[#allocation2 + $0x38] sm:$0xff]  ;;  %v530_v61 = vld [vmem:[#allocation2 + $0x50] sm:$0xff]  ;;  %v538_v62 = vld [vmem:[#allocation2 + $0x60] sm:$0xff] }
  0x3a   : > { %v540_v56 = vld [vmem:[#allocation2 + $0x78] sm:$0xff]  ;;  %v533_v3 = vld [vmem:[#allocation2 + $0x48] sm:$0xff]  ;;  %v539_v10 = vld [vmem:[#allocation2 + $0x70] sm:$0xff] }
  0x3b   : > { %1526 = vmatpush3.bf16.msra.mxu0 %v1612_v19  ;;  %1563 = vmatpush3.bf16.msra.mxu1 %v1612_v19  ;;  %v541_v4 = vld [vmem:[#allocation2 + $0x28] sm:$0xff] }
  0x3c   : > { %1527 = vmatprep.subr.bf16.mxu0 %v1613_v20  ;;  %1556 = vmatprep.subr.bf16.mxu1 %v1613_v20  ;;  %v531_v9 = vld [vmem:[#allocation2 + $0x68] sm:$0xff] }
  0x3f   : > { %1528 = vmatpush3.bf16.msra.mxu0 %v1613_v20  ;;  %1564 = vmatpush3.bf16.msra.mxu1 %v1613_v20 }
  0x40   : > { %1529 = vmatprep.subr.bf16.mxu0 %v1614_v23  ;;  %1557 = vmatprep.subr.bf16.mxu1 %v1614_v23 }
  0x43   : > { %1530 = vmatpush3.bf16.msra.mxu0 %v1614_v23  ;;  %1565 = vmatpush3.bf16.msra.mxu1 %v1614_v23 }
  0x44   : > { %1531 = vmatprep.subr.bf16.mxu0 %v1615_v24  ;;  %1558 = vmatprep.subr.bf16.mxu1 %v1615_v24 }
  0x47   : > { %1532 = vmatpush3.bf16.msra.mxu0 %v1615_v24  ;;  %1566 = vmatpush3.bf16.msra.mxu1 %v1615_v24 }
  0x48   : > { %1533 = vmatprep.subr.bf16.mxu0 %v1616_v25  ;;  %1559 = vmatprep.subr.bf16.mxu1 %v1616_v25 }
  0x4b   : > { %1534 = vmatpush3.bf16.msra.mxu0 %v1616_v25  ;;  %1567 = vmatpush3.bf16.msra.mxu1 %v1616_v25 }
  0x4c   : > { %1535 = vmatprep.subr.bf16.mxu0 %v1617_v26  ;;  %1560 = vmatprep.subr.bf16.mxu1 %v1617_v26 }
  0x4f   : > { %1536 = vmatpush3.bf16.msra.mxu0 %v1617_v26  ;;  %1568 = vmatpush3.bf16.msra.mxu1 %v1617_v26 }
  0x52   : > { %1538 = vmatmul.mubr.bf16.vlgmr.msra.gmra.mxu0 %v1620_v27  ;;  %1546 = vmatmul.mubr.bf16.vlgmr.msra.gmra.mxu1 %v1621_v28 }
  0x53   : > { %1541 = vmatprep.mubr.bf16.mxu0 %v1622_v29  ;;  %1549 = vmatprep.mubr.bf16.mxu1 %v1623_v30 }
  0x5a   : > { %1542 = vmatmul.mubr.bf16.gmra.mxu0 %v1624_v31  ;;  %1550 = vmatmul.mubr.bf16.gmra.mxu1 %v1625_v32 }
 0x112   : > { %v1539_v35 = vpop.f32.mrf.mxu0  ;;  %v1547_v36 = vpop.f32.mrf.mxu1 }
 0x113   : > { %v769_v39 = vadd.f32 %v1539_v35, %v528_v33  ;;  %v777_v40 = vadd.f32 %v1547_v36, %v536_v34 }
 0x114   : > { %v704_v41 = vpop.f32.mrf.mxu0  ;;  %v736_v42 = vpop.f32.mrf.mxu1 }
 0x115   : > { %785 = vst [vmem:[#allocation2 + $0x58] sm:$0xff] %v769_v39  ;;  %793 = vst [vmem:[#allocation2 + $0x10] sm:$0xff] %v777_v40  ;;  %v767_v45 = vadd.f32 %v704_v41, %v526_v37  ;;  %v775_v46 = vadd.f32 %v736_v42, %v534_v38 }
 0x116   : > { %v1540_v47 = vpop.f32.mrf.mxu0  ;;  %v1548_v48 = vpop.f32.mrf.mxu1 }
 0x117   : > { %783 = vst [vmem:[#allocation2 + $0x30] sm:$0xff] %v767_v45  ;;  %791 = vst [vmem:[#allocation2 + $0x40] sm:$0xff] %v775_v46  ;;  %v770_v51 = vadd.f32 %v1540_v47, %v529_v43  ;;  %v778_v52 = vadd.f32 %v1548_v48, %v537_v44 }
 0x118   : > { %v707_v53 = vpop.f32.mrf.mxu0  ;;  %v739_v54 = vpop.f32.mrf.mxu1 }
 0x119   : > { %786 = vst [vmem:[#allocation2 + $0x18] sm:$0xff] %v770_v51  ;;  %794 = vst [vmem:[#allocation2 + $0x38] sm:$0xff] %v778_v52  ;;  %v768_v57 = vadd.f32 %v707_v53, %v527_v49  ;;  %v776_v58 = vadd.f32 %v739_v54, %v535_v50 }
 0x11a   : > { %v1543_v59 = vpop.f32.mrf.mxu0  ;;  %v1551_v60 = vpop.f32.mrf.mxu1 }
 0x11b   : > { %784 = vst [vmem:[#allocation2] sm:$0xff] %v768_v57  ;;  %792 = vst [vmem:[#allocation2 + $0x20] sm:$0xff] %v776_v58  ;;  %v773_v63 = vadd.f32 %v1543_v59, %v532_v55  ;;  %v781_v0 = vadd.f32 %v1551_v60, %v540_v56 }
 0x11c   : > { %v720_v1 = vpop.f32.mrf.mxu0  ;;  %v752_v2 = vpop.f32.mrf.mxu1 }
 0x11d   : > { %789 = vst [vmem:[#allocation2 + $0x8] sm:$0xff] %v773_v63  ;;  %797 = vst [vmem:[#allocation2 + $0x78] sm:$0xff] %v781_v0  ;;  %v771_v5 = vadd.f32 %v720_v1, %v530_v61  ;;  %v779_v6 = vadd.f32 %v752_v2, %v538_v62 }
 0x11e   : > { %v1544_v7 = vpop.f32.mrf.mxu0  ;;  %v1552_v8 = vpop.f32.mrf.mxu1 }
 0x11f   : > { %787 = vst [vmem:[#allocation2 + $0x50] sm:$0xff] %v771_v5  ;;  %795 = vst [vmem:[#allocation2 + $0x60] sm:$0xff] %v779_v6  ;;  %v774_v11 = vadd.f32 %v1544_v7, %v533_v3  ;;  %v782_v12 = vadd.f32 %v1552_v8, %v541_v4  ;;  %802 = sbr.rel (%p1299_p11) target bundleno = 323 (0x143), region = 89 }
 0x120   : > { %v723_v13 = vpop.f32.mrf.mxu0  ;;  %v755_v14 = vpop.f32.mrf.mxu1 }
 0x121   : > { %790 = vst [vmem:[#allocation2 + $0x48] sm:$0xff] %v774_v11  ;;  %798 = vst [vmem:[#allocation2 + $0x28] sm:$0xff] %v782_v12  ;;  %v772_v15 = vadd.f32 %v723_v13, %v531_v9  ;;  %v780_v16 = vadd.f32 %v755_v14, %v539_v10 }
 0x123   : > { %788 = vst [vmem:[#allocation2 + $0x68] sm:$0xff] %v772_v15  ;;  %796 = vst [vmem:[#allocation2 + $0x70] sm:$0xff] %v780_v16 }
 0x124   : > { %v803_v17 = vld [vmem:[#allocation2 + $0x30] sm:$0xff]  ;;  %v804_v18 = vld [vmem:[#allocation2] sm:$0xff]  ;;  %v805_v23 = vld [vmem:[#allocation2 + $0x58] sm:$0xff] }
 0x125   : > { %v1373_v19 = vld [vmem:[%s1926_s2] sm:$0xff]   ;;  %v806_v24 = vld [vmem:[#allocation2 + $0x18] sm:$0xff]  ;;  %v1484_v25 = vld [vmem:[%s1926_s2 + $0x8] sm:$0xff]  }
 0x126   : > { %v1374_v20 = vunpack.c.l.bf16 %v1373_v19  ;;  %v1375_v21 = vunpack.c.h.bf16 %v1373_v19  ;;  %v1798_v22 = vld [vmem:[%s1927_s3] ss:$0 sm:$0xff]  ;;  %v1378_v28 = vunpack.c.l.bf16 %v1484_v25  ;;  %v1379_v29 = vunpack.c.h.bf16 %v1484_v25  ;;  %v807_v30 = vld [vmem:[#allocation2 + $0x50] sm:$0xff]  ;;  %v1486_v35 = vld [vmem:[%s1926_s2 + $0x18] sm:$0xff]  }
 0x127   : > { %v1485_v32 = vld [vmem:[%s1926_s2 + $0x10] sm:$0xff]   ;;  %v1487_v40 = vld [vmem:[%s1926_s2 + $0x20] sm:$0xff]   ;;  %v809_v44 = vld [vmem:[#allocation2 + $0x8] sm:$0xff]  ;;  %v1386_v46 = vunpack.c.l.bf16 %v1486_v35  ;;  %v1387_v49 = vunpack.c.h.bf16 %v1486_v35 }
 0x128   : > { %v851_v26 = vadd.f32 %v1374_v20, %v803_v17  ;;  %v852_v27 = vadd.f32 %v1375_v21, %v804_v18  ;;  %v1382_v33 = vunpack.c.l.bf16 %v1485_v32  ;;  %v1383_v34 = vunpack.c.h.bf16 %v1485_v32  ;;  %v810_v45 = vld [vmem:[#allocation2 + $0x48] sm:$0xff]  ;;  %v811_v47 = vld [vmem:[#allocation2 + $0x40] sm:$0xff]  ;;  %v1489_v54 = vld [vmem:[%s1926_s2 + $0x30] sm:$0xff]  }
 0x129   : > { %v853_v39 = vadd.f32 %v1378_v28, %v805_v23  ;;  %v854_v41 = vadd.f32 %v1379_v29, %v806_v24  ;;  %v812_v50 = vld [vmem:[#allocation2 + $0x20] sm:$0xff]  ;;  %v1390_v51 = vunpack.c.l.bf16 %v1487_v40  ;;  %v1391_v52 = vunpack.c.h.bf16 %v1487_v40  ;;  %v1488_v53 = vld [vmem:[%s1926_s2 + $0x28] sm:$0xff]   ;;  %v813_v63 = vld [vmem:[#allocation2 + $0x10] sm:$0xff] }
 0x12a   : > { %v808_v31 = vld [vmem:[#allocation2 + $0x68] sm:$0xff]  ;;  %v1407_v36 = vpack.c.bf16 %v852_v27, %v851_v26  ;;  %v954_v37 = vmul.f32 %v1798_v22, %v851_v26  ;;  %v1811_v38 = vmul.f32 %v1798_v22, %v852_v27  ;;  %v855_v42 = vadd.f32 %v1382_v33, %v807_v30  ;;  %v814_v0 = vld [vmem:[#allocation2 + $0x38] sm:$0xff]  ;;  %v815_v4 = vld [vmem:[#allocation2 + $0x60] sm:$0xff] }
 0x12b   : > { %v856_v43 = vadd.f32 %v1383_v34, %v808_v31  ;;  %v956_v48 = vmul.f32 %v1798_v22, %v853_v39  ;;  %v1412_v55 = vpack.c.bf16 %v854_v41, %v853_v39  ;;  %v957_v56 = vmul.f32 %v1798_v22, %v854_v41  ;;  %v1490_v6 = vld [vmem:[%s1926_s2 + $0x38] sm:$0xff]   ;;  %v1844_v11 = vld [vmem:[%s1928_s4] ss:$0 sm:$0xff]  ;;  %v816_v16 = vld [vmem:[#allocation2 + $0x70] sm:$0xff] }
 0x12c   : > { %1408 = vst [vmem:[%s1929_s5] sm:$0xff] %v1407_v36   ;;  %v958_v58 = vmul.f32 %v1798_v22, %v855_v42  ;;  %v857_v60 = vadd.f32 %v1386_v46, %v809_v44  ;;  %v858_v61 = vadd.f32 %v1387_v49, %v810_v45  ;;  %v859_v62 = vadd.f32 %v1390_v51, %v811_v47  ;;  %v817_v17 = vld [vmem:[#allocation2 + $0x78] sm:$0xff]  ;;  %v818_v18 = vld [vmem:[#allocation2 + $0x28] sm:$0xff] }
 0x12d   : > { %v1417_v57 = vpack.c.bf16 %v856_v43, %v855_v42  ;;  %v959_v59 = vmul.f32 %v1798_v22, %v856_v43  ;;  %1491 = vst [vmem:[%s1929_s5 + $0x8] sm:$0xff] %v1412_v55   ;;  %v860_v1 = vadd.f32 %v1391_v52, %v812_v50  ;;  %v1394_v2 = vunpack.c.l.bf16 %v1488_v53 }
 0x12e   : > { %v1395_v3 = vunpack.c.h.bf16 %v1488_v53  ;;  %v1398_v5 = vunpack.c.l.bf16 %v1489_v54  ;;  %v1422_v7 = vpack.c.bf16 %v858_v61, %v857_v60  ;;  %v960_v8 = vmul.f32 %v1798_v22, %v857_v60 }
 0x12f   : > { %1492 = vst [vmem:[%s1929_s5 + $0x10] sm:$0xff] %v1417_v57   ;;  %v961_v9 = vmul.f32 %v1798_v22, %v858_v61  ;;  %v962_v10 = vmul.f32 %v1798_v22, %v859_v62  ;;  %v1427_v12 = vpack.c.bf16 %v860_v1, %v859_v62  ;;  %v963_v13 = vmul.f32 %v1798_v22, %v860_v1 }
 0x130   : > { %v861_v14 = vadd.f32 %v1394_v2, %v813_v63  ;;  %v862_v15 = vadd.f32 %v1395_v3, %v814_v0  ;;  %1493 = vst [vmem:[%s1929_s5 + $0x18] sm:$0xff] %v1422_v7   ;;  %v1399_v19 = vunpack.c.h.bf16 %v1489_v54  ;;  %v863_v20 = vadd.f32 %v1398_v5, %v815_v4 }
 0x131   : > { %v1402_v21 = vunpack.c.l.bf16 %v1490_v6  ;;  %v1403_v23 = vunpack.c.h.bf16 %v1490_v6  ;;  %1494 = vst [vmem:[%s1929_s5 + $0x20] sm:$0xff] %v1427_v12   ;;  %v977_v27 = vadd.f32 %v1844_v11, %v954_v37  ;;  %v978_v32 = vadd.f32 %v1844_v11, %v1811_v38 }
 0x132   : > { %v1432_v24 = vpack.c.bf16 %v862_v15, %v861_v14  ;;  %v964_v25 = vmul.f32 %v1798_v22, %v861_v14  ;;  %v965_v26 = vmul.f32 %v1798_v22, %v862_v15  ;;  %v864_v28 = vadd.f32 %v1399_v19, %v816_v16 }
 0x133   : > { %v966_v29 = vmul.f32 %v1798_v22, %v863_v20  ;;  %v865_v30 = vadd.f32 %v1402_v21, %v817_v17  ;;  %v866_v31 = vadd.f32 %v1403_v23, %v818_v18  ;;  %v993_v33 = vmax.f32 %v977_v27, 0.0 }
 0x134   : > { %1495 = vst [vmem:[%s1929_s5 + $0x28] sm:$0xff] %v1432_v24   ;;  %v979_v34 = vadd.f32 %v1844_v11, %v956_v48  ;;  %v980_v35 = vadd.f32 %v1844_v11, %v957_v56  ;;  %v1437_v36 = vpack.c.bf16 %v864_v28, %v863_v20  ;;  %v967_v37 = vmul.f32 %v1798_v22, %v864_v28 }
 0x135   : > { %v1442_v39 = vpack.c.bf16 %v866_v31, %v865_v30  ;;  %v968_v40 = vmul.f32 %v1798_v22, %v865_v30  ;;  %v969_v41 = vmul.f32 %v1798_v22, %v866_v31  ;;  %v994_v42 = vmax.f32 %v978_v32, 0.0 }
 0x136   : > { %v995_v43 = vmax.f32 %v979_v34, 0.0  ;;  %v996_v44 = vmax.f32 %v980_v35, 0.0  ;;  %1496 = vst [vmem:[%s1929_s5 + $0x30] sm:$0xff] %v1437_v36   ;;  %v981_v38 = vadd.f32 %v1844_v11, %v958_v58  ;;  %v982_v45 = vadd.f32 %v1844_v11, %v959_v59 }
 0x137   : > { %1497 = vst [vmem:[%s1929_s5 + $0x38] sm:$0xff] %v1442_v39   ;;  %v983_v46 = vadd.f32 %v1844_v11, %v960_v8  ;;  %v984_v47 = vadd.f32 %v1844_v11, %v961_v9  ;;  %v1447_v22 = vpack.c.bf16 %v994_v42, %v993_v33  ;;  %v985_v49 = vadd.f32 %v1844_v11, %v962_v10 }
 0x138   : > { %v1452_v48 = vpack.c.bf16 %v996_v44, %v995_v43  ;;  %v986_v50 = vadd.f32 %v1844_v11, %v963_v13  ;;  %v997_v51 = vmax.f32 %v981_v38, 0.0  ;;  %v998_v52 = vmax.f32 %v982_v45, 0.0 }
 0x139   : > { %v999_v53 = vmax.f32 %v983_v46, 0.0  ;;  %v1000_v54 = vmax.f32 %v984_v47, 0.0  ;;  %1448 = vst [vmem:[%s1930_s6] sm:$0xff] %v1447_v22   ;;  %v1001_v55 = vmax.f32 %v985_v49, 0.0  ;;  %v987_v57 = vadd.f32 %v1844_v11, %v964_v25 }
 0x13a   : > { %1498 = vst [vmem:[%s1930_s6 + $0x8] sm:$0xff] %v1452_v48   ;;  %v1002_v56 = vmax.f32 %v986_v50, 0.0  ;;  %v988_v58 = vadd.f32 %v1844_v11, %v965_v26  ;;  %v1457_v59 = vpack.c.bf16 %v998_v52, %v997_v51  ;;  %v989_v61 = vadd.f32 %v1844_v11, %v966_v29 }
 0x13b   : > { %v1462_v60 = vpack.c.bf16 %v1000_v54, %v999_v53  ;;  %v990_v62 = vadd.f32 %v1844_v11, %v967_v37  ;;  %v1003_v0 = vmax.f32 %v987_v57, 0.0  ;;  %v991_v2 = vadd.f32 %v1844_v11, %v968_v40 }
 0x13c   : > { %v1467_v63 = vpack.c.bf16 %v1002_v56, %v1001_v55  ;;  %v1004_v1 = vmax.f32 %v988_v58, 0.0  ;;  %1499 = vst [vmem:[%s1930_s6 + $0x10] sm:$0xff] %v1457_v59   ;;  %v1005_v3 = vmax.f32 %v989_v61, 0.0  ;;  %v992_v5 = vadd.f32 %v1844_v11, %v969_v41 }
 0x13d   : > { %1500 = vst [vmem:[%s1930_s6 + $0x18] sm:$0xff] %v1462_v60   ;;  %v1006_v4 = vmax.f32 %v990_v62, 0.0  ;;  %v1007_v7 = vmax.f32 %v991_v2, 0.0 }
 0x13e   : > { %1501 = vst [vmem:[%s1930_s6 + $0x20] sm:$0xff] %v1467_v63   ;;  %v1472_v6 = vpack.c.bf16 %v1004_v1, %v1003_v0  ;;  %v1008_v9 = vmax.f32 %v992_v5, 0.0 }
 0x13f   : > { %v1477_v8 = vpack.c.bf16 %v1006_v4, %v1005_v3 }
 0x140   : > { %1502 = vst [vmem:[%s1930_s6 + $0x28] sm:$0xff] %v1472_v6   ;;  %v1482_v10 = vpack.c.bf16 %v1008_v9, %v1007_v7 }
 0x141   : > { %1503 = vst [vmem:[%s1930_s6 + $0x30] sm:$0xff] %v1477_v8  }
 0x142   : > { %1504 = vst [vmem:[%s1930_s6 + $0x38] sm:$0xff] %v1482_v10  }
 0x143 PF: > { %s17_s25 = sadd.s32 1, %s1664_s25   ;;  %s1931_s21 = smov %s1652_s22 }
 0x144   : > { %p14_p12 = scmp.ge.s32.totalorder %s17_s25, 11   ;;  %s1932_s22 = smov %s1737_s29 }
 0x145   : > { %s1933_s23 = smov %s1660_s24  ;;  %s1934_s24 = smov %s1936_s26 }
 0x146   :  { %16 = sbr.rel (!%p14_p12) target bundleno = 3 (0x3), region = 148 }

// kernel: _lambda_.13
= control target key start
LH: loop header
LB: loop body
LE: loop exit
PB: predicated region body
PF: predicated region fallthrough
CT: control target
= control target key end

     0   :  { %s798_s12 = smov 0   ;;  %s800_s13 = smov 0   ;;  %s891_s0 = inlined_call_operand.vmem [shape: bf16[32,1152], index: 0, kind: input, shape index: {}]   ;;  %s892_s1 = inlined_call_operand.vmem [shape: bf16[1152,128], index: 1, kind: input, shape index: {}]   ;;  %s893_s2 = inlined_call_operand.vmem [shape: f32[1,128], index: 2, kind: input, shape index: {}]   ;;  %s894_s3 = inlined_call_operand.vmem [shape: bf16[32,128], index: 3, kind: output, shape index: {}]  }
   0x1   :  { %s802_s14 = smov 0   ;;  %s804_s15 = smov 0  }
   0x2   :  { %s806_s16 = smov 0  }
   0x3 LB: > { %s25_s17 = sadd.s32 1, %s771_s15  ;;  %p48_p1 = scmp.ne.s32.totalorder %s763_s13, %s759_s12  ;;  %s775_s16 = sphi %s806_s16, %s13_s16   ;;  %s771_s15 = sphi %s804_s15, %s898_s15   ;;  %s767_s14 = sphi %s802_s14, %s897_s14   ;;  %s763_s13 = sphi %s800_s13, %s896_s13   ;;  %s759_s12 = sphi %s798_s12, %s895_s12  }
   0x4   : > { %p26_p0 = scmp.ge.s32.totalorder %s25_s17, 9  ;;  %p49_p2 = scmp.eq.s32.totalorder %s775_s16, 0 }
   0x5   : > { %s41_s19 = sadd.s32 1, %s763_s13  ;;  %p613_p5 = scmp.ge.s32.totalorder %s775_s16, 9 }
   0x6   : > { %s900_s17 = smov (%p26_p0, %s25_s17), 0  ;;  %p50_p3 = por %p49_p2, %p48_p1 }
   0x7   : > { %s37_s18 = ssub.s32 %s771_s15, %s900_s17  ;;  %162 = sbr.rel (%p613_p5) target bundleno = 18 (0x12), region = 20 }
   0x8   : > { %p39_p4 = scmp.eq.s32.totalorder %s37_s18, 0 }
   0xa   : > { %s833_s20 = scalar_select %p39_p4, %s763_s13, %s41_s19  }
   0xc   : > { %165 = sbr.rel (!%p50_p3) target bundleno = 18 (0x12), region = 24  ;;  %s167_s21 = sand.u32 (%p50_p3), 1, %s763_s13  }
   0xd   : > { %s615_s22 = sshll.u32 (%p50_p3), %s771_s15, 2  ;;  %s614_s23 = sshll.u32 (%p50_p3), %s167_s21, 4 }
   0xe   : > { %s174_s26 = scalar_lea.vmem (%p50_p3), %s891_s0, %s615_s22  ;;  %s169_s27 = scalar_lea.vmem (%p50_p3), [#allocation3], %s614_s23 }
   0xf   : > { %v191_v0 = vld [vmem:[%s174_s26] sm:$0xf] (%p50_p3)  ;;  %v193_v1 = vld [vmem:[%s174_s26 + $0x24] sm:$0xf] (%p50_p3)  ;;  %v195_v2 = vld [vmem:[%s174_s26 + $0x48] sm:$0xf] (%p50_p3) }
  0x10   : > { %192 = vst [vmem:[%s169_s27] sm:$0xf] (%p50_p3), %v191_v0  ;;  %194 = vst [vmem:[%s169_s27 + $0x4] sm:$0xf] (%p50_p3), %v193_v1  ;;  %v197_v3 = vld [vmem:[%s174_s26 + $0x6c] sm:$0xf] (%p50_p3) }
  0x11   : > { %196 = vst [vmem:[%s169_s27 + $0x8] sm:$0xf] %v195_v2  ;;  %198 = vst [vmem:[%s169_s27 + $0xc] sm:$0xf] %v197_v3 }
  0x12 PF: > { %p616_p6 = scmp.ge.s32.totalorder %s775_s16, 1  ;;  %p241_p7 = scmp.lt.s32.totalorder %s775_s16, 10 }
  0x14   : > { %p242_p8 = pnand %p616_p6, %p241_p7 }
  0x15   : > { %s248_s28 = sand.u32 (!%p242_p8), 1, %s759_s12   ;;  %s618_s29 = sshll.u32 (!%p242_p8), %s767_s14, 4 }
  0x16   : > { %245 = sbr.rel (%p242_p8) target bundleno = 284 (0x11c), region = 69  ;;  %s845_s30 = sshll.u32 (!%p242_p8), %s248_s28, 4 }
  0x17   : > { %p287_p9 = scmp.lt.s32.totalorder (!%p242_p8), %s618_s29, 143  ;;  %s250_s8 = scalar_lea.vmem (!%p242_p8), [#allocation3], %s845_s30 }
  0x18   : > { %p620_p10 = scmp.ne.s32.totalorder (!%p242_p8), %s767_s14, 0 }
  0x1b   : > { %s902_s29 = smov (!%p287_p9, %s618_s29), 143  ;;  %311 = sbr.rel (%p620_p10) target bundleno = 35 (0x23), region = 77 }
  0x1c   : > { %s619_s4 = sshll.u32 %s902_s29, 2 }
  0x1d   : > { %s850_s7 = scalar_lea.vmem %s892_s1, %s619_s4 }
  0x20   : > { %v777_v4 = vmov 0.0  }
  0x21   : > { %312 = vst [vmem:[#allocation2 + $0x10] sm:$0xff] %v777_v4  ;;  %313 = vst [vmem:[#allocation2] sm:$0xff] %v777_v4 }
  0x22   : > { %314 = vst [vmem:[#allocation2 + $0x18] sm:$0xff] %v777_v4  ;;  %315 = vst [vmem:[#allocation2 + $0x8] sm:$0xff] %v777_v4 }
  0x23 PF: > { %v727_v5 = vld [vmem:[%s850_s7 + $0x38] sm:$0xff]   ;;  %v728_v6 = vld [vmem:[%s850_s7 + $0x30] sm:$0xff]   ;;  %v729_v7 = vld [vmem:[%s850_s7 + $0x28] sm:$0xff]   ;;  %p631_p11 = scmp.ne.s32.totalorder %s767_s14, 8 }
  0x24   : > { %666 = vmatprep.subr.bf16.mxu0 %v727_v5  ;;  %v730_v8 = vld [vmem:[%s850_s7 + $0x20] sm:$0xff]   ;;  %v731_v10 = vld [vmem:[%s850_s7 + $0x18] sm:$0xff]   ;;  %v732_v11 = vld [vmem:[%s850_s7 + $0x10] sm:$0xff]  }
  0x25   : > { %667 = vmatpush3.bf16.msra.mxu0 %v727_v5  ;;  %v735_v9 = vld [vmem:[%s250_s8] sm:$0xff]   ;;  %v733_v12 = vld [vmem:[%s850_s7 + $0x8] sm:$0xff]  }
  0x26   : > { %668 = vmatprep.subr.bf16.mxu0 %v728_v6  ;;  %682 = vmatprep.mubr.bf16.mxu0 %v735_v9  ;;  %v734_v13 = vld [vmem:[%s850_s7] sm:$0xff]   ;;  %v736_v14 = vld [vmem:[%s250_s8 + $0x8] sm:$0xff]  }
  0x28   : > { %v316_v17 = vld [vmem:[#allocation2 + $0x10] sm:$0xff]  ;;  %v317_v23 = vld [vmem:[#allocation2] sm:$0xff] }
  0x29   : > { %669 = vmatpush3.bf16.msra.mxu0 %v728_v6  ;;  %v318_v15 = vld [vmem:[#allocation2 + $0x18] sm:$0xff]  ;;  %v319_v20 = vld [vmem:[#allocation2 + $0x8] sm:$0xff] }
  0x2a   : > { %670 = vmatprep.subr.bf16.mxu0 %v729_v7 }
  0x2d   : > { %671 = vmatpush3.bf16.msra.mxu0 %v729_v7 }
  0x2e   : > { %672 = vmatprep.subr.bf16.mxu0 %v730_v8 }
  0x31   : > { %673 = vmatpush3.bf16.msra.mxu0 %v730_v8 }
  0x32   : > { %674 = vmatprep.subr.bf16.mxu0 %v731_v10 }
  0x35   : > { %675 = vmatpush3.bf16.msra.mxu0 %v731_v10 }
  0x36   : > { %676 = vmatprep.subr.bf16.mxu0 %v732_v11 }
  0x39   : > { %677 = vmatpush3.bf16.msra.mxu0 %v732_v11 }
  0x3a   : > { %678 = vmatprep.subr.bf16.mxu0 %v733_v12 }
  0x3d   : > { %679 = vmatpush3.bf16.msra.mxu0 %v733_v12 }
  0x3e   : > { %680 = vmatprep.subr.bf16.mxu0 %v734_v13 }
  0x41   : > { %681 = vmatpush3.bf16.msra.mxu0 %v734_v13 }
  0x44   : > { %683 = vmatmul.mubr.bf16.vlgmr.msra.gmra.mxu0 %v736_v14 }
 0x104   : > { %v684_v16 = vpop.f32.mrf.mxu0 }
 0x105   : > { %v451_v18 = vadd.f32 %v684_v16, %v318_v15 }
 0x106   : > { %v434_v19 = vpop.f32.mrf.mxu0 }
 0x107   : > { %455 = vst [vmem:[#allocation2 + $0x18] sm:$0xff] %v451_v18  ;;  %v449_v21 = vadd.f32 %v434_v19, %v316_v17 }
 0x108   : > { %v685_v22 = vpop.f32.mrf.mxu0 }
 0x109   : > { %453 = vst [vmem:[#allocation2 + $0x10] sm:$0xff] %v449_v21  ;;  %v452_v24 = vadd.f32 %v685_v22, %v319_v20  ;;  %460 = sbr.rel (%p631_p11) target bundleno = 284 (0x11c), region = 81 }
 0x10a   : > { %v437_v25 = vpop.f32.mrf.mxu0 }
 0x10b   : > { %456 = vst [vmem:[#allocation2 + $0x8] sm:$0xff] %v452_v24  ;;  %v450_v26 = vadd.f32 %v437_v25, %v317_v23 }
 0x10d   : > { %454 = vst [vmem:[#allocation2] sm:$0xff] %v450_v26 }
 0x10e   : > { %v632_v29 = vld [vmem:[%s893_s2] ss:$0 sm:$0xff]  ;;  %v463_v32 = vld [vmem:[#allocation2 + $0x18] sm:$0xff] }
 0x10f   : > { %v474_v34 = vadd.f32 %v632_v29, %v463_v32 }
 0x110   : > { %v461_v27 = vld [vmem:[#allocation2 + $0x10] sm:$0xff] }
 0x111   : > { %v472_v30 = vadd.f32 %v632_v29, %v461_v27  ;;  %v478_v38 = vmax.f32 %v474_v34, 0.0 }
 0x112   : > { %v464_v33 = vld [vmem:[#allocation2 + $0x8] sm:$0xff] }
 0x113   : > { %v475_v35 = vadd.f32 %v632_v29, %v464_v33  ;;  %v476_v36 = vmax.f32 %v472_v30, 0.0 }
 0x114   : > { %v462_v28 = vld [vmem:[#allocation2] sm:$0xff] }
 0x115   : > { %v473_v31 = vadd.f32 %v632_v29, %v462_v28  ;;  %v479_v39 = vmax.f32 %v475_v35, 0.0 }
 0x117   : > { %v477_v37 = vmax.f32 %v473_v31, 0.0  ;;  %v653_v41 = vpack.c.bf16 %v479_v39, %v478_v38 }
 0x119   : > { %v648_v40 = vpack.c.bf16 %v477_v37, %v476_v36  ;;  %655 = vst [vmem:[%s894_s3 + $0x8] sm:$0xff] %v653_v41  }
 0x11b   : > { %649 = vst [vmem:[%s894_s3] sm:$0xff] %v648_v40  }
 0x11c PF: > { %s13_s16 = sadd.s32 1, %s775_s16   ;;  %s895_s12 = smov %s763_s13 }
 0x11d   : > { %p10_p12 = scmp.ge.s32.totalorder %s13_s16, 11   ;;  %s896_s13 = smov %s833_s20 }
 0x11e   : > { %s897_s14 = smov %s771_s15  ;;  %s898_s15 = smov %s900_s17 }
 0x11f   :  { %12 = sbr.rel (!%p10_p12) target bundleno = 3 (0x3), region = 122 }

// kernel: _lambda_.15
= control target key start
LH: loop header
LB: loop body
LE: loop exit
PB: predicated region body
PF: predicated region fallthrough
CT: control target
= control target key end

     0   :  { %s1110_s21 = smov 0   ;;  %s1112_s22 = smov 0   ;;  %s1218_s0 = inlined_call_operand.vmem [shape: bf16[32,1152], index: 0, kind: input, shape index: {}]   ;;  %s1219_s1 = inlined_call_operand.vmem [shape: bf16[1152,128], index: 1, kind: input, shape index: {}]   ;;  %s1220_s2 = inlined_call_operand.vmem [shape: bf16[32,128], index: 2, kind: input, shape index: {}]   ;;  %s1221_s3 = inlined_call_operand.vmem [shape: f32[1,128], index: 3, kind: input, shape index: {}]   ;;  %s1222_s4 = inlined_call_operand.vmem [shape: f32[1,128], index: 4, kind: input, shape index: {}]   ;;  %s1223_s5 = inlined_call_operand.vmem [shape: bf16[32,128], index: 5, kind: output, shape index: {0}]   ;;  %s1224_s6 = inlined_call_operand.vmem [shape: bf16[32,128], index: 6, kind: output, shape index: {1}]  }
   0x1   :  { %s1114_s23 = smov 0   ;;  %s1116_s24 = smov 0  }
   0x2   :  { %s1118_s25 = smov 0  }
   0x3 LB: > { %s29_s26 = sadd.s32 1, %s1068_s24  ;;  %p52_p1 = scmp.ne.s32.totalorder %s1060_s22, %s1056_s21  ;;  %s1072_s25 = sphi %s1118_s25, %s17_s25   ;;  %s1068_s24 = sphi %s1116_s24, %s1228_s24   ;;  %s1064_s23 = sphi %s1114_s23, %s1227_s23   ;;  %s1060_s22 = sphi %s1112_s22, %s1226_s22   ;;  %s1056_s21 = sphi %s1110_s21, %s1225_s21  }
   0x4   : > { %p30_p0 = scmp.ge.s32.totalorder %s29_s26, 9  ;;  %p53_p2 = scmp.eq.s32.totalorder %s1072_s25, 0 }
   0x5   : > { %s45_s28 = sadd.s32 1, %s1060_s22  ;;  %p879_p5 = scmp.ge.s32.totalorder %s1072_s25, 9 }
   0x6   : > { %s1230_s26 = smov (%p30_p0, %s29_s26), 0  ;;  %p54_p3 = por %p53_p2, %p52_p1 }
   0x7   : > { %s41_s27 = ssub.s32 %s1068_s24, %s1230_s26  ;;  %266 = sbr.rel (%p879_p5) target bundleno = 18 (0x12), region = 28 }
   0x8   : > { %p43_p4 = scmp.eq.s32.totalorder %s41_s27, 0 }
   0xa   : > { %s1145_s29 = scalar_select %p43_p4, %s1060_s22, %s45_s28  }
   0xc   : > { %269 = sbr.rel (!%p54_p3) target bundleno = 18 (0x12), region = 32  ;;  %s271_s30 = sand.u32 (%p54_p3), 1, %s1060_s22  }
   0xd   : > { %s881_s7 = sshll.u32 (%p54_p3), %s1068_s24, 2  ;;  %s880_s8 = sshll.u32 (%p54_p3), %s271_s30, 4 }
   0xe   : > { %s278_s11 = scalar_lea.vmem (%p54_p3), %s1218_s0, %s881_s7  ;;  %s273_s12 = scalar_lea.vmem (%p54_p3), [#allocation3], %s880_s8 }
   0xf   : > { %v295_v0 = vld [vmem:[%s278_s11] sm:$0xf] (%p54_p3)  ;;  %v297_v1 = vld [vmem:[%s278_s11 + $0x24] sm:$0xf] (%p54_p3)  ;;  %v299_v2 = vld [vmem:[%s278_s11 + $0x48] sm:$0xf] (%p54_p3) }
  0x10   : > { %296 = vst [vmem:[%s273_s12] sm:$0xf] (%p54_p3), %v295_v0  ;;  %298 = vst [vmem:[%s273_s12 + $0x4] sm:$0xf] (%p54_p3), %v297_v1  ;;  %v301_v3 = vld [vmem:[%s278_s11 + $0x6c] sm:$0xf] (%p54_p3) }
  0x11   : > { %300 = vst [vmem:[%s273_s12 + $0x8] sm:$0xf] %v299_v2  ;;  %302 = vst [vmem:[%s273_s12 + $0xc] sm:$0xf] %v301_v3 }
  0x12 PF: > { %p882_p6 = scmp.ge.s32.totalorder %s1072_s25, 1  ;;  %p345_p7 = scmp.lt.s32.totalorder %s1072_s25, 10 }
  0x14   : > { %p346_p8 = pnand %p882_p6, %p345_p7 }
  0x15   : > { %s352_s13 = sand.u32 (!%p346_p8), 1, %s1056_s21   ;;  %s884_s14 = sshll.u32 (!%p346_p8), %s1064_s23, 4 }
  0x16   : > { %349 = sbr.rel (%p346_p8) target bundleno = 288 (0x120), region = 77  ;;  %s1157_s15 = sshll.u32 (!%p346_p8), %s352_s13, 4 }
  0x17   : > { %p416_p9 = scmp.lt.s32.totalorder (!%p346_p8), %s884_s14, 143  ;;  %s354_s20 = scalar_lea.vmem (!%p346_p8), [#allocation3], %s1157_s15 }
  0x18   : > { %p886_p10 = scmp.ne.s32.totalorder (!%p346_p8), %s1064_s23, 0 }
  0x1b   : > { %s1232_s14 = smov (!%p416_p9, %s884_s14), 143  ;;  %461 = sbr.rel (%p886_p10) target bundleno = 35 (0x23), region = 85 }
  0x1c   : > { %s885_s16 = sshll.u32 %s1232_s14, 2 }
  0x1d   : > { %s1162_s19 = scalar_lea.vmem %s1219_s1, %s885_s16 }
  0x20   : > { %v1074_v4 = vmov 0.0  }
  0x21   : > { %462 = vst [vmem:[#allocation2 + $0x10] sm:$0xff] %v1074_v4  ;;  %463 = vst [vmem:[#allocation2] sm:$0xff] %v1074_v4 }
  0x22   : > { %464 = vst [vmem:[#allocation2 + $0x18] sm:$0xff] %v1074_v4  ;;  %465 = vst [vmem:[#allocation2 + $0x8] sm:$0xff] %v1074_v4 }
  0x23 PF: > { %v1024_v5 = vld [vmem:[%s1162_s19 + $0x38] sm:$0xff]   ;;  %v1025_v6 = vld [vmem:[%s1162_s19 + $0x30] sm:$0xff]   ;;  %v1026_v7 = vld [vmem:[%s1162_s19 + $0x28] sm:$0xff]   ;;  %p897_p11 = scmp.ne.s32.totalorder %s1064_s23, 8 }
  0x24   : > { %963 = vmatprep.subr.bf16.mxu0 %v1024_v5  ;;  %v1027_v8 = vld [vmem:[%s1162_s19 + $0x20] sm:$0xff]   ;;  %v1028_v10 = vld [vmem:[%s1162_s19 + $0x18] sm:$0xff]   ;;  %v1029_v11 = vld [vmem:[%s1162_s19 + $0x10] sm:$0xff]  }
  0x25   : > { %964 = vmatpush3.bf16.msra.mxu0 %v1024_v5  ;;  %v1032_v9 = vld [vmem:[%s354_s20] sm:$0xff]   ;;  %v1030_v12 = vld [vmem:[%s1162_s19 + $0x8] sm:$0xff]  }
  0x26   : > { %965 = vmatprep.subr.bf16.mxu0 %v1025_v6  ;;  %979 = vmatprep.mubr.bf16.mxu0 %v1032_v9  ;;  %v1031_v13 = vld [vmem:[%s1162_s19] sm:$0xff]   ;;  %v1033_v14 = vld [vmem:[%s354_s20 + $0x8] sm:$0xff]  }
  0x28   : > { %v466_v17 = vld [vmem:[#allocation2 + $0x10] sm:$0xff]  ;;  %v467_v23 = vld [vmem:[#allocation2] sm:$0xff] }
  0x29   : > { %966 = vmatpush3.bf16.msra.mxu0 %v1025_v6  ;;  %v468_v15 = vld [vmem:[#allocation2 + $0x18] sm:$0xff]  ;;  %v469_v20 = vld [vmem:[#allocation2 + $0x8] sm:$0xff] }
  0x2a   : > { %967 = vmatprep.subr.bf16.mxu0 %v1026_v7 }
  0x2d   : > { %968 = vmatpush3.bf16.msra.mxu0 %v1026_v7 }
  0x2e   : > { %969 = vmatprep.subr.bf16.mxu0 %v1027_v8 }
  0x31   : > { %970 = vmatpush3.bf16.msra.mxu0 %v1027_v8 }
  0x32   : > { %971 = vmatprep.subr.bf16.mxu0 %v1028_v10 }
  0x35   : > { %972 = vmatpush3.bf16.msra.mxu0 %v1028_v10 }
  0x36   : > { %973 = vmatprep.subr.bf16.mxu0 %v1029_v11 }
  0x39   : > { %974 = vmatpush3.bf16.msra.mxu0 %v1029_v11 }
  0x3a   : > { %975 = vmatprep.subr.bf16.mxu0 %v1030_v12 }
  0x3d   : > { %976 = vmatpush3.bf16.msra.mxu0 %v1030_v12 }
  0x3e   : > { %977 = vmatprep.subr.bf16.mxu0 %v1031_v13 }
  0x41   : > { %978 = vmatpush3.bf16.msra.mxu0 %v1031_v13 }
  0x44   : > { %980 = vmatmul.mubr.bf16.vlgmr.msra.gmra.mxu0 %v1033_v14 }
 0x104   : > { %v981_v16 = vpop.f32.mrf.mxu0 }
 0x105   : > { %v601_v18 = vadd.f32 %v981_v16, %v468_v15 }
 0x106   : > { %v584_v19 = vpop.f32.mrf.mxu0 }
 0x107   : > { %605 = vst [vmem:[#allocation2 + $0x18] sm:$0xff] %v601_v18  ;;  %v599_v21 = vadd.f32 %v584_v19, %v466_v17 }
 0x108   : > { %v982_v22 = vpop.f32.mrf.mxu0 }
 0x109   : > { %603 = vst [vmem:[#allocation2 + $0x10] sm:$0xff] %v599_v21  ;;  %v602_v24 = vadd.f32 %v982_v22, %v469_v20  ;;  %610 = sbr.rel (%p897_p11) target bundleno = 288 (0x120), region = 89 }
 0x10a   : > { %v587_v25 = vpop.f32.mrf.mxu0 }
 0x10b   : > { %606 = vst [vmem:[#allocation2 + $0x8] sm:$0xff] %v602_v24  ;;  %v600_v26 = vadd.f32 %v587_v25, %v467_v23 }
 0x10d   : > { %604 = vst [vmem:[#allocation2] sm:$0xff] %v600_v26 }
 0x10e   : > { %v923_v29 = vld [vmem:[%s1220_s2] sm:$0xff]   ;;  %v613_v33 = vld [vmem:[#allocation2 + $0x18] sm:$0xff]  ;;  %v950_v34 = vld [vmem:[%s1220_s2 + $0x8] sm:$0xff]  }
 0x10f   : > { %v924_v30 = vunpack.c.l.bf16 %v923_v29  ;;  %v925_v31 = vunpack.c.h.bf16 %v923_v29  ;;  %v902_v32 = vld [vmem:[%s1221_s3] ss:$0 sm:$0xff]  ;;  %v928_v38 = vunpack.c.l.bf16 %v950_v34  ;;  %v929_v39 = vunpack.c.h.bf16 %v950_v34 }
 0x110   : > { %v611_v27 = vld [vmem:[#allocation2 + $0x10] sm:$0xff]  ;;  %v903_v40 = vld [vmem:[%s1222_s4] ss:$0 sm:$0xff] }
 0x111   : > { %v623_v35 = vadd.f32 %v924_v30, %v611_v27  ;;  %v625_v44 = vadd.f32 %v928_v38, %v613_v33 }
 0x112   : > { %v614_v37 = vld [vmem:[#allocation2 + $0x8] sm:$0xff] }
 0x113   : > { %v654_v42 = vmul.f32 %v902_v32, %v623_v35  ;;  %v626_v45 = vadd.f32 %v929_v39, %v614_v37  ;;  %v656_v46 = vmul.f32 %v902_v32, %v625_v44 }
 0x114   : > { %v612_v28 = vld [vmem:[#allocation2] sm:$0xff] }
 0x115   : > { %v624_v36 = vadd.f32 %v925_v31, %v612_v28  ;;  %v665_v47 = vadd.f32 %v903_v40, %v654_v42  ;;  %v938_v49 = vpack.c.bf16 %v626_v45, %v625_v44  ;;  %v657_v50 = vmul.f32 %v902_v32, %v626_v45 }
 0x116   : > { %v667_v53 = vadd.f32 %v903_v40, %v656_v46 }
 0x117   : > { %v933_v41 = vpack.c.bf16 %v624_v36, %v623_v35  ;;  %v655_v43 = vmul.f32 %v902_v32, %v624_v36  ;;  %v669_v51 = vmax.f32 %v665_v47, 0.0  ;;  %951 = vst [vmem:[%s1223_s5 + $0x8] sm:$0xff] %v938_v49   ;;  %v668_v54 = vadd.f32 %v903_v40, %v657_v50 }
 0x118   : > { %v671_v56 = vmax.f32 %v667_v53, 0.0 }
 0x119   : > { %934 = vst [vmem:[%s1223_s5] sm:$0xff] %v933_v41   ;;  %v666_v48 = vadd.f32 %v903_v40, %v655_v43  ;;  %v672_v57 = vmax.f32 %v668_v54, 0.0 }
 0x11b   : > { %v670_v52 = vmax.f32 %v666_v48, 0.0  ;;  %v948_v58 = vpack.c.bf16 %v672_v57, %v671_v56 }
 0x11d   : > { %v943_v55 = vpack.c.bf16 %v670_v52, %v669_v51  ;;  %952 = vst [vmem:[%s1224_s6 + $0x8] sm:$0xff] %v948_v58  }
 0x11f   : > { %944 = vst [vmem:[%s1224_s6] sm:$0xff] %v943_v55  }
 0x120 PF: > { %s17_s25 = sadd.s32 1, %s1072_s25   ;;  %s1225_s21 = smov %s1060_s22 }
 0x121   : > { %p14_p12 = scmp.ge.s32.totalorder %s17_s25, 11   ;;  %s1226_s22 = smov %s1145_s29 }
 0x122   : > { %s1227_s23 = smov %s1068_s24  ;;  %s1228_s24 = smov %s1230_s26 }
 0x123   :  { %16 = sbr.rel (!%p14_p12) target bundleno = 3 (0x3), region = 148 }

// kernel: _lambda_.17
= control target key start
LH: loop header
LB: loop body
LE: loop exit
PB: predicated region body
PF: predicated region fallthrough
CT: control target
= control target key end

     0   :  { %v182_v0 = vmov 0.0   ;;  %vm183_vm0 = vmmov 0   ;;  %s229_s1 = inlined_call_operand.vmem [shape: bf16[128,128], index: 1, kind: input, shape index: {}]   ;;  %s230_s0 = inlined_call_operand.vmem [shape: bf16[8,128], index: 0, kind: input, shape index: {}]   ;;  %s231_s2 = inlined_call_operand.vmem [shape: bf16[8,128], index: 2, kind: output, shape index: {}]  }
   0x1   :  { %152 = vmatprep.subr.bf16.mxu0 %v182_v0  ;;  %v174_v1 = vld [vmem:[%s229_s1 + $0x38] sm:$0xff]   ;;  %168 = vmatprep.mubr.msk.bf16.mxu0 %vm183_vm0, %v182_v0  ;;  %v175_v2 = vld [vmem:[%s229_s1 + $0x30] sm:$0xff]   ;;  %v176_v3 = vld [vmem:[%s229_s1 + $0x28] sm:$0xff]  }
   0x2   :  { %153 = vmatpush3.bf16.msra.mxu0 %v174_v1  ;;  %v177_v4 = vld [vmem:[%s229_s1 + $0x20] sm:$0xff]   ;;  %v178_v5 = vld [vmem:[%s229_s1 + $0x18] sm:$0xff]   ;;  %v179_v6 = vld [vmem:[%s229_s1 + $0x10] sm:$0xff]  }
   0x3   :  { %154 = vmatprep.subr.bf16.mxu0 %v182_v0  ;;  %v180_v7 = vld [vmem:[%s229_s1 + $0x8] sm:$0xff]   ;;  %v181_v8 = vld [vmem:[%s229_s1] sm:$0xff]  }
   0x4   :  { %v18_v9 = vld [vmem:[%s230_s0] sm:$0xf] }
   0x6   :  { %155 = vmatpush3.bf16.msra.mxu0 %v175_v2 }
   0x7   :  { %156 = vmatprep.subr.bf16.mxu0 %v182_v0 }
   0xa   :  { %157 = vmatpush3.bf16.msra.mxu0 %v176_v3 }
   0xb   :  { %158 = vmatprep.subr.bf16.mxu0 %v182_v0 }
   0xe   :  { %159 = vmatpush3.bf16.msra.mxu0 %v177_v4 }
   0xf   :  { %160 = vmatprep.subr.bf16.mxu0 %v182_v0 }
  0x12   :  { %161 = vmatpush3.bf16.msra.mxu0 %v178_v5 }
  0x13   :  { %162 = vmatprep.subr.bf16.mxu0 %v182_v0 }
  0x16   :  { %163 = vmatpush3.bf16.msra.mxu0 %v179_v6 }
  0x17   :  { %164 = vmatprep.subr.bf16.mxu0 %v182_v0 }
  0x1a   :  { %165 = vmatpush3.bf16.msra.mxu0 %v180_v7 }
  0x1b   :  { %166 = vmatprep.subr.bf16.mxu0 %v182_v0 }
  0x1e   :  { %167 = vmatpush3.bf16.msra.mxu0 %v181_v8 }
  0x21   :  { %169 = vmatmul.mubr.bf16.vlgmr.msra.gmra.mxu0 %v18_v9 }
  0xe1   :  { %v117_v10 = vpop.f32.mrf.mxu0 }
  0xe2   :  { %v129_v11 = vpack.c.bf16 %v117_v10, %v117_v10 }
  0xe3   :  { %v170_v12 = vpop.f32.mrf.mxu0 }
  0xe4   :  { %130 = vst [vmem:[%s231_s2] sm:$0xf] %v129_v11 }
  0xe5   :  { %v120_v13 = vpop.f32.mrf.mxu0 }
  0xe7   :  { %v171_v14 = vpop.f32.mrf.mxu0 }

// kernel: _lambda_.16
= control target key start
LH: loop header
LB: loop body
LE: loop exit
PB: predicated region body
PF: predicated region fallthrough
CT: control target
= control target key end

     0   :  { %s622_s12 = smov 0   ;;  %s624_s13 = smov 0   ;;  %s671_s0 = inlined_call_operand.vmem [shape: bf16[8,1152], index: 0, kind: input, shape index: {}]   ;;  %s672_s1 = inlined_call_operand.vmem [shape: bf16[1152,128], index: 1, kind: input, shape index: {}]   ;;  %s673_s2 = inlined_call_operand.vmem [shape: f32[1,128], index: 2, kind: input, shape index: {}]   ;;  %s674_s3 = inlined_call_operand.vmem [shape: bf16[8,128], index: 3, kind: output, shape index: {}]  }
   0x1   :  { %s626_s14 = smov 0  }
   0x2 LB: > { %s25_s15 = sadd.s32 1, %s593_s13  ;;  %p493_p0 = scmp.ge.s32.totalorder %s597_s14, 1  ;;  %s597_s14 = sphi %s626_s14, %s13_s14   ;;  %s593_s13 = sphi %s624_s13, %s676_s13   ;;  %s589_s12 = sphi %s622_s12, %s675_s12  }
   0x3   : > { %p26_p1 = scmp.ge.s32.totalorder %s25_s15, 9  ;;  %p187_p2 = scmp.lt.s32.totalorder %s597_s14, 10 }
   0x5   : > { %s678_s15 = smov (%p26_p1, %s25_s15), 0  ;;  %p188_p3 = pnand %p493_p0, %p187_p2 }
   0x6   : > { %p229_p4 = scmp.lt.s32.totalorder (!%p188_p3), %s589_s12, 8  ;;  %s495_s16 = sshll.u32 (!%p188_p3), %s589_s12, 4 }
   0x7   : > { %191 = sbr.rel (%p188_p3) target bundleno = 263 (0x107), region = 32  ;;  %p236_p5 = scmp.lt.s32.totalorder (!%p188_p3), %s495_s16, 143 }
   0x8   : > { %p497_p6 = scmp.ne.s32.totalorder (!%p188_p3), %s589_s12, 0 }
   0xc   : > { %s230_s17 = scalar_select %p229_p4, %s589_s12, 8 }
   0xd   : > { %s680_s16 = smov (!%p236_p5, %s495_s16), 143  ;;  %258 = sbr.rel (%p497_p6) target bundleno = 20 (0x14), region = 36 }
   0xe   : > { %s494_s18 = sshll.u32 %s230_s17, 2  ;;  %s496_s22 = sshll.u32 %s680_s16, 2 }
   0xf   : > { %s648_s21 = scalar_lea.vmem %s671_s0, %s494_s18  ;;  %s242_s25 = scalar_lea.vmem %s672_s1, %s496_s22 }
  0x12   : > { %v599_v0 = vmov 0.0  }
  0x13   : > { %259 = vst [vmem:[#allocation2] sm:$0xff] %v599_v0 }
  0x14 PF: > { %v567_v1 = vld [vmem:[%s242_s25 + $0x38] sm:$0xff]   ;;  %v600_v2 = vmov 0.0   ;;  %v568_v3 = vld [vmem:[%s242_s25 + $0x30] sm:$0xff]   ;;  %vm601_vm0 = vmmov 0   ;;  %v569_v4 = vld [vmem:[%s242_s25 + $0x28] sm:$0xff]   ;;  %p506_p7 = scmp.ne.s32.totalorder %s589_s12, 8 }
  0x15   : > { %520 = vmatprep.subr.bf16.mxu0 %v600_v2  ;;  %536 = vmatprep.mubr.msk.bf16.mxu0 %vm601_vm0, %v600_v2  ;;  %v570_v5 = vld [vmem:[%s242_s25 + $0x20] sm:$0xff]   ;;  %v571_v6 = vld [vmem:[%s242_s25 + $0x18] sm:$0xff]   ;;  %v572_v7 = vld [vmem:[%s242_s25 + $0x10] sm:$0xff]  }
  0x16   : > { %521 = vmatpush3.bf16.msra.mxu0 %v567_v1  ;;  %v573_v8 = vld [vmem:[%s242_s25 + $0x8] sm:$0xff]   ;;  %v574_v9 = vld [vmem:[%s242_s25] sm:$0xff]  }
  0x17   : > { %522 = vmatprep.subr.bf16.mxu0 %v600_v2  ;;  %v261_v10 = vld [vmem:[%s648_s21] sm:$0xf] }
  0x1a   : > { %523 = vmatpush3.bf16.msra.mxu0 %v568_v3  ;;  %v260_v11 = vld [vmem:[#allocation2] sm:$0xff] }
  0x1b   : > { %524 = vmatprep.subr.bf16.mxu0 %v600_v2 }
  0x1e   : > { %525 = vmatpush3.bf16.msra.mxu0 %v569_v4 }
  0x1f   : > { %526 = vmatprep.subr.bf16.mxu0 %v600_v2 }
  0x22   : > { %527 = vmatpush3.bf16.msra.mxu0 %v570_v5 }
  0x23   : > { %528 = vmatprep.subr.bf16.mxu0 %v600_v2 }
  0x26   : > { %529 = vmatpush3.bf16.msra.mxu0 %v571_v6 }
  0x27   : > { %530 = vmatprep.subr.bf16.mxu0 %v600_v2 }
  0x2a   : > { %531 = vmatpush3.bf16.msra.mxu0 %v572_v7 }
  0x2b   : > { %532 = vmatprep.subr.bf16.mxu0 %v600_v2 }
  0x2e   : > { %533 = vmatpush3.bf16.msra.mxu0 %v573_v8 }
  0x2f   : > { %534 = vmatprep.subr.bf16.mxu0 %v600_v2 }
  0x32   : > { %535 = vmatpush3.bf16.msra.mxu0 %v574_v9 }
  0x35   : > { %537 = vmatmul.mubr.bf16.vlgmr.msra.gmra.mxu0 %v261_v10 }
  0xf5   : > { %v360_v12 = vpop.f32.mrf.mxu0 }
  0xf6   : > { %v366_v13 = vadd.f32 %v360_v12, %v260_v11 }
  0xf7   : > { %v538_v14 = vpop.f32.mrf.mxu0  ;;  %371 = sbr.rel (%p506_p7) target bundleno = 263 (0x107), region = 40 }
  0xf8   : > { %367 = vst [vmem:[#allocation2] sm:$0xff] %v366_v13 }
  0xf9   : > { %v363_v15 = vpop.f32.mrf.mxu0 }
  0xfb   : > { %v539_v16 = vpop.f32.mrf.mxu0 }
  0xfc   : > { %v507_v18 = vld [vmem:[%s673_s2] ss:$0 sm:$0xff] }
  0xff   : > { %v372_v17 = vld [vmem:[#allocation2] sm:$0xff] }
 0x100   : > { %v380_v19 = vadd.f32 %v507_v18, %v372_v17 }
 0x102   : > { %v381_v20 = vmax.f32 %v380_v19, 0.0 }
 0x104   : > { %v382_v21 = vpack.c.bf16 %v381_v20, %v381_v20 }
 0x106   : > { %383 = vst [vmem:[%s674_s3] sm:$0xf] %v382_v21 }
 0x107 PF: > { %s13_s14 = sadd.s32 1, %s597_s14   ;;  %s675_s12 = smov %s593_s13 }
 0x108   : > { %p10_p8 = scmp.ge.s32.totalorder %s13_s14, 11   ;;  %s676_s13 = smov %s678_s15 }
 0x10a   :  { %12 = sbr.rel (!%p10_p8) target bundleno = 2 (0x2), region = 76 }

// kernel: _lambda_.19
= control target key start
LH: loop header
LB: loop body
LE: loop exit
PB: predicated region body
PF: predicated region fallthrough
CT: control target
= control target key end

     0   :  { %v315_v0 = vmov 0.0   ;;  %vm316_vm0 = vmmov 0   ;;  %vm31_vm1 = vcmask 1043456   ;;  %vm144_vm2 = vcmask 1041409   ;;  %s411_s1 = inlined_call_operand.vmem [shape: bf16[128,128], index: 1, kind: input, shape index: {}]   ;;  %s412_s0 = inlined_call_operand.vmem [shape: bf16[8,4,128], index: 0, kind: input, shape index: {}]   ;;  %s413_s2 = inlined_call_operand.vmem [shape: f32[1,128], index: 2, kind: input, shape index: {}]   ;;  %s414_s3 = inlined_call_operand.vmem [shape: f32[8,128], index: 3, kind: output, shape index: {}]  }
   0x1   :  { %281 = vmatprep.subr.bf16.mxu0 %v315_v0  ;;  %v303_v1 = vld [vmem:[%s411_s1 + $0x38] sm:$0xff]   ;;  %297 = vmatprep.mubr.msk.bf16.mxu0 %vm316_vm0, %v315_v0  ;;  %v304_v2 = vld [vmem:[%s411_s1 + $0x30] sm:$0xff]   ;;  %v305_v3 = vld [vmem:[%s411_s1 + $0x28] sm:$0xff]   ;;  %vm146_vm3 = vcmask 1042434   ;;  %vm148_vm4 = vcmask 1043459   ;;  %vm150_vm5 = vcmask 1044484  }
   0x2   :  { %282 = vmatpush3.bf16.msra.mxu0 %v303_v1  ;;  %v15_v4 = vld [vmem:[%s412_s0] sm:$0x3]  ;;  %v16_v5 = vld [vmem:[%s412_s0 + $0x2] sm:$0x3]  ;;  %v17_v6 = vld [vmem:[%s412_s0 + $0x4] sm:$0x3] }
   0x3   :  { %283 = vmatprep.subr.bf16.mxu0 %v315_v0  ;;  %v18_v7 = vld [vmem:[%s412_s0 + $0x6] sm:$0x3]  ;;  %v19_v8 = vld [vmem:[%s412_s0 + $0x8] sm:$0x3]  ;;  %v20_v9 = vld [vmem:[%s412_s0 + $0xa] sm:$0x3]  ;;  %v23_v10 = vunpack.c.l.bf16 %v15_v4  ;;  %v24_v11 = vunpack.c.l.bf16 %v16_v5  ;;  %v25_v12 = vunpack.c.l.bf16 %v17_v6 }
   0x4   :  { %v306_v13 = vld [vmem:[%s411_s1 + $0x20] sm:$0xff]   ;;  %v21_v14 = vld [vmem:[%s412_s0 + $0xc] sm:$0x3]  ;;  %v22_v15 = vld [vmem:[%s412_s0 + $0xe] sm:$0x3]  ;;  %v26_v16 = vunpack.c.l.bf16 %v18_v7  ;;  %v27_v17 = vunpack.c.l.bf16 %v19_v8  ;;  %v28_v18 = vunpack.c.l.bf16 %v20_v9  ;;  %vm152_vm6 = vcmask 1045509  }
   0x5   :  { %v29_v19 = vunpack.c.l.bf16 %v21_v14  ;;  %v30_v20 = vunpack.c.l.bf16 %v22_v15  ;;  %v32_v21 = vsel %vm31_vm1, %v23_v10, 0.0  ;;  %v39_v22 = vsel %vm31_vm1, %v24_v11, 0.0  ;;  %v307_v31 = vld [vmem:[%s411_s1 + $0x18] sm:$0xff]   ;;  %v308_v48 = vld [vmem:[%s411_s1 + $0x10] sm:$0xff]  }
   0x6   :  { %284 = vmatpush3.bf16.msra.mxu0 %v304_v2  ;;  %v33_v23 = vrot.slane %v32_v21, 4  ;;  %v40_v24 = vrot.slane %v39_v22, 4  ;;  %v46_v25 = vsel %vm31_vm1, %v25_v12, 0.0  ;;  %v53_v26 = vsel %vm31_vm1, %v26_v16, 0.0  ;;  %v309_v2 = vld [vmem:[%s411_s1 + $0x8] sm:$0xff]  }
   0x7   :  { %285 = vmatprep.subr.bf16.mxu0 %v315_v0  ;;  %v47_v27 = vrot.slane %v46_v25, 4  ;;  %v54_v28 = vrot.slane %v53_v26, 4  ;;  %v60_v29 = vsel %vm31_vm1, %v27_v17, 0.0  ;;  %v67_v30 = vsel %vm31_vm1, %v28_v18, 0.0 }
   0x8   :  { %v34_v32 = vadd.f32 %v33_v23, %v32_v21  ;;  %v41_v33 = vadd.f32 %v40_v24, %v39_v22  ;;  %v61_v34 = vrot.slane %v60_v29, 4  ;;  %v68_v35 = vrot.slane %v67_v30, 4 }
   0x9   :  { %v48_v36 = vadd.f32 %v47_v27, %v46_v25  ;;  %v55_v37 = vadd.f32 %v54_v28, %v53_v26  ;;  %v74_v38 = vsel %vm31_vm1, %v29_v19, 0.0  ;;  %v81_v39 = vsel %vm31_vm1, %v30_v20, 0.0  ;;  %v310_v19 = vld [vmem:[%s411_s1] sm:$0xff]  }
   0xa   :  { %286 = vmatpush3.bf16.msra.mxu0 %v305_v3  ;;  %v35_v40 = vrot.slane %v34_v32, 2  ;;  %v42_v41 = vrot.slane %v41_v33, 2  ;;  %v62_v42 = vadd.f32 %v61_v34, %v60_v29  ;;  %v69_v43 = vadd.f32 %v68_v35, %v67_v30 }
   0xb   :  { %287 = vmatprep.subr.bf16.mxu0 %v315_v0  ;;  %v49_v44 = vrot.slane %v48_v36, 2  ;;  %v56_v45 = vrot.slane %v55_v37, 2  ;;  %v75_v46 = vrot.slane %v74_v38, 4  ;;  %v82_v47 = vrot.slane %v81_v39, 4 }
   0xc   :  { %v36_v49 = vadd.f32 %v35_v40, %v34_v32  ;;  %v43_v50 = vadd.f32 %v42_v41, %v41_v33  ;;  %v63_v51 = vrot.slane %v62_v42, 2  ;;  %v70_v52 = vrot.slane %v69_v43, 2 }
   0xd   :  { %v50_v53 = vadd.f32 %v49_v44, %v48_v36  ;;  %v57_v54 = vadd.f32 %v56_v45, %v55_v37  ;;  %v76_v55 = vadd.f32 %v75_v46, %v74_v38  ;;  %v83_v56 = vadd.f32 %v82_v47, %v81_v39 }
   0xe   :  { %288 = vmatpush3.bf16.msra.mxu0 %v306_v13  ;;  %v37_v57 = vrot.slane %v36_v49, 1  ;;  %v44_v58 = vrot.slane %v43_v50, 1  ;;  %v64_v59 = vadd.f32 %v63_v51, %v62_v42  ;;  %v71_v60 = vadd.f32 %v70_v52, %v69_v43 }
   0xf   :  { %289 = vmatprep.subr.bf16.mxu0 %v315_v0  ;;  %v51_v61 = vrot.slane %v50_v53, 1  ;;  %v58_v62 = vrot.slane %v57_v54, 1  ;;  %v77_v63 = vrot.slane %v76_v55, 2  ;;  %v84_v1 = vrot.slane %v83_v56, 2 }
  0x10   :  { %v38_v3 = vadd.f32 %v37_v57, %v36_v49  ;;  %v45_v4 = vadd.f32 %v44_v58, %v43_v50  ;;  %v65_v5 = vrot.slane %v64_v59, 1  ;;  %v72_v6 = vrot.slane %v71_v60, 1  ;;  %v263_v49 = vld [vmem:[%s413_s2] ss:$0 sm:$0xff] }
  0x11   :  { %v52_v7 = vadd.f32 %v51_v61, %v50_v53  ;;  %v59_v8 = vadd.f32 %v58_v62, %v57_v54  ;;  %v78_v9 = vadd.f32 %v77_v63, %v76_v55  ;;  %v85_v10 = vadd.f32 %v84_v1, %v83_v56 }
  0x12   :  { %290 = vmatpush3.bf16.msra.mxu0 %v307_v31  ;;  %v66_v11 = vadd.f32 %v65_v5, %v64_v59  ;;  %v73_v12 = vadd.f32 %v72_v6, %v71_v60  ;;  %v89_v13 = vmul.f32 0.25, %v38_v3  ;;  %v90_v14 = vmul.f32 0.25, %v45_v4 }
  0x13   :  { %291 = vmatprep.subr.bf16.mxu0 %v315_v0  ;;  %v79_v15 = vrot.slane %v78_v9, 1  ;;  %v86_v16 = vrot.slane %v85_v10, 1  ;;  %v91_v17 = vmul.f32 0.25, %v52_v7  ;;  %v92_v18 = vmul.f32 0.25, %v59_v8 }
  0x14   :  { %v93_v20 = vmul.f32 0.25, %v66_v11  ;;  %v94_v21 = vmul.f32 0.25, %v73_v12  ;;  %v97_v22 = vpack.c.bf16 %v89_v13, %v89_v13  ;;  %v98_v23 = vpack.c.bf16 %v90_v14, %v90_v14 }
  0x15   :  { %v80_v24 = vadd.f32 %v79_v15, %v78_v9  ;;  %v87_v25 = vadd.f32 %v86_v16, %v85_v10  ;;  %v99_v26 = vpack.c.bf16 %v91_v17, %v91_v17  ;;  %v100_v27 = vpack.c.bf16 %v92_v18, %v92_v18 }
  0x16   :  { %292 = vmatpush3.bf16.msra.mxu0 %v308_v48  ;;  %v101_v28 = vpack.c.bf16 %v93_v20, %v93_v20  ;;  %v102_v29 = vpack.c.bf16 %v94_v21, %v94_v21  ;;  %v136_v30 = vunpack.c.l.b16 %v97_v22  ;;  %v137_v31 = vunpack.c.l.b16 %v98_v23 }
  0x17   :  { %293 = vmatprep.subr.bf16.mxu0 %v315_v0  ;;  %v95_v32 = vmul.f32 0.25, %v80_v24  ;;  %v96_v33 = vmul.f32 0.25, %v87_v25  ;;  %v138_v34 = vunpack.c.l.b16 %v99_v26  ;;  %v139_v35 = vunpack.c.l.b16 %v100_v27 }
  0x18   :  { %v140_v36 = vunpack.c.l.b16 %v101_v28  ;;  %v141_v37 = vunpack.c.l.b16 %v102_v29  ;;  %v145_v38 = vsel %vm144_vm2, %v137_v31, %v136_v30  ;;  %vm154_vm7 = vcmask 1046534  }
  0x19   :  { %v103_v39 = vpack.c.bf16 %v95_v32, %v95_v32  ;;  %v147_v40 = vsel %vm146_vm3, %v138_v34, %v145_v38  ;;  %vm156_vm8 = vcmask 1047559  }
  0x1a   :  { %294 = vmatpush3.bf16.msra.mxu0 %v309_v2  ;;  %v149_v41 = vsel %vm148_vm4, %v139_v35, %v147_v40 }
  0x1b   :  { %295 = vmatprep.subr.bf16.mxu0 %v315_v0  ;;  %v104_v0 = vpack.c.bf16 %v96_v33, %v96_v33  ;;  %v142_v42 = vunpack.c.l.b16 %v103_v39  ;;  %v151_v44 = vsel %vm150_vm5, %v140_v36, %v149_v41 }
  0x1c   :  { %v153_v45 = vsel %vm152_vm6, %v141_v37, %v151_v44 }
  0x1d   :  { %v143_v43 = vunpack.c.l.b16 %v104_v0  ;;  %v155_v46 = vsel %vm154_vm7, %v142_v42, %v153_v45 }
  0x1e   :  { %296 = vmatpush3.bf16.msra.mxu0 %v310_v19 }
  0x1f   :  { %v157_v47 = vsel %vm156_vm8, %v143_v43, %v155_v46 }
  0x20   :  { %v158_v48 = vpack.c.b16 %v157_v47, %v157_v47 }
  0x22   :  { %298 = vmatmul.mubr.bf16.vlgmr.msra.gmra.mxu0 %v158_v48 }
  0xe2   :  { %v242_v50 = vpop.f32.mrf.mxu0 }
  0xe3   :  { %v243_v51 = vadd.f32 %v263_v49, %v242_v50 }
  0xe4   :  { %v299_v52 = vpop.f32.mrf.mxu0 }
  0xe5   :  { %248 = vmax.xlane.f32.xlu0 %v243_v51 }
  0xe6   :  { %v245_v53 = vpop.f32.mrf.mxu0 }
  0xe8   :  { %v300_v54 = vpop.f32.mrf.mxu0 }
 0x16e   :  { %v249_v55 = vpop.xlane.xlu0 %248 }
 0x16f   :  { %v250_v56 = vsub.f32 %v243_v51, %v249_v55 }
 0x171   :  { %v251_v57 = vmul.f32 1.442695, %v250_v56 }
 0x173   :  { %311 = vpow2.f32 %v251_v57 }
 0x180   :  { %v312_v58 = vpop.eup %311 }
 0x181   :  { %253 = vadd.xlane.f32.xlu0 %v312_v58 }
 0x20a   :  { %v254_v59 = vpop.xlane.xlu0 %253 }
 0x20b   :  { %313 = vlog2.f32 %v254_v59 }
 0x218   :  { %v314_v60 = vpop.eup %313 }
 0x219   :  { %v256_v61 = vmul.f32 0.6931472, %v314_v60 }
 0x21b   :  { %v257_v62 = vsub.f32 %v250_v56, %v256_v61 }
 0x21d   :  { %258 = vst [vmem:[%s414_s3] sm:$0xff] %v257_v62 }

// kernel: _lambda_.18
= control target key start
LH: loop header
LB: loop body
LE: loop exit
PB: predicated region body
PF: predicated region fallthrough
CT: control target
= control target key end

     0   :  { %s772_s18 = smov 0   ;;  %s774_s19 = smov 0   ;;  %s827_s0 = inlined_call_operand.vmem [shape: bf16[8,1152], index: 0, kind: input, shape index: {}]   ;;  %s828_s1 = inlined_call_operand.vmem [shape: bf16[1152,128], index: 1, kind: input, shape index: {}]   ;;  %s829_s2 = inlined_call_operand.vmem [shape: bf16[8,128], index: 2, kind: input, shape index: {}]   ;;  %s830_s3 = inlined_call_operand.vmem [shape: f32[1,128], index: 3, kind: input, shape index: {}]   ;;  %s831_s4 = inlined_call_operand.vmem [shape: f32[1,128], index: 4, kind: input, shape index: {}]   ;;  %s832_s5 = inlined_call_operand.vmem [shape: bf16[8,128], index: 5, kind: output, shape index: {}]  }
   0x1   :  { %s776_s20 = smov 0  }
   0x2 LB: > { %s27_s21 = sadd.s32 1, %s733_s19  ;;  %p632_p0 = scmp.ge.s32.totalorder %s737_s20, 1  ;;  %s737_s20 = sphi %s776_s20, %s15_s20   ;;  %s733_s19 = sphi %s774_s19, %s834_s19   ;;  %s729_s18 = sphi %s772_s18, %s833_s18  }
   0x3   : > { %p28_p1 = scmp.ge.s32.totalorder %s27_s21, 9  ;;  %p259_p2 = scmp.lt.s32.totalorder %s737_s20, 10 }
   0x5   : > { %s836_s21 = smov (%p28_p1, %s27_s21), 0  ;;  %p260_p3 = pnand %p632_p0, %p259_p2 }
   0x6   : > { %p315_p4 = scmp.lt.s32.totalorder (!%p260_p3), %s729_s18, 8  ;;  %s634_s22 = sshll.u32 (!%p260_p3), %s729_s18, 4 }
   0x7   : > { %263 = sbr.rel (%p260_p3) target bundleno = 267 (0x10b), region = 40  ;;  %p322_p5 = scmp.lt.s32.totalorder (!%p260_p3), %s634_s22, 143 }
   0x8   : > { %p636_p6 = scmp.ne.s32.totalorder (!%p260_p3), %s729_s18, 0 }
   0xc   : > { %s316_s23 = scalar_select %p315_p4, %s729_s18, 8 }
   0xd   : > { %s838_s22 = smov (!%p322_p5, %s634_s22), 143  ;;  %354 = sbr.rel (%p636_p6) target bundleno = 20 (0x14), region = 44 }
   0xe   : > { %s633_s24 = sshll.u32 %s316_s23, 2  ;;  %s635_s28 = sshll.u32 %s838_s22, 2 }
   0xf   : > { %s798_s27 = scalar_lea.vmem %s827_s0, %s633_s24  ;;  %s328_s6 = scalar_lea.vmem %s828_s1, %s635_s28 }
  0x12   : > { %v739_v0 = vmov 0.0  }
  0x13   : > { %355 = vst [vmem:[#allocation2] sm:$0xff] %v739_v0 }
  0x14 PF: > { %v707_v1 = vld [vmem:[%s328_s6 + $0x38] sm:$0xff]   ;;  %v740_v2 = vmov 0.0   ;;  %v708_v3 = vld [vmem:[%s328_s6 + $0x30] sm:$0xff]   ;;  %vm741_vm0 = vmmov 0   ;;  %v709_v4 = vld [vmem:[%s328_s6 + $0x28] sm:$0xff]   ;;  %p645_p7 = scmp.ne.s32.totalorder %s729_s18, 8 }
  0x15   : > { %660 = vmatprep.subr.bf16.mxu0 %v740_v2  ;;  %676 = vmatprep.mubr.msk.bf16.mxu0 %vm741_vm0, %v740_v2  ;;  %v710_v5 = vld [vmem:[%s328_s6 + $0x20] sm:$0xff]   ;;  %v711_v6 = vld [vmem:[%s328_s6 + $0x18] sm:$0xff]   ;;  %v712_v7 = vld [vmem:[%s328_s6 + $0x10] sm:$0xff]  }
  0x16   : > { %661 = vmatpush3.bf16.msra.mxu0 %v707_v1  ;;  %v713_v8 = vld [vmem:[%s328_s6 + $0x8] sm:$0xff]   ;;  %v714_v9 = vld [vmem:[%s328_s6] sm:$0xff]  }
  0x17   : > { %662 = vmatprep.subr.bf16.mxu0 %v740_v2  ;;  %v357_v10 = vld [vmem:[%s798_s27] sm:$0xf] }
  0x1a   : > { %663 = vmatpush3.bf16.msra.mxu0 %v708_v3  ;;  %v356_v11 = vld [vmem:[#allocation2] sm:$0xff] }
  0x1b   : > { %664 = vmatprep.subr.bf16.mxu0 %v740_v2 }
  0x1e   : > { %665 = vmatpush3.bf16.msra.mxu0 %v709_v4 }
  0x1f   : > { %666 = vmatprep.subr.bf16.mxu0 %v740_v2 }
  0x22   : > { %667 = vmatpush3.bf16.msra.mxu0 %v710_v5 }
  0x23   : > { %668 = vmatprep.subr.bf16.mxu0 %v740_v2 }
  0x26   : > { %669 = vmatpush3.bf16.msra.mxu0 %v711_v6 }
  0x27   : > { %670 = vmatprep.subr.bf16.mxu0 %v740_v2 }
  0x2a   : > { %671 = vmatpush3.bf16.msra.mxu0 %v712_v7 }
  0x2b   : > { %672 = vmatprep.subr.bf16.mxu0 %v740_v2 }
  0x2e   : > { %673 = vmatpush3.bf16.msra.mxu0 %v713_v8 }
  0x2f   : > { %674 = vmatprep.subr.bf16.mxu0 %v740_v2 }
  0x32   : > { %675 = vmatpush3.bf16.msra.mxu0 %v714_v9 }
  0x35   : > { %677 = vmatmul.mubr.bf16.vlgmr.msra.gmra.mxu0 %v357_v10 }
  0xf5   : > { %v456_v12 = vpop.f32.mrf.mxu0 }
  0xf6   : > { %v462_v13 = vadd.f32 %v456_v12, %v356_v11 }
  0xf7   : > { %v678_v14 = vpop.f32.mrf.mxu0  ;;  %467 = sbr.rel (%p645_p7) target bundleno = 267 (0x10b), region = 48 }
  0xf8   : > { %463 = vst [vmem:[#allocation2] sm:$0xff] %v462_v13 }
  0xf9   : > { %v459_v15 = vpop.f32.mrf.mxu0 }
  0xfb   : > { %v679_v16 = vpop.f32.mrf.mxu0 }
  0xfc   : > { %v469_v18 = vld [vmem:[%s829_s2] sm:$0xf] }
  0xfd   : > { %v470_v19 = vunpack.c.l.bf16 %v469_v18  ;;  %v646_v20 = vld [vmem:[%s830_s3] ss:$0 sm:$0xff] }
  0xfe   : > { %v647_v22 = vld [vmem:[%s831_s4] ss:$0 sm:$0xff] }
  0xff   : > { %v468_v17 = vld [vmem:[#allocation2] sm:$0xff] }
 0x100   : > { %v471_v21 = vadd.f32 %v470_v19, %v468_v17 }
 0x102   : > { %v479_v23 = vmul.f32 %v646_v20, %v471_v21 }
 0x104   : > { %v487_v24 = vadd.f32 %v647_v22, %v479_v23 }
 0x106   : > { %v488_v25 = vmax.f32 %v487_v24, 0.0 }
 0x108   : > { %v489_v26 = vpack.c.bf16 %v488_v25, %v488_v25 }
 0x10a   : > { %490 = vst [vmem:[%s832_s5] sm:$0xf] %v489_v26 }
 0x10b PF: > { %s15_s20 = sadd.s32 1, %s737_s20   ;;  %s833_s18 = smov %s733_s19 }
 0x10c   : > { %p12_p8 = scmp.ge.s32.totalorder %s15_s20, 11   ;;  %s834_s19 = smov %s836_s21 }
 0x10e   :  { %14 = sbr.rel (!%p12_p8) target bundleno = 2 (0x2), region = 90 }

</bundles_post_ra>
